<compile_context>
chip_gen: v7x
topology: tpu7x:2x2x1
jax: 0.10.0
libtpu: 0.0.40
codegen_flags: <defaults>
</compile_context>

<pallas_src>
import functools
import numpy as np
import jax
import jax.numpy as jnp
from jax.experimental import pallas as pl
from jax.experimental.pallas import tpu as pltpu

_VMEM_LIMIT = 48 * 1024 * 1024
_COMPUTE_DTYPE = jnp.bfloat16


# --------------------------------------------------------------------------
# Fused [zero-pad + concat + palette-broadcast] -> 3x3 conv
#   (+ optional InstanceNorm2d(affine=False, eps=1e-5))
# --------------------------------------------------------------------------
def _conv3x3_kernel(*refs, kinds_cins, nb, H, W, cin_total, cout,
                    apply_norm, use_bias):
    n_in = len(kinds_cins)
    in_refs = refs[:n_in]
    w_ref = refs[n_in]
    idx = n_in + 1
    b_ref = None
    if use_bias:
        b_ref = refs[idx]
        idx += 1
    o_ref = refs[idx]
    xpad_ref = refs[idx + 1]
    cdt = xpad_ref.dtype

    # Zero only the 1-pixel border of the padded scratch; the interior is fully
    # overwritten below.  (Re-zeroed every grid step: scratch is uninitialized
    # and may be per-core on megacore parts.)
    xpad_ref[:, 0:1, :, :] = jnp.zeros((nb, 1, W + 2, cin_total), cdt)
    xpad_ref[:, H + 1:H + 2, :, :] = jnp.zeros((nb, 1, W + 2, cin_total), cdt)
    xpad_ref[:, :, 0:1, :] = jnp.zeros((nb, H + 2, 1, cin_total), cdt)
    xpad_ref[:, :, W + 1:W + 2, :] = jnp.zeros((nb, H + 2, 1, cin_total), cdt)

    # Fused concat: copy each input into its channel slice of the padded tile.
    # Palette inputs are (nb, 1, 18) per-batch constants broadcast over space
    # (never materialized in HBM).
    off = 0
    for (kind, cin), ref in zip(kinds_cins, in_refs):
        if kind == "pal":
            for bb in range(nb):
                row = ref[bb:bb + 1, 0:1, :].astype(cdt)            # (1,1,18)
                xpad_ref[bb:bb + 1, 1:H + 1, 1:W + 1, off:off + cin] = (
                    jnp.broadcast_to(row[:, :, None, :], (1, H, W, cin)))
        else:
            xpad_ref[:, 1:H + 1, 1:W + 1, off:off + cin] = ref[...].astype(cdt)
        off += cin

    # 3x3 conv as 9 shifted (nb*H*W, Cin) @ (Cin, Cout) MXU matmuls,
    # bf16 operands, f32 accumulation.
    acc = jnp.zeros((nb * H * W, cout), jnp.float32)
    for dy in range(3):
        for dx in range(3):
            patch = xpad_ref[:, dy:dy + H, dx:dx + W, :].reshape(
                nb * H * W, cin_total)
            acc = acc + jnp.dot(patch, w_ref[dy, dx],
                                preferred_element_type=jnp.float32)

    if use_bias:
        # Only for the final conv; bias before InstanceNorm(affine=False) is a
        # mathematical no-op and is skipped for the other 8 convs.
        acc = acc + b_ref[...].astype(jnp.float32)

    if apply_norm:
        # InstanceNorm2d(affine=False): per (batch, channel) over spatial dims,
        # biased variance, eps=1e-5, computed in f32.
        a3 = acc.reshape(nb, H * W, cout)
        mean = jnp.mean(a3, axis=1, keepdims=True)
        var = jnp.mean(jnp.square(a3 - mean), axis=1, keepdims=True)
        acc = ((a3 - mean) * jax.lax.rsqrt(var + 1e-5)).reshape(
            nb * H * W, cout)

    o_ref[...] = acc.reshape(nb, H, W, cout).astype(o_ref.dtype)


def conv3x3_fused(entries, w, b=None, *, instance_norm,
                  out_dtype=_COMPUTE_DTYPE):
    """entries: ordered list of ("feat", (B,H,W,C) bf16) / ("pal", (B,1,18) f32).

    Channel order of `entries` must match the input-channel order of `w`
    (3, 3, Cin_total, Cout), i.e. the torch.cat order of the original module.
    """
    feats = [a for k, a in entries if k == "feat"]
    B, H, W = int(feats[0].shape[0]), int(feats[0].shape[1]), int(feats[0].shape[2])
    kinds_cins = tuple((k, int(a.shape[-1])) for k, a in entries)
    cin_total = sum(c for _, c in kinds_cins)
    cout = int(w.shape[-1])
    use_bias = not instance_norm

    # Fold the whole batch into the matmul M dimension while the spatial tile
    # is small (coarse decoder stages) — better MXU utilisation, fewer grid
    # steps.  Large tiles fall back to one batch per grid step.
    nb = B if H * W <= 4096 else 1
    grid = (B // nb,)

    in_specs, operands = [], []
    for kind, arr in entries:
        cin = int(arr.shape[-1])
        if kind == "pal":
            in_specs.append(pl.BlockSpec((nb, 1, cin), lambda g: (g, 0, 0)))
        else:
            in_specs.append(
                pl.BlockSpec((nb, H, W, cin), lambda g: (g, 0, 0, 0)))
        operands.append(arr)
    in_specs.append(
        pl.BlockSpec((3, 3, cin_total, cout), lambda g: (0, 0, 0, 0)))
    operands.append(w.astype(_COMPUTE_DTYPE))
    if use_bias:
        in_specs.append(pl.BlockSpec((1, cout), lambda g: (0, 0)))
        operands.append(b.reshape(1, cout).astype(jnp.float32))

    kern = functools.partial(
        _conv3x3_kernel, kinds_cins=kinds_cins, nb=nb, H=H, W=W,
        cin_total=cin_total, cout=cout, apply_norm=instance_norm,
        use_bias=use_bias)

    return pl.pallas_call(
        kern,
        out_shape=jax.ShapeDtypeStruct((B, H, W, cout), out_dtype),
        grid=grid,
        in_specs=in_specs,
        out_specs=pl.BlockSpec((nb, H, W, cout), lambda g: (g, 0, 0, 0)),
        scratch_shapes=[
            pltpu.VMEM((nb, H + 2, W + 2, cin_total), _COMPUTE_DTYPE)],
        compiler_params=pltpu.CompilerParams(
            dimension_semantics=("parallel",),
            vmem_limit_bytes=_VMEM_LIMIT),
    )(*operands)


# --------------------------------------------------------------------------
# Bilinear x2 upsample (align_corners=True) — separable two-pass matmuls
# --------------------------------------------------------------------------
def _upsample_rows_kernel(x_ref, rh_ref, o_ref):
    # x_ref: (1, H, W*C)   rh_ref: (OH, H)   o_ref: (1, OH, W*C)
    t = jnp.dot(rh_ref[...], x_ref[0], preferred_element_type=jnp.float32)
    o_ref[0] = t.astype(o_ref.dtype)


def _upsample_cols_kernel(t_ref, rw_ref, o_ref):
    # t_ref: (1, OH, W, C)   rw_ref: (OW, W)   o_ref: (1, OH, OW, C)
    _, OH, W, _ = t_ref.shape
    OW = rw_ref.shape[0]
    # Batched matmul over output rows: z[oh] = Rw @ t[oh]   ((OW,W)@(W,C)).
    rwb = jnp.broadcast_to(rw_ref[...][None, :, :], (OH, OW, W))
    z = jax.lax.dot_general(
        rwb, t_ref[0],
        dimension_numbers=(((2,), (1,)), ((0,), (0,))),
        preferred_element_type=jnp.float32)                   # (OH, OW, C)
    o_ref[0] = z.astype(o_ref.dtype)


def _interp_matrix_1d(n_in, n_out):
    # PyTorch bilinear, align_corners=True, 1-D interpolation operator.
    m = np.zeros((n_out, n_in), dtype=np.float32)
    if n_in == 1:
        m[:, 0] = 1.0
        return m
    scale = (n_in - 1) / (n_out - 1)
    for o in range(n_out):
        c = o * scale
        i0 = min(int(np.floor(c)), n_in - 1)
        i1 = min(i0 + 1, n_in - 1)
        f = c - i0
        m[o, i0] += 1.0 - f
        m[o, i1] += f
    return m


def upsample2x_bilinear(x):
    # x: (B, H, W, C) bf16 -> (B, 2H, 2W, C) bf16
    B, H, W, C = (int(d) for d in x.shape)
    OH, OW = 2 * H, 2 * W
    rh = jnp.asarray(_interp_matrix_1d(H, OH), dtype=_COMPUTE_DTYPE)
    rw = jnp.asarray(_interp_matrix_1d(W, OW), dtype=_COMPUTE_DTYPE)
    cp = pltpu.CompilerParams(dimension_semantics=("parallel",),
                              vmem_limit_bytes=_VMEM_LIMIT)

    # Pass 1 (rows): one 2D matmul per batch on the (H, W*C) slab.
    xf = x.reshape(B, H, W * C)
    t = pl.pallas_call(
        _upsample_rows_kernel,
        out_shape=jax.ShapeDtypeStruct((B, OH, W * C), _COMPUTE_DTYPE),
        grid=(B,),
        in_specs=[pl.BlockSpec((1, H, W * C), lambda b: (b, 0, 0)),
                  pl.BlockSpec((OH, H), lambda b: (0, 0))],
        out_specs=pl.BlockSpec((1, OH, W * C), lambda b: (b, 0, 0)),
        compiler_params=cp,
    )(xf, rh)

    # Pass 2 (columns): batched matmul over output rows.
    t4 = t.reshape(B, OH, W, C)
    return pl.pallas_call(
        _upsample_cols_kernel,
        out_shape=jax.ShapeDtypeStruct((B, OH, OW, C), _COMPUTE_DTYPE),
        grid=(B,),
        in_specs=[pl.BlockSpec((1, OH, W, C), lambda b: (b, 0, 0, 0)),
                  pl.BlockSpec((OW, W), lambda b: (0, 0))],
        out_specs=pl.BlockSpec((1, OH, OW, C), lambda b: (b, 0, 0, 0)),
        compiler_params=cp,
    )(t4, rw)


# --------------------------------------------------------------------------
# Parameter init (deterministic, PyTorch-like fan-in uniform)
# --------------------------------------------------------------------------
def _init_conv(key, cin, cout):
    k1, k2 = jax.random.split(key)
    bound = 1.0 / np.sqrt(cin * 9)
    w = jax.random.uniform(k1, (3, 3, cin, cout), jnp.float32, -bound, bound)
    b = jax.random.uniform(k2, (cout,), jnp.float32, -bound, bound)
    return {"w": w, "b": b}


# --------------------------------------------------------------------------
# Full forward pass (inputs/outputs NCHW, exactly like the PyTorch module)
# --------------------------------------------------------------------------
def recoloring_decoder_forward(params, c1, c2, c3, c4, target_palettes_1d, illu):
    def nchw_to_nhwc(t):
        return jnp.transpose(t, (0, 2, 3, 1)).astype(_COMPUTE_DTYPE)

    bz = c1.shape[0]
    # Channel k of batch b is the constant target_palettes_1d[b*18 + k]; the
    # broadcast over (h, w) happens inside the conv kernel (never hits HBM).
    tp = target_palettes_1d.reshape(bz, 1, 18).astype(jnp.float32)
    p = params

    # dconv_up_4: cat(c1, palettes) -> conv+IN -> conv+IN
    x = conv3x3_fused([("feat", nchw_to_nhwc(c1)), ("pal", tp)],
                      p["up4"]["c1"]["w"], instance_norm=True)
    x = conv3x3_fused([("feat", x)], p["up4"]["c2"]["w"], instance_norm=True)
    x = upsample2x_bilinear(x)

    # dconv_up_3: cat(c2, x)
    x = conv3x3_fused([("feat", nchw_to_nhwc(c2)), ("feat", x)],
                      p["up3"]["c1"]["w"], instance_norm=True)
    x = conv3x3_fused([("feat", x)], p["up3"]["c2"]["w"], instance_norm=True)
    x = upsample2x_bilinear(x)

    # dconv_up_2: cat(palettes, c3, x)
    x = conv3x3_fused([("pal", tp), ("feat", nchw_to_nhwc(c3)), ("feat", x)],
                      p["up2"]["c1"]["w"], instance_norm=True)
    x = conv3x3_fused([("feat", x)], p["up2"]["c2"]["w"], instance_norm=True)
    x = upsample2x_bilinear(x)

    # dconv_up_1: cat(palettes, c4, x)
    x = conv3x3_fused([("pal", tp), ("feat", nchw_to_nhwc(c4)), ("feat", x)],
                      p["up1"]["c1"]["w"], instance_norm=True)
    x = conv3x3_fused([("feat", x)], p["up1"]["c2"]["w"], instance_norm=True)
    x = upsample2x_bilinear(x)

    # conv_last: cat(x, illu) -> conv (bias, no norm), f32 output
    illu_nhwc = illu.astype(_COMPUTE_DTYPE)[:, :, :, None]        # (B,H,W,1)
    x = conv3x3_fused([("feat", x), ("feat", illu_nhwc)],
                      p["last"]["w"], p["last"]["b"],
                      instance_norm=False, out_dtype=jnp.float32)  # -> 3
    return jnp.transpose(x, (0, 3, 1, 2))                          # NCHW out


# --------------------------------------------------------------------------
if __name__ == "__main__":
    key = jax.random.PRNGKey(0)
    keys = jax.random.split(key, 16)
    params = {
        "up4": {"c1": _init_conv(keys[0], 18 + 512, 256),
                "c2": _init_conv(keys[1], 256, 256)},
        "up3": {"c1": _init_conv(keys[2], 256 + 256, 128),
                "c2": _init_conv(keys[3], 128, 128)},
        "up2": {"c1": _init_conv(keys[4], 18 + 128 + 128, 64),
                "c2": _init_conv(keys[5], 64, 64)},
        "up1": {"c1": _init_conv(keys[6], 18 + 64 + 64, 64),
                "c2": _init_conv(keys[7], 64, 64)},
        "last": _init_conv(keys[8], 1 + 64, 3),
    }

    bz, h, w = 2, 2, 2   # small shapes: output spatial = 16*h = 32
    c1 = jax.random.normal(keys[9], (bz, 512, h, w), jnp.float32)
    c2 = jax.random.normal(keys[10], (bz, 256, 2 * h, 2 * w), jnp.float32)
    c3 = jax.random.normal(keys[11], (bz, 128, 4 * h, 4 * w), jnp.float32)
    c4 = jax.random.normal(keys[12], (bz, 64, 8 * h, 8 * w), jnp.float32)
    target_palettes_1d = jax.random.uniform(keys[13], (bz * 18,), jnp.float32)
    illu = jax.random.normal(keys[14], (bz, 16 * h, 16 * w), jnp.float32)

    out = recoloring_decoder_forward(params, c1, c2, c3, c4,
                                     target_palettes_1d, illu)
    out = jax.block_until_ready(out)
    assert out.shape == (bz, 3, 16 * h, 16 * w), out.shape
    assert out.dtype == jnp.float32
    assert bool(jnp.isfinite(out).all())
    print("KERNEL_OK")
</pallas_src>

<mosaic_0001>
module attributes {stable_mosaic.version = 11 : i64} {
  func.func @_conv3x3_kernel(%arg0: i32, %arg1: memref<2x2x2x512xbf16, #tpu.memory_space<vmem>>, %arg2: memref<2x1x18xf32, #tpu.memory_space<vmem>>, %arg3: memref<3x3x530x256xbf16, #tpu.memory_space<vmem>>, %arg4: memref<2x2x2x256xbf16, #tpu.memory_space<vmem>>, %arg5: memref<2x4x4x530xbf16, #tpu.memory_space<vmem>>) attributes {dimension_semantics = [#tpu.dimension_semantics<parallel>], iteration_bounds = array<i64: 1>, scalar_prefetch = 0 : i64, scratch_operands = 1 : i64, tpu.core_type = #tpu.core_type<tc>, window_params = [{transform_indices = @transform_0, window_bounds = array<i64: 2, 2, 2, 512>}, {transform_indices = @transform_1, window_bounds = array<i64: 2, 1, 18>}, {pipeline_mode = #tpu.pipeline_mode<synchronous>, transform_indices = @transform_2, window_bounds = array<i64: 3, 3, 530, 256>}, {transform_indices = @transform_3, window_bounds = array<i64: 2, 2, 2, 256>}]} {
    %cst = arith.constant 0.000000e+00 : bf16
    %0 = vector.broadcast %cst : bf16 to vector<2x1x4x530xbf16>
    %c0 = arith.constant 0 : index
    %c0_0 = arith.constant 0 : index
    %c0_1 = arith.constant 0 : index
    %c0_2 = arith.constant 0 : index
    %1 = vector.load %arg5[%c0, %c0_0, %c0_1, %c0_2] : memref<2x4x4x530xbf16, #tpu.memory_space<vmem>>, vector<2x1x4x530xbf16>
    tpu.vector_store %arg5[%c0, %c0_0, %c0_1, %c0_2], %0 {strides = array<i32>} : memref<2x4x4x530xbf16, #tpu.memory_space<vmem>>, vector<2x1x4x530xbf16>,
    %cst_3 = arith.constant 0.000000e+00 : bf16
    %2 = vector.broadcast %cst_3 : bf16 to vector<2x1x4x530xbf16>
    %c0_4 = arith.constant 0 : index
    %c3 = arith.constant 3 : index
    %c0_5 = arith.constant 0 : index
    %c0_6 = arith.constant 0 : index
    %3 = vector.load %arg5[%c0_4, %c3, %c0_5, %c0_6] : memref<2x4x4x530xbf16, #tpu.memory_space<vmem>>, vector<2x1x4x530xbf16>
    tpu.vector_store %arg5[%c0_4, %c3, %c0_5, %c0_6], %2 {strides = array<i32>} : memref<2x4x4x530xbf16, #tpu.memory_space<vmem>>, vector<2x1x4x530xbf16>,
    %cst_7 = arith.constant 0.000000e+00 : bf16
    %4 = vector.broadcast %cst_7 : bf16 to vector<2x4x1x530xbf16>
    %c0_8 = arith.constant 0 : index
    %c0_9 = arith.constant 0 : index
    %c0_10 = arith.constant 0 : index
    %c0_11 = arith.constant 0 : index
    %5 = vector.load %arg5[%c0_8, %c0_9, %c0_10, %c0_11] : memref<2x4x4x530xbf16, #tpu.memory_space<vmem>>, vector<2x4x1x530xbf16>
    tpu.vector_store %arg5[%c0_8, %c0_9, %c0_10, %c0_11], %4 {strides = array<i32>} : memref<2x4x4x530xbf16, #tpu.memory_space<vmem>>, vector<2x4x1x530xbf16>,
    %cst_12 = arith.constant 0.000000e+00 : bf16
    %6 = vector.broadcast %cst_12 : bf16 to vector<2x4x1x530xbf16>
    %c0_13 = arith.constant 0 : index
    %c0_14 = arith.constant 0 : index
    %c3_15 = arith.constant 3 : index
    %c0_16 = arith.constant 0 : index
    %7 = vector.load %arg5[%c0_13, %c0_14, %c3_15, %c0_16] : memref<2x4x4x530xbf16, #tpu.memory_space<vmem>>, vector<2x4x1x530xbf16>
    tpu.vector_store %arg5[%c0_13, %c0_14, %c3_15, %c0_16], %6 {strides = array<i32>} : memref<2x4x4x530xbf16, #tpu.memory_space<vmem>>, vector<2x4x1x530xbf16>,
    %c0_17 = arith.constant 0 : index
    %c0_18 = arith.constant 0 : index
    %c0_19 = arith.constant 0 : index
    %c0_20 = arith.constant 0 : index
    %8 = vector.load %arg1[%c0_17, %c0_18, %c0_19, %c0_20] : memref<2x2x2x512xbf16, #tpu.memory_space<vmem>>, vector<2x2x2x512xbf16>
    %c0_21 = arith.constant 0 : index
    %c1 = arith.constant 1 : index
    %c1_22 = arith.constant 1 : index
    %c0_23 = arith.constant 0 : index
    %9 = vector.load %arg5[%c0_21, %c1, %c1_22, %c0_23] : memref<2x4x4x530xbf16, #tpu.memory_space<vmem>>, vector<2x2x2x512xbf16>
    tpu.vector_store %arg5[%c0_21, %c1, %c1_22, %c0_23], %8 {strides = array<i32>} : memref<2x4x4x530xbf16, #tpu.memory_space<vmem>>, vector<2x2x2x512xbf16>,
    %c0_24 = arith.constant 0 : index
    %c0_25 = arith.constant 0 : index
    %c0_26 = arith.constant 0 : index
    %10 = vector.load %arg2[%c0_24, %c0_25, %c0_26] : memref<2x1x18xf32, #tpu.memory_space<vmem>>, vector<1x1x18xf32>
    %11 = arith.truncf %10 : vector<1x1x18xf32> to vector<1x1x18xbf16>
    %12 = vector.shape_cast %11 : vector<1x1x18xbf16> to vector<1x1x1x18xbf16>
    %13 = vector.shape_cast %12 : vector<1x1x1x18xbf16> to vector<1x1x1x18xbf16>
    %14 = vector.broadcast %13 : vector<1x1x1x18xbf16> to vector<1x2x2x18xbf16>
    %c0_27 = arith.constant 0 : index
    %c1_28 = arith.constant 1 : index
    %c1_29 = arith.constant 1 : index
    %c512 = arith.constant 512 : index
    %15 = vector.load %arg5[%c0_27, %c1_28, %c1_29, %c512] : memref<2x4x4x530xbf16, #tpu.memory_space<vmem>>, vector<1x2x2x18xbf16>
    tpu.vector_store %arg5[%c0_27, %c1_28, %c1_29, %c512], %14 {strides = array<i32>} : memref<2x4x4x530xbf16, #tpu.memory_space<vmem>>, vector<1x2x2x18xbf16>,
    %c1_30 = arith.constant 1 : index
    %c0_31 = arith.constant 0 : index
    %c0_32 = arith.constant 0 : index
    %16 = vector.load %arg2[%c1_30, %c0_31, %c0_32] : memref<2x1x18xf32, #tpu.memory_space<vmem>>, vector<1x1x18xf32>
    %17 = arith.truncf %16 : vector<1x1x18xf32> to vector<1x1x18xbf16>
    %18 = vector.shape_cast %17 : vector<1x1x18xbf16> to vector<1x1x1x18xbf16>
    %19 = vector.shape_cast %18 : vector<1x1x1x18xbf16> to vector<1x1x1x18xbf16>
    %20 = vector.broadcast %19 : vector<1x1x1x18xbf16> to vector<1x2x2x18xbf16>
    %c1_33 = arith.constant 1 : index
    %c1_34 = arith.constant 1 : index
    %c1_35 = arith.constant 1 : index
    %c512_36 = arith.constant 512 : index
    %21 = vector.load %arg5[%c1_33, %c1_34, %c1_35, %c512_36] : memref<2x4x4x530xbf16, #tpu.memory_space<vmem>>, vector<1x2x2x18xbf16>
    tpu.vector_store %arg5[%c1_33, %c1_34, %c1_35, %c512_36], %20 {strides = array<i32>} : memref<2x4x4x530xbf16, #tpu.memory_space<vmem>>, vector<1x2x2x18xbf16>,
    %cst_37 = arith.constant 0.000000e+00 : f32
    %22 = vector.broadcast %cst_37 : f32 to vector<8x256xf32>
    %c0_38 = arith.constant 0 : index
    %c0_39 = arith.constant 0 : index
    %c0_40 = arith.constant 0 : index
    %c0_41 = arith.constant 0 : index
    %23 = vector.load %arg5[%c0_38, %c0_39, %c0_40, %c0_41] : memref<2x4x4x530xbf16, #tpu.memory_space<vmem>>, vector<2x2x2x530xbf16>
    %24 = vector.shape_cast %23 : vector<2x2x2x530xbf16> to vector<8x530xbf16>
    %c0_42 = arith.constant 0 : index
    %c0_43 = arith.constant 0 : index
    %c0_44 = arith.constant 0 : index
    %c0_45 = arith.constant 0 : index
    %25 = vector.load %arg3[%c0_42, %c0_43, %c0_44, %c0_45] : memref<3x3x530x256xbf16, #tpu.memory_space<vmem>>, vector<1x1x530x256xbf16>
    %26 = vector.shape_cast %25 : vector<1x1x530x256xbf16> to vector<530x256xbf16>
    %cst_46 = arith.constant dense<0.000000e+00> : vector<8x256xf32>
    %27 = tpu.matmul %24, %26, %cst_46 {dimension_numbers = #tpu.dot_dimension_numbers<[1], [0], [0], [1], [0, 0, 1, 1], [], []>} : vector<8x530xbf16>, vector<530x256xbf16>, vector<8x256xf32> -> vector<8x256xf32>
    %28 = arith.addf %22, %27 : vector<8x256xf32>
    %c0_47 = arith.constant 0 : index
    %c0_48 = arith.constant 0 : index
    %c1_49 = arith.constant 1 : index
    %c0_50 = arith.constant 0 : index
    %29 = vector.load %arg5[%c0_47, %c0_48, %c1_49, %c0_50] : memref<2x4x4x530xbf16, #tpu.memory_space<vmem>>, vector<2x2x2x530xbf16>
    %30 = vector.shape_cast %29 : vector<2x2x2x530xbf16> to vector<8x530xbf16>
    %c0_51 = arith.constant 0 : index
    %c1_52 = arith.constant 1 : index
    %c0_53 = arith.constant 0 : index
    %c0_54 = arith.constant 0 : index
    %31 = vector.load %arg3[%c0_51, %c1_52, %c0_53, %c0_54] : memref<3x3x530x256xbf16, #tpu.memory_space<vmem>>, vector<1x1x530x256xbf16>
    %32 = vector.shape_cast %31 : vector<1x1x530x256xbf16> to vector<530x256xbf16>
    %cst_55 = arith.constant dense<0.000000e+00> : vector<8x256xf32>
    %33 = tpu.matmul %30, %32, %cst_55 {dimension_numbers = #tpu.dot_dimension_numbers<[1], [0], [0], [1], [0, 0, 1, 1], [], []>} : vector<8x530xbf16>, vector<530x256xbf16>, vector<8x256xf32> -> vector<8x256xf32>
    %34 = arith.addf %28, %33 : vector<8x256xf32>
    %c0_56 = arith.constant 0 : index
    %c0_57 = arith.constant 0 : index
    %c2 = arith.constant 2 : index
    %c0_58 = arith.constant 0 : index
    %35 = vector.load %arg5[%c0_56, %c0_57, %c2, %c0_58] : memref<2x4x4x530xbf16, #tpu.memory_space<vmem>>, vector<2x2x2x530xbf16>
    %36 = vector.shape_cast %35 : vector<2x2x2x530xbf16> to vector<8x530xbf16>
    %c0_59 = arith.constant 0 : index
    %c2_60 = arith.constant 2 : index
    %c0_61 = arith.constant 0 : index
    %c0_62 = arith.constant 0 : index
    %37 = vector.load %arg3[%c0_59, %c2_60, %c0_61, %c0_62] : memref<3x3x530x256xbf16, #tpu.memory_space<vmem>>, vector<1x1x530x256xbf16>
    %38 = vector.shape_cast %37 : vector<1x1x530x256xbf16> to vector<530x256xbf16>
    %cst_63 = arith.constant dense<0.000000e+00> : vector<8x256xf32>
    %39 = tpu.matmul %36, %38, %cst_63 {dimension_numbers = #tpu.dot_dimension_numbers<[1], [0], [0], [1], [0, 0, 1, 1], [], []>} : vector<8x530xbf16>, vector<530x256xbf16>, vector<8x256xf32> -> vector<8x256xf32>
    %40 = arith.addf %34, %39 : vector<8x256xf32>
    %c0_64 = arith.constant 0 : index
    %c1_65 = arith.constant 1 : index
    %c0_66 = arith.constant 0 : index
    %c0_67 = arith.constant 0 : index
    %41 = vector.load %arg5[%c0_64, %c1_65, %c0_66, %c0_67] : memref<2x4x4x530xbf16, #tpu.memory_space<vmem>>, vector<2x2x2x530xbf16>
    %42 = vector.shape_cast %41 : vector<2x2x2x530xbf16> to vector<8x530xbf16>
    %c1_68 = arith.constant 1 : index
    %c0_69 = arith.constant 0 : index
    %c0_70 = arith.constant 0 : index
    %c0_71 = arith.constant 0 : index
    %43 = vector.load %arg3[%c1_68, %c0_69, %c0_70, %c0_71] : memref<3x3x530x256xbf16, #tpu.memory_space<vmem>>, vector<1x1x530x256xbf16>
    %44 = vector.shape_cast %43 : vector<1x1x530x256xbf16> to vector<530x256xbf16>
    %cst_72 = arith.constant dense<0.000000e+00> : vector<8x256xf32>
    %45 = tpu.matmul %42, %44, %cst_72 {dimension_numbers = #tpu.dot_dimension_numbers<[1], [0], [0], [1], [0, 0, 1, 1], [], []>} : vector<8x530xbf16>, vector<530x256xbf16>, vector<8x256xf32> -> vector<8x256xf32>
    %46 = arith.addf %40, %45 : vector<8x256xf32>
    %c0_73 = arith.constant 0 : index
    %c1_74 = arith.constant 1 : index
    %c1_75 = arith.constant 1 : index
    %c0_76 = arith.constant 0 : index
    %47 = vector.load %arg5[%c0_73, %c1_74, %c1_75, %c0_76] : memref<2x4x4x530xbf16, #tpu.memory_space<vmem>>, vector<2x2x2x530xbf16>
    %48 = vector.shape_cast %47 : vector<2x2x2x530xbf16> to vector<8x530xbf16>
    %c1_77 = arith.constant 1 : index
    %c1_78 = arith.constant 1 : index
    %c0_79 = arith.constant 0 : index
    %c0_80 = arith.constant 0 : index
    %49 = vector.load %arg3[%c1_77, %c1_78, %c0_79, %c0_80] : memref<3x3x530x256xbf16, #tpu.memory_space<vmem>>, vector<1x1x530x256xbf16>
    %50 = vector.shape_cast %49 : vector<1x1x530x256xbf16> to vector<530x256xbf16>
    %cst_81 = arith.constant dense<0.000000e+00> : vector<8x256xf32>
    %51 = tpu.matmul %48, %50, %cst_81 {dimension_numbers = #tpu.dot_dimension_numbers<[1], [0], [0], [1], [0, 0, 1, 1], [], []>} : vector<8x530xbf16>, vector<530x256xbf16>, vector<8x256xf32> -> vector<8x256xf32>
    %52 = arith.addf %46, %51 : vector<8x256xf32>
    %c0_82 = arith.constant 0 : index
    %c1_83 = arith.constant 1 : index
    %c2_84 = arith.constant 2 : index
    %c0_85 = arith.constant 0 : index
    %53 = vector.load %arg5[%c0_82, %c1_83, %c2_84, %c0_85] : memref<2x4x4x530xbf16, #tpu.memory_space<vmem>>, vector<2x2x2x530xbf16>
    %54 = vector.shape_cast %53 : vector<2x2x2x530xbf16> to vector<8x530xbf16>
    %c1_86 = arith.constant 1 : index
    %c2_87 = arith.constant 2 : index
    %c0_88 = arith.constant 0 : index
    %c0_89 = arith.constant 0 : index
    %55 = vector.load %arg3[%c1_86, %c2_87, %c0_88, %c0_89] : memref<3x3x530x256xbf16, #tpu.memory_space<vmem>>, vector<1x1x530x256xbf16>
    %56 = vector.shape_cast %55 : vector<1x1x530x256xbf16> to vector<530x256xbf16>
    %cst_90 = arith.constant dense<0.000000e+00> : vector<8x256xf32>
    %57 = tpu.matmul %54, %56, %cst_90 {dimension_numbers = #tpu.dot_dimension_numbers<[1], [0], [0], [1], [0, 0, 1, 1], [], []>} : vector<8x530xbf16>, vector<530x256xbf16>, vector<8x256xf32> -> vector<8x256xf32>
    %58 = arith.addf %52, %57 : vector<8x256xf32>
    %c0_91 = arith.constant 0 : index
    %c2_92 = arith.constant 2 : index
    %c0_93 = arith.constant 0 : index
    %c0_94 = arith.constant 0 : index
    %59 = vector.load %arg5[%c0_91, %c2_92, %c0_93, %c0_94] : memref<2x4x4x530xbf16, #tpu.memory_space<vmem>>, vector<2x2x2x530xbf16>
    %60 = vector.shape_cast %59 : vector<2x2x2x530xbf16> to vector<8x530xbf16>
    %c2_95 = arith.constant 2 : index
    %c0_96 = arith.constant 0 : index
    %c0_97 = arith.constant 0 : index
    %c0_98 = arith.constant 0 : index
    %61 = vector.load %arg3[%c2_95, %c0_96, %c0_97, %c0_98] : memref<3x3x530x256xbf16, #tpu.memory_space<vmem>>, vector<1x1x530x256xbf16>
    %62 = vector.shape_cast %61 : vector<1x1x530x256xbf16> to vector<530x256xbf16>
    %cst_99 = arith.constant dense<0.000000e+00> : vector<8x256xf32>
    %63 = tpu.matmul %60, %62, %cst_99 {dimension_numbers = #tpu.dot_dimension_numbers<[1], [0], [0], [1], [0, 0, 1, 1], [], []>} : vector<8x530xbf16>, vector<530x256xbf16>, vector<8x256xf32> -> vector<8x256xf32>
    %64 = arith.addf %58, %63 : vector<8x256xf32>
    %c0_100 = arith.constant 0 : index
    %c2_101 = arith.constant 2 : index
    %c1_102 = arith.constant 1 : index
    %c0_103 = arith.constant 0 : index
    %65 = vector.load %arg5[%c0_100, %c2_101, %c1_102, %c0_103] : memref<2x4x4x530xbf16, #tpu.memory_space<vmem>>, vector<2x2x2x530xbf16>
    %66 = vector.shape_cast %65 : vector<2x2x2x530xbf16> to vector<8x530xbf16>
    %c2_104 = arith.constant 2 : index
    %c1_105 = arith.constant 1 : index
    %c0_106 = arith.constant 0 : index
    %c0_107 = arith.constant 0 : index
    %67 = vector.load %arg3[%c2_104, %c1_105, %c0_106, %c0_107] : memref<3x3x530x256xbf16, #tpu.memory_space<vmem>>, vector<1x1x530x256xbf16>
    %68 = vector.shape_cast %67 : vector<1x1x530x256xbf16> to vector<530x256xbf16>
    %cst_108 = arith.constant dense<0.000000e+00> : vector<8x256xf32>
    %69 = tpu.matmul %66, %68, %cst_108 {dimension_numbers = #tpu.dot_dimension_numbers<[1], [0], [0], [1], [0, 0, 1, 1], [], []>} : vector<8x530xbf16>, vector<530x256xbf16>, vector<8x256xf32> -> vector<8x256xf32>
    %70 = arith.addf %64, %69 : vector<8x256xf32>
    %c0_109 = arith.constant 0 : index
    %c2_110 = arith.constant 2 : index
    %c2_111 = arith.constant 2 : index
    %c0_112 = arith.constant 0 : index
    %71 = vector.load %arg5[%c0_109, %c2_110, %c2_111, %c0_112] : memref<2x4x4x530xbf16, #tpu.memory_space<vmem>>, vector<2x2x2x530xbf16>
    %72 = vector.shape_cast %71 : vector<2x2x2x530xbf16> to vector<8x530xbf16>
    %c2_113 = arith.constant 2 : index
    %c2_114 = arith.constant 2 : index
    %c0_115 = arith.constant 0 : index
    %c0_116 = arith.constant 0 : index
    %73 = vector.load %arg3[%c2_113, %c2_114, %c0_115, %c0_116] : memref<3x3x530x256xbf16, #tpu.memory_space<vmem>>, vector<1x1x530x256xbf16>
    %74 = vector.shape_cast %73 : vector<1x1x530x256xbf16> to vector<530x256xbf16>
    %cst_117 = arith.constant dense<0.000000e+00> : vector<8x256xf32>
    %75 = tpu.matmul %72, %74, %cst_117 {dimension_numbers = #tpu.dot_dimension_numbers<[1], [0], [0], [1], [0, 0, 1, 1], [], []>} : vector<8x530xbf16>, vector<530x256xbf16>, vector<8x256xf32> -> vector<8x256xf32>
    %76 = arith.addf %70, %75 : vector<8x256xf32>
    %77 = vector.shape_cast %76 : vector<8x256xf32> to vector<2x4x256xf32>
    %cst_118 = arith.constant dense<0.000000e+00> : vector<2x256xf32>
    %78 = vector.multi_reduction <add>, %77, %cst_118 [1] : vector<2x4x256xf32> to vector<2x256xf32>
    %79 = vector.shape_cast %78 : vector<2x256xf32> to vector<2x1x256xf32>
    %cst_119 = arith.constant 4.000000e+00 : f32
    %80 = vector.broadcast %cst_119 : f32 to vector<2x1x256xf32>
    %81 = arith.divf %79, %80 : vector<2x1x256xf32>
    %82 = vector.broadcast %81 : vector<2x1x256xf32> to vector<2x4x256xf32>
    %83 = arith.subf %77, %82 : vector<2x4x256xf32>
    %84 = arith.mulf %83, %83 : vector<2x4x256xf32>
    %cst_120 = arith.constant dense<0.000000e+00> : vector<2x256xf32>
    %85 = vector.multi_reduction <add>, %84, %cst_120 [1] : vector<2x4x256xf32> to vector<2x256xf32>
    %86 = vector.shape_cast %85 : vector<2x256xf32> to vector<2x1x256xf32>
    %cst_121 = arith.constant 4.000000e+00 : f32
    %87 = vector.broadcast %cst_121 : f32 to vector<2x1x256xf32>
    %88 = arith.divf %86, %87 : vector<2x1x256xf32>
    %89 = vector.broadcast %81 : vector<2x1x256xf32> to vector<2x4x256xf32>
    %90 = arith.subf %77, %89 : vector<2x4x256xf32>
    %cst_122 = arith.constant 9.99999974E-6 : f32
    %91 = vector.broadcast %cst_122 : f32 to vector<2x1x256xf32>
    %92 = arith.addf %88, %91 : vector<2x1x256xf32>
    %93 = math.rsqrt %92 : vector<2x1x256xf32>
    %94 = vector.broadcast %93 : vector<2x1x256xf32> to vector<2x4x256xf32>
    %95 = arith.mulf %90, %94 : vector<2x4x256xf32>
    %96 = vector.shape_cast %95 : vector<2x4x256xf32> to vector<8x256xf32>
    %97 = vector.shape_cast %96 : vector<8x256xf32> to vector<2x2x2x256xf32>
    %98 = arith.truncf %97 : vector<2x2x2x256xf32> to vector<2x2x2x256xbf16>
    %c0_123 = arith.constant 0 : index
    %c0_124 = arith.constant 0 : index
    %c0_125 = arith.constant 0 : index
    %c0_126 = arith.constant 0 : index
    %99 = vector.load %arg4[%c0_123, %c0_124, %c0_125, %c0_126] : memref<2x2x2x256xbf16, #tpu.memory_space<vmem>>, vector<2x2x2x256xbf16>
    tpu.vector_store %arg4[%c0_123, %c0_124, %c0_125, %c0_126], %98 {strides = array<i32>} : memref<2x2x2x256xbf16, #tpu.memory_space<vmem>>, vector<2x2x2x256xbf16>,
    return
  }
  func.func @transform_0(%arg0: i32) -> (i32, i32, i32, i32) {
    %c0_i32 = arith.constant 0 : i32
    %c0_i32_0 = arith.constant 0 : i32
    %c0_i32_1 = arith.constant 0 : i32
    %c0_i32_2 = arith.constant 0 : i32
    return %arg0, %c0_i32, %c0_i32_0, %c0_i32_1 : i32, i32, i32, i32
  }
  func.func @transform_1(%arg0: i32) -> (i32, i32, i32) {
    %c0_i32 = arith.constant 0 : i32
    %c0_i32_0 = arith.constant 0 : i32
    %c0_i32_1 = arith.constant 0 : i32
    return %arg0, %c0_i32, %c0_i32_0 : i32, i32, i32
  }
  func.func @transform_2(%arg0: i32) -> (i32, i32, i32, i32) {
    %c0_i32 = arith.constant 0 : i32
    %c0_i32_0 = arith.constant 0 : i32
    %c0_i32_1 = arith.constant 0 : i32
    %c0_i32_2 = arith.constant 0 : i32
    %c0_i32_3 = arith.constant 0 : i32
    return %c0_i32, %c0_i32_0, %c0_i32_1, %c0_i32_2 : i32, i32, i32, i32
  }
  func.func @transform_3(%arg0: i32) -> (i32, i32, i32, i32) {
    %c0_i32 = arith.constant 0 : i32
    %c0_i32_0 = arith.constant 0 : i32
    %c0_i32_1 = arith.constant 0 : i32
    %c0_i32_2 = arith.constant 0 : i32
    return %arg0, %c0_i32, %c0_i32_0, %c0_i32_1 : i32, i32, i32, i32
  }
}

</mosaic_0001>

<bundles_post_ra>
// kernel: tpu_custom_call.1
= control target key start
LH: loop header
LB: loop body
LE: loop exit
PB: predicated region body
PF: predicated region fallthrough
CT: control target
= control target key end

     0   :  { %8 = vsyncpa [#allocation4], 0  ;;  %s9326_s0 = inlined_call_operand.hbm [shape: bf16[2,2,2,512], index: 0, kind: input, shape index: {}]   ;;  %s9327_s1 = inlined_call_operand.hbm [shape: f32[2,1,18], index: 1, kind: input, shape index: {}]   ;;  %s9328_s2 = inlined_call_operand.hbm [shape: bf16[3,3,530,256], index: 2, kind: input, shape index: {}]   ;;  %s9329_s3 = inlined_call_operand.hbm [shape: bf16[2,2,2,256], index: 3, kind: output, shape index: {}]  }
   0x1   :  { %9 = vsyncpa [#allocation7], 0 }
   0x2   :  { %10 = vsyncpa [#allocation5], 0  ;;  %s8687_s12 = smov [#allocation6]   ;;  %s8593_s16 = scalar_lea.hbm %s9327_s1, 32 }
   0x3   :  { %s28_s13 = sshll.u32 %s8687_s12, 4  ;;  %p8594_p0 = scmp.ne.s32.totalorder %s9327_s1, %s8593_s16  ;;  %s29_s13 = int_to_ptr.vmem [resolvable:$true] %s28_s13 }
   0x4   :  { %p8597_p1 = scmp.lt.u32.totalorder %s8593_s16, %s9327_s1 }
   0x6   :  { %p8599_p2 = pnand %p8597_p1, %p8594_p0 }
   0x8   :  { %8602 = shalt.err (!%p8599_p2)
}
   0x9   :  { %s8603_s21 = scalar_lea.vmem %s29_s13, 32  ;;  %p8608_p4 = scmp.lt.s32.totalorder %s29_s13, %s29_s13 }
   0xa   :  { %p8604_p3 = scmp.ne.s32.totalorder %s29_s13, %s8603_s21  ;;  %p8609_p5 = scmp.lt.s32.totalorder %s8603_s21, %s8603_s21 }
   0xc   :  { %p8610_p6 = por %p8609_p5, %p8608_p4 }
   0xe   :  { %p8611_p7 = pnand %p8610_p6, %p8604_p3 }
  0x10   :  { %8614 = shalt.err (!%p8611_p7)
}
  0x11   :  { %s8688_s22 = smov 16   ;;  %s8689_s23 = smov 1  }
  0x12   :  { %34 = dma.hbm_to_vmem [thread:$0]  %s9327_s1, 32, %s29_s13, [#allocation7], %s8688_s22, %s8688_s22, %s8689_s23  }
  0x13   :  { %s8690_s26 = smov [#allocation3]   ;;  %s8615_s30 = scalar_lea.hbm %s9326_s0, 256 }
  0x14   :  { %s16_s27 = sshll.u32 %s8690_s26, 4  ;;  %p8616_p8 = scmp.ne.s32.totalorder %s9326_s0, %s8615_s30  ;;  %s17_s27 = int_to_ptr.vmem [resolvable:$true] %s16_s27 }
  0x15   :  { %p8619_p9 = scmp.lt.u32.totalorder %s8615_s30, %s9326_s0 }
  0x17   :  { %p8621_p10 = pnand %p8619_p9, %p8616_p8 }
  0x19   :  { %8624 = shalt.err (!%p8621_p10)
}
  0x1a   :  { %s8625_s8 = scalar_lea.vmem %s17_s27, 256  ;;  %p8630_p12 = scmp.lt.s32.totalorder %s17_s27, %s17_s27 }
  0x1b   :  { %p8626_p11 = scmp.ne.s32.totalorder %s17_s27, %s8625_s8  ;;  %p8631_p13 = scmp.lt.s32.totalorder %s8625_s8, %s8625_s8 }
  0x1d   :  { %p8632_p0 = por %p8631_p13, %p8630_p12 }
  0x1f   :  { %p8633_p1 = pnand %p8632_p0, %p8626_p11 }
  0x21   :  { %8636 = shalt.err (!%p8633_p1)
}
  0x22   :  { %s8691_s1 = smov 64   ;;  %s8692_s9 = smov 4  }
  0x23   :  { %22 = dma.hbm_to_vmem [thread:$0]  %s9326_s0, 256, %s17_s27, [#allocation4], %s8691_s1, %s8691_s1, %s8692_s9  }
  0x24   :  { %s8693_s12 = smov [#allocation8]   ;;  %s8637_s16 = scalar_lea.hbm %s9328_s2, 77184 }
  0x25   :  { %s40_s13 = sshll.u32 %s8693_s12, 4  ;;  %p8638_p2 = scmp.ne.s32.totalorder %s9328_s2, %s8637_s16  ;;  %s41_s13 = int_to_ptr.vmem [resolvable:$true] %s40_s13 }
  0x26   :  { %p8641_p3 = scmp.lt.u32.totalorder %s8637_s16, %s9328_s2 }
  0x28   :  { %p8643_p4 = pnand %p8641_p3, %p8638_p2 }
  0x2a   :  { %8646 = shalt.err (!%p8643_p4)
}
  0x2b   :  { %s8647_s21 = scalar_lea.vmem %s41_s13, 77184  ;;  %p8652_p6 = scmp.lt.s32.totalorder %s41_s13, %s41_s13 }
  0x2c   :  { %p8648_p5 = scmp.ne.s32.totalorder %s41_s13, %s8647_s21  ;;  %p8653_p7 = scmp.lt.s32.totalorder %s8647_s21, %s8647_s21 }
  0x2e   :  { %p8654_p8 = por %p8653_p7, %p8652_p6 }
  0x30   :  { %p8655_p9 = pnand %p8654_p8, %p8648_p5 }
  0x32   :  { %8658 = shalt.err (!%p8655_p9)
}
  0x33   :  { %s8694_s0 = smov 128   ;;  %s8695_s22 = smov 8  }
  0x34   :  { %46 = dma.hbm_to_vmem [thread:$0]  %s9328_s2, 77184, %s41_s13, [#allocation7], %s8694_s0, %s8694_s0, %s8695_s22  }
  0x35   :  { %8681 = dma.done.wait [#allocation4], 256  }
  0x36   :  { %8682 = vsyncadd [#allocation4], 4294967040 }
  0x37   :  { %8683 = dma.done.wait [#allocation7], 77216  }
  0x38   :  { %8684 = vsyncadd [#allocation7], 4294890080  ;;  %vm9331_vm0 = vcmask 140288   ;;  %v7675_v0 = vld [vmem:[#allocation8 + $0x21c] ss:$8 sps:$4 sm:$0xff]   ;;  %v8696_v2 = vmov 0   ;;  %v298_v50 = vlaneseq }
  0x39   :  { %v7677_v1 = vld [vmem:[#allocation8 + $0x964] ss:$8 sps:$4 sm:$0xff]   ;;  %57 = vst [vmem:[#allocation2] sm:$0xff] %v8696_v2  ;;  %59 = vst.msk [vmem:[#allocation2 + $0x8] sm:$0x3] %vm9331_vm0, %v8696_v2  ;;  %1076 = vmatprep.subr.bf16.mxu1 %v7675_v0  ;;  %vm9330_vm2 = vcmask 1040384  }
  0x3a   :  { %60 = vst [vmem:[#allocation2 + $0x28] sm:$0xff] %v8696_v2  ;;  %61 = vst.msk [vmem:[#allocation2 + $0x30] sm:$0x3] %vm9331_vm0, %v8696_v2  ;;  %v7679_v3 = vld [vmem:[#allocation8 + $0x218] ss:$8 sps:$4 sm:$0xff]   ;;  %3709 = vmatprep.subr.bf16.mxu0 %v7677_v1  ;;  %vm70_vm3 = vcmask 1042434  }
  0x3b   :  { %63 = vst [vmem:[#allocation2 + $0x1e] sm:$0xff] %v8696_v2  ;;  %64 = vst.msk [vmem:[#allocation2 + $0x26] sm:$0x3] %vm9331_vm0, %v8696_v2  ;;  %v7680_v4 = vld [vmem:[#allocation8 + $0x960] ss:$8 sps:$4 sm:$0xff]   ;;  %1077 = vmatpush1.bf16.msra.mxu1 %v7679_v3  ;;  %vm74_vm7 = vcmask 1044484  }
  0x3c   :  { %65 = vst [vmem:[#allocation2 + $0x46] sm:$0xff] %v8696_v2  ;;  %66 = vst.msk [vmem:[#allocation2 + $0x4e] sm:$0x3] %vm9331_vm0, %v8696_v2  ;;  %v7681_v5 = vld [vmem:[#allocation8 + $0x22c] ss:$8 sps:$4 sm:$0xff]   ;;  %3710 = vmatpush1.bf16.msra.mxu0 %v7680_v4  ;;  %vm78_vm11 = vcmask 1046534  }
  0x3d   :  { %v7683_v6 = vld [vmem:[#allocation8 + $0x974] ss:$8 sps:$4 sm:$0xff]   ;;  %v7685_v7 = vld [vmem:[#allocation8 + $0x228] ss:$8 sps:$4 sm:$0xff]   ;;  %1078 = vmatprep.subr.bf16.mxu1 %v7681_v5  ;;  %v7689_v10 = vld [vmem:[#allocation8 + $0x984] ss:$8 sps:$4 sm:$0xff]  }
  0x3e   :  { %v7686_v8 = vld [vmem:[#allocation8 + $0x970] ss:$8 sps:$4 sm:$0xff]   ;;  %3711 = vmatprep.subr.bf16.mxu0 %v7683_v6  ;;  %v7687_v9 = vld [vmem:[#allocation8 + $0x23c] ss:$8 sps:$4 sm:$0xff]   ;;  %v7692_v12 = vld [vmem:[#allocation8 + $0x980] ss:$8 sps:$4 sm:$0xff]  }
  0x3f   :  { %v7691_v11 = vld [vmem:[#allocation8 + $0x238] ss:$8 sps:$4 sm:$0xff]   ;;  %1079 = vmatpush1.bf16.msra.mxu1 %v7685_v7  ;;  %v7693_v13 = vld [vmem:[#allocation8 + $0x24c] ss:$8 sps:$4 sm:$0xff]   ;;  %v7697_v15 = vld [vmem:[#allocation8 + $0x248] ss:$8 sps:$4 sm:$0xff]  }
  0x40   :  { %3712 = vmatpush1.bf16.msra.mxu0 %v7686_v8  ;;  %1080 = vmatprep.subr.bf16.mxu1 %v7687_v9  ;;  %v7695_v14 = vld [vmem:[#allocation8 + $0x994] ss:$8 sps:$4 sm:$0xff]   ;;  %v7698_v16 = vld [vmem:[#allocation8 + $0x990] ss:$8 sps:$4 sm:$0xff]   ;;  %v7701_v18 = vld [vmem:[#allocation8 + $0x9a4] ss:$8 sps:$4 sm:$0xff]  }
  0x41   :  { %3713 = vmatprep.subr.bf16.mxu0 %v7689_v10  ;;  %v7699_v17 = vld [vmem:[#allocation8 + $0x25c] ss:$8 sps:$4 sm:$0xff]   ;;  %v7703_v19 = vld [vmem:[#allocation8 + $0x258] ss:$8 sps:$4 sm:$0xff]   ;;  %v7705_v21 = vld [vmem:[#allocation8 + $0x26c] ss:$8 sps:$4 sm:$0xff]  }
  0x42   :  { %v7704_v20 = vld [vmem:[#allocation8 + $0x9a0] ss:$8 sps:$4 sm:$0xff]   ;;  %v7707_v22 = vld [vmem:[#allocation8 + $0x9b4] ss:$8 sps:$4 sm:$0xff]   ;;  %vm9332_vm1 = vsmask.f32 256 }
  0x43   :  { %1081 = vmatpush1.bf16.msra.mxu1 %v7691_v11  ;;  %v7709_v23 = vld [vmem:[#allocation8 + $0x268] ss:$8 sps:$4 sm:$0xff]   ;;  %v7711_v25 = vld [vmem:[#allocation8 + $0x27c] ss:$8 sps:$4 sm:$0xff]   ;;  %v7715_v27 = vld [vmem:[#allocation8 + $0x278] ss:$8 sps:$4 sm:$0xff]  }
  0x44   :  { %3714 = vmatpush1.bf16.msra.mxu0 %v7692_v12  ;;  %1082 = vmatprep.subr.bf16.mxu1 %v7693_v13  ;;  %v7710_v24 = vld [vmem:[#allocation8 + $0x9b0] ss:$8 sps:$4 sm:$0xff]   ;;  %v7713_v26 = vld [vmem:[#allocation8 + $0x9c4] ss:$8 sps:$4 sm:$0xff]   ;;  %v7716_v28 = vld [vmem:[#allocation8 + $0x9c0] ss:$8 sps:$4 sm:$0xff]  }
  0x45   :  { %3715 = vmatprep.subr.bf16.mxu0 %v7695_v14  ;;  %vm8772_vm4 = vmand %vm9330_vm2, %vm9332_vm1  ;;  %vm71_vm5 = vsmask.f32 2304  ;;  %v7717_v30 = vld [vmem:[#allocation8 + $0x28c] ss:$8 sps:$4 sm:$0xff]   ;;  %v7721_v33 = vld [vmem:[#allocation8 + $0x288] ss:$8 sps:$4 sm:$0xff]  }
  0x46   :  { %v7719_v31 = vld [vmem:[#allocation8 + $0x9d4] ss:$8 sps:$4 sm:$0xff]   ;;  %vm8776_vm6 = vmand %vm70_vm3, %vm71_vm5  ;;  %v7722_v34 = vld [vmem:[#allocation8 + $0x9d0] ss:$8 sps:$4 sm:$0xff]   ;;  %vm75_vm9 = vsmask.f32 4352 }
  0x47   :  { %1083 = vmatpush1.bf16.msra.mxu1 %v7697_v15  ;;  %v7723_v35 = vld [vmem:[#allocation8 + $0x29c] ss:$8 sps:$4 sm:$0xff]   ;;  %v7727_v37 = vld [vmem:[#allocation8 + $0x298] ss:$8 sps:$4 sm:$0xff]   ;;  %vm73_vm8 = vmor %vm8776_vm6, %vm8772_vm4  ;;  %vm79_vm12 = vsmask.f32 6400 }
  0x48   :  { %3716 = vmatpush1.bf16.msra.mxu0 %v7698_v16  ;;  %1084 = vmatprep.subr.bf16.mxu1 %v7699_v17  ;;  %v7725_v36 = vld [vmem:[#allocation8 + $0x9e4] ss:$8 sps:$4 sm:$0xff]   ;;  %v7728_v38 = vld [vmem:[#allocation8 + $0x9e0] ss:$8 sps:$4 sm:$0xff]   ;;  %v7731_v40 = vld [vmem:[#allocation8 + $0x9f4] ss:$8 sps:$4 sm:$0xff]  }
  0x49   :  { %3717 = vmatprep.subr.bf16.mxu0 %v7701_v18  ;;  %v7729_v39 = vld [vmem:[#allocation8 + $0x2ac] ss:$8 sps:$4 sm:$0xff]   ;;  %vm8784_vm10 = vmand %vm74_vm7, %vm75_vm9  ;;  %vm85_vm13 = vcmask 139264   ;;  %v7733_v42 = vld [vmem:[#allocation8 + $0x2a8] ss:$8 sps:$4 sm:$0xff]   ;;  %vm132_vm15 = vcmask 1041409  }
  0x4a   :  { %vm133_vm14 = vsmask.f32 7942  ;;  %v7734_v43 = vld [vmem:[#allocation8 + $0x9f0] ss:$8 sps:$4 sm:$0xff]   ;;  %v7735_v44 = vld [vmem:[#allocation8 + $0x2bc] ss:$8 sps:$4 sm:$0xff]   ;;  %vm8795_vm5 = vmor %vm8784_vm10, %vm73_vm8 }
  0x4b   :  { %1085 = vmatpush1.bf16.msra.mxu1 %v7703_v19  ;;  %v7737_v45 = vld [vmem:[#allocation8 + $0xa04] ss:$8 sps:$4 sm:$0xff]   ;;  %vm135_vm7 = vcmask 1043459   ;;  %vm139_vm9 = vcmask 1045509   ;;  %vm140_vm2 = vsmask.f32 7958  ;;  %vm8801_vm0 = vmand %vm78_vm11, %vm79_vm12 }
  0x4c   :  { %3718 = vmatpush1.bf16.msra.mxu0 %v7704_v20  ;;  %1086 = vmatprep.subr.bf16.mxu1 %v7705_v21  ;;  %v7739_v47 = vld [vmem:[#allocation8 + $0x2b8] ss:$8 sps:$4 sm:$0xff]   ;;  %vm144_vm3 = vsmask.f32 7966  ;;  %v7741_v51 = vld [vmem:[#allocation8 + $0x2cc] ss:$8 sps:$4 sm:$0xff]   ;;  %vm8809_vm11 = vmor %vm8801_vm0, %vm8795_vm5 }
  0x4d   :  { %3719 = vmatprep.subr.bf16.mxu0 %v7707_v22  ;;  %v7740_v48 = vld [vmem:[#allocation8 + $0xa00] ss:$8 sps:$4 sm:$0xff]   ;;  %vm143_vm4 = vcmask 1047559   ;;  %v7743_v52 = vld [vmem:[#allocation8 + $0xa14] ss:$8 sps:$4 sm:$0xff]   ;;  %vm8815_vm6 = vmand %vm85_vm13, %vm9332_vm1  ;;  %vm269_vm8 = vcmask 1043458  }
  0x4e   :  { %vm267_vm10 = vsmask.f32 1282  ;;  %v7745_v53 = vld [vmem:[#allocation8 + $0x2c8] ss:$8 sps:$4 sm:$0xff]   ;;  %vm270_vm12 = vsmask.f32 3338  ;;  %vm8827_vm0 = vmand %vm132_vm15, %vm133_vm14 }
  0x4f   :  { %1087 = vmatpush1.bf16.msra.mxu1 %v7709_v23  ;;  %v7746_v54 = vld [vmem:[#allocation8 + $0xa10] ss:$8 sps:$4 sm:$0xff]   ;;  %v7747_v56 = vld [vmem:[#allocation8 + $0x2dc] ss:$8 sps:$4 sm:$0xff]   ;;  %v90_v59 = vld [vmem:[#allocation2 + $0xa] sm:$0x55] }
  0x50   :  { %3720 = vmatpush1.bf16.msra.mxu0 %v7710_v24  ;;  %1088 = vmatprep.subr.bf16.mxu1 %v7711_v25  ;;  %v7749_v57 = vld [vmem:[#allocation8 + $0xa24] ss:$8 sps:$4 sm:$0xff]   ;;  %v93_v60 = vld [vmem:[#allocation2 + $0x12] sm:$0x1]  ;;  %v8819_v61 = vshrl.u32 %v298_v50, 7  ;;  %v91_v62 = vsel %vm8809_vm11, 0, %v90_v59 }
  0x51   :  { %3721 = vmatprep.subr.bf16.mxu0 %v7713_v26  ;;  %v94_v63 = vsel %vm8815_vm6, 0, %v93_v60  ;;  %v96_v0 = vld [vmem:[#allocation2 + $0x14] sm:$0x55]  ;;  %v99_v1 = vld [vmem:[#allocation2 + $0x1c] sm:$0x1]  ;;  %s8699_s2 = smov [#allocation9]  }
  0x52   :  { %92 = vst [vmem:[#allocation2 + $0xa] sm:$0x55] %v91_v62  ;;  %95 = vst [vmem:[#allocation2 + $0x12] sm:$0x1] %v94_v63  ;;  %v97_v4 = vsel %vm8809_vm11, 0, %v96_v0  ;;  %v100_v5 = vsel %vm8815_vm6, 0, %v99_v1 }
  0x53   :  { %1089 = vmatpush1.bf16.msra.mxu1 %v7715_v27  ;;  %v114_v6 = vld [vmem:[#allocation2 + $0x32] sm:$0x55]  ;;  %v117_v7 = vld [vmem:[#allocation2 + $0x3a] sm:$0x1]  ;;  %vm9349_vm5 = vsmask.f32 7950 }
  0x54   :  { %3722 = vmatpush1.bf16.msra.mxu0 %v7716_v28  ;;  %1090 = vmatprep.subr.bf16.mxu1 %v7717_v30  ;;  %vm8837_vm1 = vmand %vm135_vm7, %vm9349_vm5  ;;  %v7751_v9 = vld [vmem:[#allocation8 + $0x2d8] ss:$8 sps:$4 sm:$0xff]   ;;  %98 = vst [vmem:[#allocation2 + $0x14] sm:$0x55] %v97_v4  ;;  %v115_v11 = vsel %vm8809_vm11, 0, %v114_v6  ;;  %v118_v12 = vsel %vm8815_vm6, 0, %v117_v7 }
  0x55   :  { %3723 = vmatprep.subr.bf16.mxu0 %v7719_v31  ;;  %v7752_v10 = vld [vmem:[#allocation8 + $0xa20] ss:$8 sps:$4 sm:$0xff]   ;;  %101 = vst [vmem:[#allocation2 + $0x1c] sm:$0x1] %v100_v5  ;;  %vm138_vm15 = vmor %vm8837_vm1, %vm8827_vm0  ;;  %v7753_v15 = vld [vmem:[#allocation8 + $0x2ec] ss:$8 sps:$4 sm:$0xff]  }
  0x56   :  { %v120_v13 = vld [vmem:[#allocation2 + $0x3c] sm:$0x55]  ;;  %v123_v14 = vld [vmem:[#allocation2 + $0x44] sm:$0x1]  ;;  %116 = vst [vmem:[#allocation2 + $0x32] sm:$0x55] %v115_v11  ;;  %vm141_vm7 = vmand %vm139_vm9, %vm140_vm2 }
  0x57   :  { %1091 = vmatpush1.bf16.msra.mxu1 %v7721_v33  ;;  %v7755_v16 = vld [vmem:[#allocation8 + $0xa34] ss:$8 sps:$4 sm:$0xff]   ;;  %119 = vst [vmem:[#allocation2 + $0x3a] sm:$0x1] %v118_v12  ;;  %v121_v17 = vsel %vm8809_vm11, 0, %v120_v13  ;;  %v124_v18 = vsel %vm8815_vm6, 0, %v123_v14  ;;  %vm142_vm1 = vmor %vm141_vm7, %vm138_vm15 }
  0x58   :  { %3724 = vmatpush1.bf16.msra.mxu0 %v7722_v34  ;;  %1092 = vmatprep.subr.bf16.mxu1 %v7723_v35  ;;  %v155_v19 = vld [vmem:[#allocation2 + $0xa] sm:$0xaa]  ;;  %v158_v20 = vld [vmem:[#allocation2 + $0x12] sm:$0x2]  ;;  %122 = vst [vmem:[#allocation2 + $0x3c] sm:$0x55] %v121_v17  ;;  %vm145_vm5 = vmand %vm143_vm4, %vm144_vm3 }
  0x59   :  { %3725 = vmatprep.subr.bf16.mxu0 %v7725_v36  ;;  %125 = vst [vmem:[#allocation2 + $0x44] sm:$0x1] %v124_v18  ;;  %v161_v21 = vld [vmem:[#allocation2 + $0x14] sm:$0xaa]  ;;  %v164_v22 = vld [vmem:[#allocation2 + $0x1c] sm:$0x2]  ;;  %vm8857_vm2 = vmor %vm145_vm5, %vm142_vm1 }
  0x5a   :  { %vm274_vm0 = vsmask.f32 5394  ;;  %v179_v23 = vld [vmem:[#allocation2 + $0x32] sm:$0xaa]  ;;  %v182_v24 = vld [vmem:[#allocation2 + $0x3a] sm:$0x2]  ;;  %vm8892_vm5 = vmand %vm269_vm8, %vm270_vm12 }
  0x5b   :  { %1093 = vmatpush1.bf16.msra.mxu1 %v7727_v37  ;;  %vm278_vm13 = vsmask.f32 7450  ;;  %v7757_v25 = vld [vmem:[#allocation8 + $0x2e8] ss:$8 sps:$4 sm:$0xff]   ;;  %v185_v28 = vld [vmem:[#allocation2 + $0x3c] sm:$0xaa] }
  0x5c   :  { %3726 = vmatpush1.bf16.msra.mxu0 %v7728_v38  ;;  %1094 = vmatprep.subr.bf16.mxu1 %v7729_v39  ;;  %v7758_v26 = vld [vmem:[#allocation8 + $0xa30] ss:$8 sps:$4 sm:$0xff]   ;;  %v188_v29 = vld [vmem:[#allocation2 + $0x44] sm:$0x2]  ;;  %vm277_vm9 = vcmask 1047558   ;;  %v300_v30 = vsub.s32 0, %v8819_v61 }
  0x5d   :  { %3727 = vmatprep.subr.bf16.mxu0 %v7731_v40  ;;  %v7759_v31 = vld [vmem:[#allocation8 + $0x2fc] ss:$8 sps:$4 sm:$0xff]   ;;  %vm9354_vm15 = vcmask 140289   ;;  %v156_v33 = vsel %vm8857_vm2, 0, %v155_v19  ;;  %v162_v34 = vsel %vm8857_vm2, 0, %v161_v21  ;;  %v180_v35 = vsel %vm8857_vm2, 0, %v179_v23 }
  0x5e   :  { %vm8864_vm7 = vmand %vm9354_vm15, %vm133_vm14  ;;  %v186_v36 = vsel %vm8857_vm2, 0, %v185_v28  ;;  %v293_v37 = vld [vmem:[#allocation6] sm:$0x1]  ;;  %vm550_vm3 = vsmask.f32 1284  ;;  %vm9357_vm14 = vcmask 1041408  }
  0x5f   :  { %1095 = vmatpush1.bf16.msra.mxu1 %v7733_v42  ;;  %157 = vst [vmem:[#allocation2 + $0xa] sm:$0xaa] %v156_v33  ;;  %v159_v38 = vsel %vm8864_vm7, 0, %v158_v20  ;;  %163 = vst [vmem:[#allocation2 + $0x14] sm:$0xaa] %v162_v34  ;;  %v165_v39 = vsel %vm8864_vm7, 0, %v164_v22 }
  0x60   :  { %3728 = vmatpush1.bf16.msra.mxu0 %v7734_v43  ;;  %1096 = vmatprep.subr.bf16.mxu1 %v7735_v44  ;;  %181 = vst [vmem:[#allocation2 + $0x32] sm:$0xaa] %v180_v35  ;;  %v183_v40 = vsel %vm8864_vm7, 0, %v182_v24  ;;  %187 = vst [vmem:[#allocation2 + $0x3c] sm:$0xaa] %v186_v36  ;;  %v189_v41 = vsel %vm8864_vm7, 0, %v188_v29 }
  0x61   :  { %3729 = vmatprep.subr.bf16.mxu0 %v7737_v45  ;;  %vm8886_vm4 = vmand %vm9357_vm14, %vm267_vm10  ;;  %v311_v43 = vld [vmem:[#allocation6 + $0x1] sm:$0x1]  ;;  %v7761_v44 = vld [vmem:[#allocation8 + $0xa44] ss:$8 sps:$4 sm:$0xff]   ;;  %160 = vst [vmem:[#allocation2 + $0x12] sm:$0x2] %v159_v38 }
  0x62   :  { %166 = vst [vmem:[#allocation2 + $0x1c] sm:$0x2] %v165_v39  ;;  %184 = vst [vmem:[#allocation2 + $0x3a] sm:$0x2] %v183_v40  ;;  %v7763_v49 = vld [vmem:[#allocation8 + $0x2f8] ss:$8 sps:$4 sm:$0xff]  }
  0x63   :  { %1097 = vmatpush1.bf16.msra.mxu1 %v7739_v47  ;;  %190 = vst [vmem:[#allocation2 + $0x44] sm:$0x2] %v189_v41  ;;  %v6806_v45 = vld.sshfl [vmem:[#allocation3] sm:$0x55 pattern:$0x73625140]  ;;  %v294_v47 = vpack.c.bf16 %v293_v37, %v293_v37  ;;  %vm272_vm14 = vmor %vm8892_vm5, %vm8886_vm4 }
  0x64   :  { %3730 = vmatpush1.bf16.msra.mxu0 %v7740_v48  ;;  %1098 = vmatprep.subr.bf16.mxu1 %v7741_v51  ;;  %v312_v48 = vpack.c.bf16 %v311_v43, %v311_v43  ;;  %v7764_v50 = vld [vmem:[#allocation8 + $0xa40] ss:$8 sps:$4 sm:$0xff]   ;;  %v6807_v51 = vld.sshfl [vmem:[#allocation3 + $0x4] sm:$0x55 pattern:$0x73625140] }
  0x65   :  { %3731 = vmatprep.subr.bf16.mxu0 %v7743_v52  ;;  %v234_v52 = vshrl.u32 %v6806_v45, 16  ;;  %v6808_v59 = vld.sshfl [vmem:[#allocation3 + $0x8] sm:$0x55 pattern:$0x73625140]  ;;  %v241_v60 = vshrl.u32 %v6807_v51, 16  ;;  %v296_v63 = vpack.i.b16 %v294_v47, %v294_v47 }
  0x66   :  { %v244_v62 = vshll.u32 %v6807_v51, 16  ;;  %vm9362_vm8 = vcmask 1045508   ;;  %v314_v0 = vpack.i.b16 %v312_v48, %v312_v48  ;;  %vm558_vm15 = vsmask.f32 5396  ;;  %v7770_v11 = vld [vmem:[#allocation8 + $0xa50] ss:$8 sps:$4 sm:$0xff]  }
  0x67   :  { %1099 = vmatpush1.bf16.msra.mxu1 %v7745_v53  ;;  %v237_v53 = vshll.u32 %v6806_v45, 16  ;;  %vm275_vm12 = vmand %vm9362_vm8, %vm274_vm0  ;;  %v6809_v1 = vld.sshfl [vmem:[#allocation3 + $0xc] sm:$0x55 pattern:$0x73625140]  ;;  %v236_v3 = vrot.slane %v234_v52, 7 }
  0x68   :  { %3732 = vmatpush1.bf16.msra.mxu0 %v7746_v54  ;;  %1100 = vmatprep.subr.bf16.mxu1 %v7747_v56  ;;  %v82_v54 = vld [vmem:[#allocation2] sm:$0x55]  ;;  %v7765_v56 = vld [vmem:[#allocation8 + $0x30c] ss:$8 sps:$4 sm:$0xff]   ;;  %v248_v4 = vshrl.u32 %v6808_v59, 16  ;;  %vm276_vm1 = vmor %vm275_vm12, %vm272_vm14  ;;  %v243_v5 = vrot.slane %v241_v60, 7 }
  0x69   :  { %3733 = vmatprep.subr.bf16.mxu0 %v7749_v57  ;;  %v7767_v57 = vld [vmem:[#allocation8 + $0xa54] ss:$8 sps:$4 sm:$0xff]   ;;  %v251_v6 = vshll.u32 %v6808_v59, 16  ;;  %v255_v7 = vshrl.u32 %v6809_v1, 16  ;;  %v258_v8 = vshll.u32 %v6809_v1, 16  ;;  %vm279_vm0 = vmand %vm277_vm9, %vm278_vm13  ;;  %v239_v12 = vor.u32 %v237_v53, %v236_v3  ;;  %v281_v21 = vld [vmem:[#allocation2 + $0xa] sm:$0xff] }
  0x6a   :  { %v250_v13 = vrot.slane %v248_v4, 7  ;;  %vm8909_vm8 = vmor %vm279_vm0, %vm276_vm1  ;;  %v108_v17 = vld [vmem:[#allocation2 + $0x28] sm:$0x55]  ;;  %v111_v18 = vld [vmem:[#allocation2 + $0x30] sm:$0x1]  ;;  %v246_v19 = vor.u32 %v244_v62, %v243_v5  ;;  %v83_v24 = vsel %vm8809_vm11, 0, %v82_v54 }
  0x6b   :  { %1101 = vmatpush1.bf16.msra.mxu1 %v7751_v9  ;;  %v87_v9 = vld [vmem:[#allocation2 + $0x8] sm:$0x1]  ;;  %v257_v20 = vrot.slane %v255_v7, 7  ;;  %v284_v22 = vld [vmem:[#allocation2 + $0x14] sm:$0xff]  ;;  %v282_v28 = vsel %vm8909_vm8, %v239_v12, %v281_v21  ;;  %v290_v29 = vld [vmem:[#allocation2 + $0x3c] sm:$0xff]  ;;  %vm9365_vm13 = vcmask 140288  }
  0x6c   :  { %3734 = vmatpush1.bf16.msra.mxu0 %v7752_v10  ;;  %1102 = vmatprep.subr.bf16.mxu1 %v7753_v15  ;;  %v7769_v10 = vld [vmem:[#allocation8 + $0x308] ss:$8 sps:$4 sm:$0xff]   ;;  %v301_v15 = vrot.slane %v296_v63, %v300_v30  ;;  %vm8925_vm9 = vmand %vm9365_vm13, %vm267_vm10  ;;  %84 = vst [vmem:[#allocation2] sm:$0x55] %v83_v24  ;;  %v109_v33 = vsel %vm8809_vm11, 0, %v108_v17  ;;  %v112_v34 = vsel %vm8815_vm6, 0, %v111_v18  ;;  %v285_v36 = vsel %vm8909_vm8, %v246_v19, %v284_v22 }
  0x6d   :  { %3735 = vmatprep.subr.bf16.mxu0 %v7755_v16  ;;  %v319_v16 = vrot.slane %v314_v0, %v300_v30  ;;  %v287_v23 = vld [vmem:[#allocation2 + $0x32] sm:$0xff]  ;;  %v260_v35 = vor.u32 %v258_v8, %v257_v20  ;;  %283 = vst [vmem:[#allocation2 + $0xa] sm:$0xff] %v282_v28  ;;  %v307_v38 = vld [vmem:[#allocation2 + $0x1c] sm:$0x3]  ;;  %v321_v39 = vld [vmem:[#allocation2 + $0x3a] sm:$0x3] }
  0x6e   :  { %v324_v40 = vld [vmem:[#allocation2 + $0x44] sm:$0x3]  ;;  %110 = vst [vmem:[#allocation2 + $0x28] sm:$0x55] %v109_v33  ;;  %113 = vst [vmem:[#allocation2 + $0x30] sm:$0x1] %v112_v34  ;;  %v308_v42 = vsel %vm8925_vm9, %v301_v15, %v307_v38 }
  0x6f   :  { %1103 = vmatpush1.bf16.msra.mxu1 %v7757_v25  ;;  %v88_v25 = vsel %vm8815_vm6, 0, %v87_v9  ;;  %286 = vst [vmem:[#allocation2 + $0x14] sm:$0xff] %v285_v36  ;;  %v322_v43 = vsel %vm8925_vm9, %v319_v16, %v321_v39  ;;  %vm9368_vm10 = vsmask.f32 256  ;;  %v147_v45 = vld [vmem:[#allocation2] sm:$0xaa]  ;;  %v291_v47 = vsel %vm8909_vm8, %v260_v35, %v290_v29 }
  0x70   :  { %3736 = vmatpush1.bf16.msra.mxu0 %v7758_v26  ;;  %1104 = vmatprep.subr.bf16.mxu1 %v7759_v31  ;;  %v253_v26 = vor.u32 %v251_v6, %v250_v13  ;;  %v304_v31 = vld [vmem:[#allocation2 + $0x12] sm:$0x3]  ;;  %89 = vst [vmem:[#allocation2 + $0x8] sm:$0x1] %v88_v25  ;;  %vm551_vm4 = vmor %vm9368_vm10, %vm550_vm3  ;;  %v152_v46 = vld [vmem:[#allocation2 + $0x8] sm:$0x2] }
  0x71   :  { %3737 = vmatprep.subr.bf16.mxu0 %v7761_v44  ;;  %v305_v37 = vsel %vm8925_vm9, %v301_v15, %v304_v31  ;;  %v325_v44 = vsel %vm8925_vm9, %v319_v16, %v324_v40  ;;  %309 = vst [vmem:[#allocation2 + $0x1c] sm:$0x3] %v308_v42  ;;  %323 = vst [vmem:[#allocation2 + $0x3a] sm:$0x3] %v322_v43  ;;  %vm9369_vm1 = vsmask.f32 2312 }
  0x72   :  { %v288_v41 = vsel %vm8909_vm8, %v253_v26, %v287_v23  ;;  %306 = vst [vmem:[#allocation2 + $0x12] sm:$0x3] %v305_v37  ;;  %326 = vst [vmem:[#allocation2 + $0x44] sm:$0x3] %v325_v44  ;;  %v148_v48 = vsel %vm8857_vm2, 0, %v147_v45  ;;  %s6793_s25 = sshll.u32 %s8699_s2, 4  ;;  %s6794_s25 = int_to_ptr.vmem [resolvable:$true] %s6793_s25 }
  0x73   :  { %1105 = vmatpush1.bf16.msra.mxu1 %v7763_v49  ;;  %289 = vst [vmem:[#allocation2 + $0x32] sm:$0xff] %v288_v41  ;;  %vm553_vm5 = vmor %vm551_vm4, %vm9369_vm1  ;;  %v153_v49 = vsel %vm8864_vm7, 0, %v152_v46  ;;  %v176_v51 = vld [vmem:[#allocation2 + $0x30] sm:$0x2]  ;;  %vm9370_vm3 = vsmask.f32 3340  ;;  %p8664_p11 = scmp.lt.s32.totalorder %s6794_s25, %s6794_s25 }
  0x74   :  { %3738 = vmatpush1.bf16.msra.mxu0 %v7764_v50  ;;  %1106 = vmatprep.subr.bf16.mxu1 %v7765_v56  ;;  %v173_v50 = vld [vmem:[#allocation2 + $0x28] sm:$0xaa]  ;;  %292 = vst [vmem:[#allocation2 + $0x3c] sm:$0xff] %v291_v47  ;;  %vm555_vm14 = vmor %vm553_vm5, %vm9370_vm3  ;;  %v177_v53 = vsel %vm8864_vm7, 0, %v176_v51  ;;  %vm9371_vm12 = vsmask.f32 4368 }
  0x75   :  { %3739 = vmatprep.subr.bf16.mxu0 %v7767_v57  ;;  %149 = vst [vmem:[#allocation2] sm:$0xaa] %v148_v48  ;;  %154 = vst [vmem:[#allocation2 + $0x8] sm:$0x2] %v153_v49  ;;  %v174_v52 = vsel %vm8857_vm2, 0, %v173_v50  ;;  %vm1065_vm5 = vcmask 146432  }
  0x76   :  { %vm557_vm0 = vmor %vm555_vm14, %vm9371_vm12  ;;  %vm560_vm8 = vsmask.f32 6424  ;;  %175 = vst [vmem:[#allocation2 + $0x28] sm:$0xaa] %v174_v52  ;;  %v7773_v54 = vld [vmem:[#allocation8 + $0x31c] ss:$8 sps:$4 sm:$0xff]  }
  0x77   :  { %1107 = vmatpush1.bf16.msra.mxu1 %v7769_v10  ;;  %178 = vst [vmem:[#allocation2 + $0x30] sm:$0x2] %v177_v53  ;;  %vm559_vm13 = vmor %vm557_vm0, %vm558_vm15  ;;  %v8697_v56 = vmov 1966171168   ;;  %v7776_v59 = vld [vmem:[#allocation8 + $0xa64] ss:$8 sps:$4 sm:$0xff]  }
  0x78   :  { %3740 = vmatpush1.bf16.msra.mxu0 %v7770_v11  ;;  %v673_v57 = vunpack.c.l.s4 %v8697_v56  ;;  %1117 = vmatprep.subr.bf16.mxu1 %v7773_v54  ;;  %vm561_vm9 = vmor %vm559_vm13, %vm560_vm8  ;;  %vm562_vm10 = vsmask.f32 7452  ;;  %v7138_v60 = vld.sshfl [vmem:[#allocation2 + $0xa] sm:$0xff pattern:$0x75316420]  ;;  %vm9374_vm15 = vcmask 1040384  }
  0x79   :  { %v7139_v62 = vld.sshfl [vmem:[#allocation2 + $0x12] sm:$0x11 pattern:$0x75316420]  ;;  %3750 = vmatprep.subr.bf16.mxu0 %v7776_v59  ;;  %vm8961_vm4 = vmor %vm561_vm9, %vm562_vm10  ;;  %v8058_v58 = vld [vmem:[#allocation8 + $0x1e4] ss:$8 sps:$4 sm:$0xff]  }
  0x7a   :  { %v7140_v63 = vld.sshfl [vmem:[#allocation2 + $0x14] sm:$0xff pattern:$0x75316420]  ;;  %v3108_v1 = vcombine.low %v7138_v60, %v7139_v62  ;;  %v3109_v3 = vcombine.high %v7138_v60, %v7139_v62  ;;  %v674_v5 = vunpack.c.0.s8 %v673_v57  ;;  %vm9375_vm1 = vmmov %vm9374_vm15  ;;  %s8659_s26 = scalar_lea.vmem %s6794_s25, 128 }
  0x7b   :  { %v7142_v0 = vld.sshfl [vmem:[#allocation2 + $0x32] sm:$0xff pattern:$0x75316420]  ;;  %v7144_v12 = vld.sshfl [vmem:[#allocation2 + $0x3c] sm:$0xff pattern:$0x75316420]  ;;  %vm9376_vm3 = vmmov %vm9375_vm1  ;;  %p8660_p10 = scmp.ne.s32.totalorder %s6794_s25, %s8659_s26  ;;  %p8665_p12 = scmp.lt.s32.totalorder %s8659_s26, %s8659_s26 }
  0x7c   :  { %v7141_v6 = vld.sshfl [vmem:[#allocation2 + $0x1c] sm:$0x11 pattern:$0x75316420]  ;;  %v3159_v10 = vshrl.u32 %v3108_v1, 16  ;;  %v3164_v11 = vshll.u32 %v3109_v3, 16  ;;  %v8968_v25 = vsub.s32 %v674_v5, %v8819_v61  ;;  %vm9377_vm14 = vmmov %vm9375_vm1 }
  0x7d   :  { %v7143_v7 = vld.sshfl [vmem:[#allocation2 + $0x3a] sm:$0x11 pattern:$0x75316420]  ;;  %v3124_v8 = vcombine.low %v7140_v63, %v7141_v6  ;;  %v3125_v9 = vcombine.high %v7140_v63, %v7141_v6  ;;  %v3261_v63 = vld [vmem:[#allocation8 + $0xa70] sm:$0x11]  ;;  %vm9379_vm12 = vmmov %vm9375_vm1  ;;  %p8666_p13 = por %p8665_p12, %p8664_p11 }
  0x7e   :  { %v3140_v13 = vcombine.low %v7142_v0, %v7143_v7  ;;  %v3141_v14 = vcombine.high %v7142_v0, %v7143_v7  ;;  %v6818_v15 = vld.sshfl [vmem:[#allocation2] sm:$0xff pattern:$0x75316420]  ;;  %v3166_v17 = vsel %vm8961_vm4, %v3159_v10, %v3164_v11  ;;  %v6822_v28 = vld.sshfl [vmem:[#allocation2 + $0x28] sm:$0xff pattern:$0x75316420]  ;;  %v7217_v11 = vcombine.high %v3261_v63, %v3261_v63  ;;  %vm9381_vm0 = vmmov %vm9375_vm1 }
  0x7f   :  { %v7145_v16 = vld.sshfl [vmem:[#allocation2 + $0x44] sm:$0x11 pattern:$0x75316420]  ;;  %v3168_v18 = vshrl.u32 %v3124_v8, 16  ;;  %v3173_v19 = vshll.u32 %v3125_v9, 16  ;;  %vm9384_vm8 = vmmov %vm9381_vm0  ;;  %p8667_p0 = pnand %p8666_p13, %p8660_p10 }
  0x80   :  { %v3156_v20 = vcombine.low %v7144_v12, %v7145_v16  ;;  %v3157_v21 = vcombine.high %v7144_v12, %v7145_v16  ;;  %v3177_v22 = vshrl.u32 %v3140_v13, 16  ;;  %v3182_v23 = vshll.u32 %v3141_v14, 16  ;;  %v6819_v24 = vld.sshfl [vmem:[#allocation2 + $0x8] sm:$0x11 pattern:$0x75316420]  ;;  %vm9385_vm13 = vmmov %vm9381_vm0 }
  0x81   :  { %v3175_v26 = vsel %vm8961_vm4, %v3168_v18, %v3173_v19  ;;  %v500_v29 = vcombine.low %v6818_v15, %v6819_v24  ;;  %v501_v30 = vcombine.high %v6818_v15, %v6819_v24  ;;  %v6823_v36 = vld.sshfl [vmem:[#allocation2 + $0x30] sm:$0x11 pattern:$0x75316420]  ;;  %v7774_v8 = vld [vmem:[#allocation8 + $0xa60] ss:$8 sps:$4 sm:$0xff]   ;;  %v7216_v12 = vcombine.low %v3261_v63, %v3261_v63  ;;  %vm9386_vm9 = vmmov %vm9381_vm0 }
  0x82   :  { %v3184_v31 = vsel %vm8961_vm4, %v3177_v22, %v3182_v23  ;;  %v3186_v33 = vshrl.u32 %v3156_v20, 16  ;;  %v3191_v34 = vshll.u32 %v3157_v21, 16  ;;  %v3262_v35 = vcombine.low %v3166_v17, %v3175_v26  ;;  %v7771_v14 = vld [vmem:[#allocation8 + $0x318] ss:$8 sps:$4 sm:$0xff]   ;;  %v7779_v18 = vld [vmem:[#allocation8 + $0x32c] ss:$8 sps:$4 sm:$0xff]   ;;  %vm9387_vm10 = vmmov %vm9381_vm0 }
  0x83   :  { %v532_v37 = vcombine.low %v6822_v28, %v6823_v36  ;;  %v533_v38 = vcombine.high %v6822_v28, %v6823_v36  ;;  %v565_v39 = vshrl.u32 %v500_v29, 16  ;;  %v570_v41 = vshll.u32 %v501_v30, 16  ;;  %v7787_v21 = vld [vmem:[#allocation8 + $0xa7c] ss:$8 sps:$4 sm:$0xff]   ;;  %v7777_v22 = vld [vmem:[#allocation8 + $0x328] ss:$8 sps:$4 sm:$0xff]  }
  0x84   :  { %v3193_v40 = vsel %vm8961_vm4, %v3186_v33, %v3191_v34  ;;  %v3272_v43 = vrot.slane %v3262_v35, %v8968_v25  ;;  %v3263_v0 = vcombine.high %v3166_v17, %v3175_v26  ;;  %v3663_v20 = vsel %vm9375_vm1, %v7216_v12, 0  ;;  %v7784_v23 = vld [vmem:[#allocation8 + $0x33c] ss:$8 sps:$4 sm:$0xff]   ;;  %v7782_v26 = vld [vmem:[#allocation8 + $0x338] ss:$8 sps:$4 sm:$0xff]  }
  0x85   :  { %v3264_v42 = vcombine.low %v3184_v31, %v3193_v40  ;;  %v583_v44 = vshrl.u32 %v532_v37, 16  ;;  %v572_v45 = vsel %vm8961_vm4, %v565_v39, %v570_v41  ;;  %v588_v46 = vshll.u32 %v533_v38, 16  ;;  %v7790_v28 = vld [vmem:[#allocation8 + $0x34c] ss:$8 sps:$4 sm:$0xff]   ;;  %v7785_v30 = vld [vmem:[#allocation8 + $0xa78] ss:$8 sps:$4 sm:$0xff]  }
  0x86   :  { %v668_v48 = vcombine.low %v572_v45, %v3166_v17  ;;  %v669_v49 = vcombine.high %v572_v45, %v3166_v17  ;;  %v3265_v1 = vcombine.high %v3184_v31, %v3193_v40  ;;  %v3279_v16 = vrot.slane %v3263_v0, %v8968_v25  ;;  %v7788_v33 = vld [vmem:[#allocation8 + $0x348] ss:$8 sps:$4 sm:$0xff]   ;;  %v7799_v35 = vld [vmem:[#allocation8 + $0xa9c] ss:$8 sps:$4 sm:$0xff]   ;;  %v7794_v36 = vld [vmem:[#allocation8 + $0x358] ss:$8 sps:$4 sm:$0xff]  }
  0x87   :  { %v3286_v47 = vrot.slane %v3264_v42, %v8968_v25  ;;  %v590_v50 = vsel %vm8961_vm4, %v583_v44, %v588_v46  ;;  %v7791_v34 = vld [vmem:[#allocation8 + $0xa88] ss:$8 sps:$4 sm:$0xff]   ;;  %v7802_v37 = vld [vmem:[#allocation8 + $0x36c] ss:$8 sps:$4 sm:$0xff]   ;;  %v7797_v38 = vld [vmem:[#allocation8 + $0xa98] ss:$8 sps:$4 sm:$0xff]  }
  0x88   :  { %v670_v52 = vcombine.low %v590_v50, %v3184_v31  ;;  %v671_v53 = vcombine.high %v590_v50, %v3184_v31  ;;  %v678_v54 = vrot.slane %v668_v48, %v8968_v25  ;;  %v8984_v56 = vrot.slane %v669_v49, %v8968_v25  ;;  %v7793_v31 = vld [vmem:[#allocation8 + $0xa8c] ss:$8 sps:$4 sm:$0xff]   ;;  %v7800_v40 = vld [vmem:[#allocation8 + $0x368] ss:$8 sps:$4 sm:$0xff]   ;;  %v7808_v41 = vld [vmem:[#allocation8 + $0x37c] ss:$8 sps:$4 sm:$0xff]  }
  0x89   :  { %v3295_v51 = vcombine.high %v3272_v43, %v3286_v47  ;;  %v3294_v57 = vcombine.low %v3272_v43, %v3286_v47  ;;  %v3293_v17 = vrot.slane %v3265_v1, %v8968_v25  ;;  %v7805_v39 = vld [vmem:[#allocation8 + $0xaac] ss:$8 sps:$4 sm:$0xff]   ;;  %v7803_v42 = vld [vmem:[#allocation8 + $0xaa8] ss:$8 sps:$4 sm:$0xff]   ;;  %v7811_v43 = vld [vmem:[#allocation8 + $0xabc] ss:$8 sps:$4 sm:$0xff]  }
  0x8a   :  { %v692_v60 = vrot.slane %v670_v52, %v8968_v25  ;;  %v8991_v62 = vrot.slane %v671_v53, %v8968_v25  ;;  %v7806_v44 = vld [vmem:[#allocation8 + $0x378] ss:$8 sps:$4 sm:$0xff]   ;;  %v7814_v45 = vld [vmem:[#allocation8 + $0x38c] ss:$8 sps:$4 sm:$0xff]   ;;  %v7812_v47 = vld [vmem:[#allocation8 + $0x388] ss:$8 sps:$4 sm:$0xff]  }
  0x8b   :  { %v8987_v59 = vrot.slane %v3295_v51, %v8968_v25  ;;  %v8994_v3 = vrot.slane %v3294_v57, %v8968_v25  ;;  %v3296_v24 = vcombine.low %v3279_v16, %v3293_v17  ;;  %v7809_v46 = vld [vmem:[#allocation8 + $0xab8] ss:$8 sps:$4 sm:$0xff]   ;;  %v7817_v48 = vld [vmem:[#allocation8 + $0xacc] ss:$8 sps:$4 sm:$0xff]   ;;  %v7815_v49 = vld [vmem:[#allocation8 + $0xac8] ss:$8 sps:$4 sm:$0xff]  }
  0x8c   :  { %v701_v6 = vcombine.high %v678_v54, %v692_v60  ;;  %v702_v7 = vcombine.low %v8984_v56, %v8991_v62  ;;  %v700_v9 = vcombine.low %v678_v54, %v692_v60  ;;  %v7820_v50 = vld [vmem:[#allocation8 + $0x39c] ss:$8 sps:$4 sm:$0xff]   ;;  %v7818_v51 = vld [vmem:[#allocation8 + $0x398] ss:$8 sps:$4 sm:$0xff]   ;;  %v7826_v60 = vld [vmem:[#allocation8 + $0x3ac] ss:$8 sps:$4 sm:$0xff]  }
  0x8d   :  { %v3319_v5 = vcombine.high %v8987_v59, %v8987_v59  ;;  %v3318_v10 = vcombine.high %v8994_v3, %v8994_v3  ;;  %v3310_v29 = vrot.slane %v3296_v24, %v8968_v25  ;;  %v7823_v52 = vld [vmem:[#allocation8 + $0xadc] ss:$8 sps:$4 sm:$0xff]   ;;  %v7220_v53 = vld.sshfl [vmem:[#allocation2 + $0xa] sm:$0xf0 pattern:$0x75316420] }
  0x8e   :  { %v723_v13 = vrot.slane %v701_v6, %v8968_v25  ;;  %v9004_v15 = vrot.slane %v700_v9, %v8968_v25  ;;  %v7821_v54 = vld [vmem:[#allocation8 + $0xad8] ss:$8 sps:$4 sm:$0xff]   ;;  %v7224_v63 = vld.sshfl [vmem:[#allocation2 + $0x32] sm:$0xf0 pattern:$0x75316420] }
  0x8f   :  { %3741 = vmatprep.mubr.bf16.mxu0 %v3319_v5  ;;  %v7222_v57 = vld.sshfl [vmem:[#allocation2 + $0x14] sm:$0xf0 pattern:$0x75316420]  ;;  %v7847_v24 = vld [vmem:[#allocation8 + $0xb1c] ss:$8 sps:$4 sm:$0xff]  }
  0x90   :  { %3742 = vmatmul.mubr.bf16.vlgmr.msra.gmra.mrb[0].mxu0 %v3318_v10  ;;  %v725_v19 = vcombine.high %v723_v13, %v723_v13  ;;  %1108 = vmatprep.mubr.bf16.mxu1 %v723_v13  ;;  %v7228_v0 = vcombine.high %v7220_v53, %v7222_v57  ;;  %v7226_v1 = vld.sshfl [vmem:[#allocation2 + $0x3c] sm:$0xf0 pattern:$0x75316420]  ;;  %v7829_v5 = vld [vmem:[#allocation8 + $0xaec] ss:$8 sps:$4 sm:$0xff]  }
  0x91   :  { %3751 = vmatpush1.bf16.msra.mxu0 %v7774_v8  ;;  %1109 = vmatmul.mubr.bf16.vlgmr.msra.gmra.mrb[0].mxu1 %v9004_v15  ;;  %v7230_v6 = vcombine.high %v7224_v63, %v7226_v1  ;;  %v7824_v9 = vld [vmem:[#allocation8 + $0x3a8] ss:$8 sps:$4 sm:$0xff]   ;;  %v7832_v10 = vld [vmem:[#allocation8 + $0x3bc] ss:$8 sps:$4 sm:$0xff]   ;;  %v7830_v16 = vld [vmem:[#allocation8 + $0x3b8] ss:$8 sps:$4 sm:$0xff]  }
  0x92   :  { %7218 = vmatprep.subr.msk.bf16.mxu0 %vm9374_vm15, %v7217_v11  ;;  %1118 = vmatpush1.bf16.msra.mxu1 %v7771_v14  ;;  %v9015_v8 = vrot.slane %v7228_v0, %v8968_v25  ;;  %v7827_v12 = vld [vmem:[#allocation8 + $0xae8] ss:$8 sps:$4 sm:$0xff]   ;;  %v7835_v13 = vld [vmem:[#allocation8 + $0xafc] ss:$8 sps:$4 sm:$0xff]   ;;  %v7838_v17 = vld [vmem:[#allocation8 + $0x3cc] ss:$8 sps:$4 sm:$0xff]  }
  0x93   :  { %3782 = vmatprep.mubr.bf16.mxu0 %v8696_v2  ;;  %1119 = vmatprep.subr.bf16.mxu1 %v7779_v18  ;;  %v7796_v2 = vld [vmem:[#allocation8 + $0x35c] ss:$8 sps:$4 sm:$0xff]   ;;  %v9018_v11 = vrot.slane %v7230_v6, %v8968_v25  ;;  %v7873_v53 = vld [vmem:[#allocation8 + $0xb68] ss:$8 sps:$4 sm:$0xff]   ;;  %v7880_v57 = vld [vmem:[#allocation8 + $0xb78] ss:$8 sps:$4 sm:$0xff]  }
  0x94   :  { %1149 = vmatprep.mubr.bf16.mxu1 %v725_v19  ;;  %v7833_v19 = vld [vmem:[#allocation8 + $0xaf8] ss:$8 sps:$4 sm:$0xff]   ;;  %v7888_v6 = vld [vmem:[#allocation8 + $0xb8c] ss:$8 sps:$4 sm:$0xff]   ;;  %v7894_v56 = vld [vmem:[#allocation8 + $0xb9c] ss:$8 sps:$4 sm:$0xff]  }
  0x95   :  { %3753 = vmatpush1.bf16.msra.mxu0 %v3663_v20  ;;  %v3970_v14 = vcombine.high %v9015_v8, %v9018_v11  ;;  %v7841_v20 = vld [vmem:[#allocation8 + $0xb0c] ss:$8 sps:$4 sm:$0xff]   ;;  %v7877_v63 = vld [vmem:[#allocation8] ss:$8 sps:$4 sm:$0xff]   ;;  %v7883_v62 = vld [vmem:[#allocation8 + $0x10] ss:$8 sps:$4 sm:$0xff]  }
  0x96   :  { %4343 = vmatprep.subr.bf16.mxu0 %v7787_v21  ;;  %1120 = vmatpush1.bf16.msra.mxu1 %v7777_v22  ;;  %v7836_v21 = vld [vmem:[#allocation8 + $0x3c8] ss:$8 sps:$4 sm:$0xff]   ;;  %v7844_v22 = vld [vmem:[#allocation8 + $0x3dc] ss:$8 sps:$4 sm:$0xff]   ;;  %vm9389_vm15 = vmmov %vm9381_vm0 }
  0x97   :  { %1121 = vmatprep.subr.bf16.mxu1 %v7784_v23  ;;  %v9023_v18 = vrot.slane %v3970_v14, %v8968_v25  ;;  %v7839_v23 = vld [vmem:[#allocation8 + $0xb08] ss:$8 sps:$4 sm:$0xff]   ;;  %v6810_v1 = vld.sshfl [vmem:[#allocation2] sm:$0xf pattern:$0x75316420] }
  0x98   :  { %v7302_v55 = vld.sshfl [vmem:[#allocation2 + $0x14] sm:$0xf pattern:$0x75316420] }
  0x99   :  { %v3994_v0 = vcombine.high %v9023_v18, %v9023_v18  ;;  %v7389_v27 = vld.sshfl [vmem:[#allocation2 + $0x44] sm:$0x11 pattern:$0x75316420]  ;;  %v8129_v4 = vld [vmem:[#allocation8 + $0x4b4] ss:$8 sps:$4 sm:$0xff]  }
  0x9a   :  { %1122 = vmatpush1.bf16.msra.mxu1 %v7782_v26  ;;  %v7842_v26 = vld [vmem:[#allocation8 + $0x3d8] ss:$8 sps:$4 sm:$0xff]  }
  0x9b   :  { %1123 = vmatprep.subr.bf16.mxu1 %v7790_v28  ;;  %v7850_v28 = vld [vmem:[#allocation8 + $0x3ec] ss:$8 sps:$4 sm:$0xff]  }
  0x9c   :  { %7219 = vmatmul.mubr.msk.bf16.vlgmr.msra.gmra.mrb[0].mxu0 %vm1065_vm5, %v3310_v29  ;;  %v7845_v29 = vld [vmem:[#allocation8 + $0xb18] ss:$8 sps:$4 sm:$0xff]  }
  0x9d   :  { %4344 = vmatpush1.bf16.msra.mxu0 %v7785_v30  ;;  %4375 = vmatprep.mubr.bf16.mxu0 %v9023_v18  ;;  %v7853_v30 = vld [vmem:[#allocation8 + $0xb2c] ss:$8 sps:$4 sm:$0xff]   ;;  %v7892_v18 = vld [vmem:[#allocation8 + $0xb98] ss:$8 sps:$4 sm:$0xff]  }
  0x9e   :  { %4345 = vmatprep.subr.bf16.mxu0 %v7793_v31  ;;  %1124 = vmatpush1.bf16.msra.mxu1 %v7788_v33  ;;  %v7848_v31 = vld [vmem:[#allocation8 + $0x3e8] ss:$8 sps:$4 sm:$0xff]   ;;  %v7856_v33 = vld [vmem:[#allocation8 + $0x3fc] ss:$8 sps:$4 sm:$0xff]  }
  0x9f   :  { %1125 = vmatprep.subr.bf16.mxu1 %v7796_v2  ;;  %v7851_v2 = vld [vmem:[#allocation8 + $0xb28] ss:$8 sps:$4 sm:$0xff]  }
  0xa1   :  { %4346 = vmatpush1.bf16.msra.mxu0 %v7791_v34  ;;  %v7859_v34 = vld [vmem:[#allocation8 + $0xb3c] ss:$8 sps:$4 sm:$0xff]  }
  0xa2   :  { %4347 = vmatprep.subr.bf16.mxu0 %v7799_v35  ;;  %1126 = vmatpush1.bf16.msra.mxu1 %v7794_v36  ;;  %v7854_v35 = vld [vmem:[#allocation8 + $0x3f8] ss:$8 sps:$4 sm:$0xff]   ;;  %v7862_v36 = vld [vmem:[#allocation8 + $0x40c] ss:$8 sps:$4 sm:$0xff]  }
  0xa3   :  { %1127 = vmatprep.subr.bf16.mxu1 %v7802_v37  ;;  %v7857_v37 = vld [vmem:[#allocation8 + $0xb38] ss:$8 sps:$4 sm:$0xff]  }
  0xa5   :  { %4348 = vmatpush1.bf16.msra.mxu0 %v7797_v38  ;;  %v7865_v38 = vld [vmem:[#allocation8 + $0xb4c] ss:$8 sps:$4 sm:$0xff]  }
  0xa6   :  { %4349 = vmatprep.subr.bf16.mxu0 %v7805_v39  ;;  %1128 = vmatpush1.bf16.msra.mxu1 %v7800_v40  ;;  %v7860_v39 = vld [vmem:[#allocation8 + $0x408] ss:$8 sps:$4 sm:$0xff]  }
  0xa7   :  { %1129 = vmatprep.subr.bf16.mxu1 %v7808_v41  ;;  %v7863_v40 = vld [vmem:[#allocation8 + $0xb48] ss:$8 sps:$4 sm:$0xff]   ;;  %v7868_v41 = vld [vmem:[#allocation8 + $0x41c] ss:$8 sps:$4 sm:$0xff]  }
  0xa9   :  { %4350 = vmatpush1.bf16.msra.mxu0 %v7803_v42  ;;  %v667_v42 = vld [vmem:[#allocation8 + $0x428] sm:$0x11] }
  0xaa   :  { %4351 = vmatprep.subr.bf16.mxu0 %v7811_v43  ;;  %1130 = vmatpush1.bf16.msra.mxu1 %v7806_v44  ;;  %v724_v43 = vcombine.high %v9004_v15, %v9004_v15  ;;  %v7871_v44 = vld [vmem:[#allocation8 + $0xb5c] ss:$8 sps:$4 sm:$0xff]  }
  0xab   :  { %1131 = vmatprep.subr.bf16.mxu1 %v7814_v45  ;;  %v7866_v45 = vld [vmem:[#allocation8 + $0x418] ss:$8 sps:$4 sm:$0xff]  }
  0xad   :  { %4352 = vmatpush1.bf16.msra.mxu0 %v7809_v46  ;;  %v6897_v46 = vcombine.high %v667_v42, %v667_v42 }
  0xae   :  { %4353 = vmatprep.subr.bf16.mxu0 %v7817_v48  ;;  %1132 = vmatpush1.bf16.msra.mxu1 %v7812_v47  ;;  %v6896_v47 = vcombine.low %v667_v42, %v667_v42  ;;  %v7869_v48 = vld [vmem:[#allocation8 + $0xb58] ss:$8 sps:$4 sm:$0xff]   ;;  %v7922_v42 = vld [vmem:[#allocation8 + $0xbe8] ss:$8 sps:$4 sm:$0xff]  }
  0xaf   :  { %1133 = vmatprep.subr.bf16.mxu1 %v7820_v50  ;;  %v9028_v50 = vld [vmem:[#allocation2 + $0x1e] sm:$0xff] }
  0xb0   :  { %v1071_v15 = vsel %vm9377_vm14, %v6896_v47, 0  ;;  %v7936_v47 = vld [vmem:[#allocation8 + $0xc0c] ss:$8 sps:$4 sm:$0xff]   ;;  %vm6544_vm14 = vcmask 1043456  }
  0xb1   :  { %4354 = vmatpush1.bf16.msra.mxu0 %v7815_v49  ;;  %v7875_v49 = vld [vmem:[#allocation8 + $0xb6c] ss:$8 sps:$4 sm:$0xff]  }
  0xb2   :  { %4355 = vmatprep.subr.bf16.mxu0 %v7823_v52  ;;  %1134 = vmatpush1.bf16.msra.mxu1 %v7818_v51  ;;  %v7879_v51 = vld [vmem:[#allocation8 + $0x4] ss:$8 sps:$4 sm:$0xff]   ;;  %v3969_v52 = vcombine.low %v9015_v8, %v9018_v11 }
  0xb3   :  { %1135 = vmatprep.subr.bf16.mxu1 %v7826_v60  ;;  %v6812_v8 = vld.sshfl [vmem:[#allocation2 + $0xa] sm:$0xf pattern:$0x75316420] }
  0xb4   :  { %v9036_v60 = vrot.slane %v3969_v52, %v8968_v25  ;;  %v6900_v11 = vcombine.low %v6810_v1, %v6812_v8  ;;  %v7931_v52 = vld [vmem:[#allocation8 + $0x90] ss:$8 sps:$4 sm:$0xff]   ;;  %v7951_v8 = vld [vmem:[#allocation8 + $0xc4] ss:$8 sps:$4 sm:$0xff]  }
  0xb5   :  { %4356 = vmatpush1.bf16.msra.mxu0 %v7821_v54  ;;  %v7882_v54 = vld [vmem:[#allocation8 + $0xb7c] ss:$8 sps:$4 sm:$0xff]   ;;  %v7946_v1 = vld [vmem:[#allocation8 + $0xc28] ss:$8 sps:$4 sm:$0xff]  }
  0xb6   :  { %4357 = vmatprep.subr.bf16.mxu0 %v7829_v5  ;;  %1136 = vmatpush1.bf16.msra.mxu1 %v7824_v9  ;;  %v716_v5 = vrot.slane %v702_v7, %v8968_v25  ;;  %v7885_v9 = vld [vmem:[#allocation8 + $0x14] ss:$8 sps:$4 sm:$0xff]  }
  0xb7   :  { %1137 = vmatprep.subr.bf16.mxu1 %v7832_v10  ;;  %v6814_v10 = vld.sshfl [vmem:[#allocation2 + $0x28] sm:$0xf pattern:$0x75316420] }
  0xb9   :  { %4358 = vmatpush1.bf16.msra.mxu0 %v7827_v12  ;;  %v6816_v12 = vld.sshfl [vmem:[#allocation2 + $0x32] sm:$0xf pattern:$0x75316420] }
  0xba   :  { %4359 = vmatprep.subr.bf16.mxu0 %v7835_v13  ;;  %1138 = vmatpush1.bf16.msra.mxu1 %v7830_v16  ;;  %v7886_v13 = vld [vmem:[#allocation8 + $0xb88] ss:$8 sps:$4 sm:$0xff]   ;;  %v6902_v14 = vcombine.low %v6814_v10, %v6816_v12  ;;  %v9046_v16 = vrot.slane %v6900_v11, %v8968_v25  ;;  %v7960_v10 = vld [vmem:[#allocation8 + $0xc4c] ss:$8 sps:$4 sm:$0xff]  }
  0xbb   :  { %1139 = vmatprep.subr.bf16.mxu1 %v7838_v17  ;;  %v7891_v17 = vld [vmem:[#allocation8 + $0x24] ss:$8 sps:$4 sm:$0xff]   ;;  %v7949_v11 = vld [vmem:[#allocation8 + $0xc0] ss:$8 sps:$4 sm:$0xff]   ;;  %v7957_v12 = vld [vmem:[#allocation8 + $0xd4] ss:$8 sps:$4 sm:$0xff]  }
  0xbc   :  { %v9050_v7 = vrot.slane %v6902_v14, %v8968_v25  ;;  %v102_v14 = vld [vmem:[#allocation2 + $0x1e] sm:$0x55] }
  0xbd   :  { %4360 = vmatpush1.bf16.msra.mxu0 %v7833_v19 }
  0xbe   :  { %4361 = vmatprep.subr.bf16.mxu0 %v7841_v20  ;;  %1140 = vmatpush1.bf16.msra.mxu1 %v7836_v21  ;;  %v1232_v19 = vcombine.high %v9046_v16, %v9050_v7  ;;  %v7900_v20 = vld [vmem:[#allocation8 + $0xbac] ss:$8 sps:$4 sm:$0xff]   ;;  %v7889_v21 = vld [vmem:[#allocation8 + $0x20] ss:$8 sps:$4 sm:$0xff]  }
  0xbf   :  { %1141 = vmatprep.subr.bf16.mxu1 %v7844_v22 }
  0xc0   :  { %v9055_v22 = vrot.slane %v1232_v19, %v8968_v25  ;;  %v7955_v19 = vld [vmem:[#allocation8 + $0xd0] ss:$8 sps:$4 sm:$0xff]  }
  0xc1   :  { %4362 = vmatpush1.bf16.msra.mxu0 %v7839_v23  ;;  %v7897_v23 = vld [vmem:[#allocation8 + $0x34] ss:$8 sps:$4 sm:$0xff]  }
  0xc2   :  { %4363 = vmatprep.subr.bf16.mxu0 %v7847_v24  ;;  %1142 = vmatpush1.bf16.msra.mxu1 %v7842_v26  ;;  %v7898_v24 = vld [vmem:[#allocation8 + $0xba8] ss:$8 sps:$4 sm:$0xff]   ;;  %v7906_v26 = vld [vmem:[#allocation8 + $0xbbc] ss:$8 sps:$4 sm:$0xff]  }
  0xc3   :  { %1143 = vmatprep.subr.bf16.mxu1 %v7850_v28  ;;  %v7895_v28 = vld [vmem:[#allocation8 + $0x30] ss:$8 sps:$4 sm:$0xff]  }
  0xc5   :  { %4364 = vmatpush1.bf16.msra.mxu0 %v7845_v29  ;;  %v7903_v29 = vld [vmem:[#allocation8 + $0x44] ss:$8 sps:$4 sm:$0xff]  }
  0xc6   :  { %4365 = vmatprep.subr.bf16.mxu0 %v7853_v30  ;;  %1144 = vmatpush1.bf16.msra.mxu1 %v7848_v31  ;;  %v7904_v30 = vld [vmem:[#allocation8 + $0xbb8] ss:$8 sps:$4 sm:$0xff]   ;;  %v7912_v31 = vld [vmem:[#allocation8 + $0xbcc] ss:$8 sps:$4 sm:$0xff]  }
  0xc7   :  { %1145 = vmatprep.subr.bf16.mxu1 %v7856_v33  ;;  %v7901_v33 = vld [vmem:[#allocation8 + $0x40] ss:$8 sps:$4 sm:$0xff]  }
  0xc9   :  { %4366 = vmatpush1.bf16.msra.mxu0 %v7851_v2  ;;  %v7909_v2 = vld [vmem:[#allocation8 + $0x54] ss:$8 sps:$4 sm:$0xff]  }
  0xca   :  { %4367 = vmatprep.subr.bf16.mxu0 %v7859_v34  ;;  %1146 = vmatpush1.bf16.msra.mxu1 %v7854_v35  ;;  %v7910_v34 = vld [vmem:[#allocation8 + $0xbc8] ss:$8 sps:$4 sm:$0xff]   ;;  %v7918_v35 = vld [vmem:[#allocation8 + $0xbdc] ss:$8 sps:$4 sm:$0xff]  }
  0xcb   :  { %1147 = vmatprep.subr.bf16.mxu1 %v7862_v36  ;;  %v7907_v36 = vld [vmem:[#allocation8 + $0x50] ss:$8 sps:$4 sm:$0xff]  }
  0xcd   :  { %4368 = vmatpush1.bf16.msra.mxu0 %v7857_v37  ;;  %v7915_v37 = vld [vmem:[#allocation8 + $0x64] ss:$8 sps:$4 sm:$0xff]  }
  0xce   :  { %4369 = vmatprep.subr.bf16.mxu0 %v7865_v38  ;;  %1148 = vmatpush1.bf16.msra.mxu1 %v7860_v39  ;;  %v7916_v38 = vld [vmem:[#allocation8 + $0xbd8] ss:$8 sps:$4 sm:$0xff]   ;;  %v7924_v39 = vld [vmem:[#allocation8 + $0xbec] ss:$8 sps:$4 sm:$0xff]  }
  0xcf   :  { %1158 = vmatprep.subr.bf16.mxu1 %v7868_v41  ;;  %v7921_v41 = vld [vmem:[#allocation8 + $0x74] ss:$8 sps:$4 sm:$0xff]  }
  0xd1   :  { %4370 = vmatpush1.bf16.msra.mxu0 %v7863_v40  ;;  %1150 = vmatmul.mubr.bf16.vlgmr.msra.gmra.mrb[0].mxu1 %v724_v43  ;;  %v7913_v40 = vld [vmem:[#allocation8 + $0x60] ss:$8 sps:$4 sm:$0xff]   ;;  %v7930_v43 = vld [vmem:[#allocation8 + $0xbfc] ss:$8 sps:$4 sm:$0xff]  }
  0xd2   :  { %4371 = vmatprep.subr.bf16.mxu0 %v7871_v44  ;;  %1159 = vmatpush1.bf16.msra.mxu1 %v7866_v45  ;;  %v7919_v44 = vld [vmem:[#allocation8 + $0x70] ss:$8 sps:$4 sm:$0xff]   ;;  %v7927_v45 = vld [vmem:[#allocation8 + $0x84] ss:$8 sps:$4 sm:$0xff]  }
  0xd3   :  { %1190 = vmatprep.mubr.bf16.mxu1 %v9028_v50  ;;  %6898 = vmatprep.subr.msk.bf16.mxu1 %vm9376_vm3, %v6897_v46  ;;  %v7928_v46 = vld [vmem:[#allocation8 + $0xbf8] ss:$8 sps:$4 sm:$0xff]   ;;  %vm9391_vm3 = vmmov %vm9381_vm0 }
  0xd5   :  { %4372 = vmatpush1.bf16.msra.mxu0 %v7869_v48  ;;  %v7925_v48 = vld [vmem:[#allocation8 + $0x80] ss:$8 sps:$4 sm:$0xff]  }
  0xd6   :  { %4373 = vmatprep.subr.bf16.mxu0 %v7875_v49  ;;  %1161 = vmatpush1.bf16.msra.mxu1 %v1071_v15  ;;  %v7933_v49 = vld [vmem:[#allocation8 + $0x94] ss:$8 sps:$4 sm:$0xff]   ;;  %v7934_v15 = vld [vmem:[#allocation8 + $0xc08] ss:$8 sps:$4 sm:$0xff]  }
  0xd7   :  { %1605 = vmatprep.subr.bf16.mxu1 %v7879_v51  ;;  %v7942_v51 = vld [vmem:[#allocation8 + $0xc1c] ss:$8 sps:$4 sm:$0xff]  }
  0xd9   :  { %4374 = vmatpush1.bf16.msra.mxu0 %v7873_v53  ;;  %v7939_v53 = vld [vmem:[#allocation8 + $0xa4] ss:$8 sps:$4 sm:$0xff]  }
  0xda   :  { %4384 = vmatprep.subr.bf16.mxu0 %v7882_v54  ;;  %v7940_v54 = vld [vmem:[#allocation8 + $0xc18] ss:$8 sps:$4 sm:$0xff]  }
  0xdc   :  { %4376 = vmatmul.mubr.bf16.vlgmr.msra.gmra.mrb[0].mxu0 %v9036_v60 }
  0xdd   :  { %4385 = vmatpush1.bf16.msra.mxu0 %v7880_v57  ;;  %4416 = vmatprep.mubr.bf16.mxu0 %v3994_v0  ;;  %v7948_v57 = vld [vmem:[#allocation8 + $0xc2c] ss:$8 sps:$4 sm:$0xff]  }
  0xde   :  { %6899 = vmatmul.mubr.msk.bf16.vlgmr.msra.gmra.mrb[0].mxu1 %vm1065_vm5, %v716_v5  ;;  %4386 = vmatprep.subr.bf16.mxu0 %v7888_v6  ;;  %v7945_v0 = vld [vmem:[#allocation8 + $0xb4] ss:$8 sps:$4 sm:$0xff]   ;;  %v7943_v6 = vld [vmem:[#allocation8 + $0xb0] ss:$8 sps:$4 sm:$0xff]  }
  0xdf   :  { %1606 = vmatpush1.bf16.msra.mxu1 %v7877_v63  ;;  %1637 = vmatprep.mubr.bf16.mxu1 %v9055_v22  ;;  %v7937_v63 = vld [vmem:[#allocation8 + $0xa0] ss:$8 sps:$4 sm:$0xff]   ;;  %v7954_v5 = vld [vmem:[#allocation8 + $0xc3c] ss:$8 sps:$4 sm:$0xff]  }
  0xe0   :  { %1607 = vmatprep.subr.bf16.mxu1 %v7885_v9  ;;  %v7952_v9 = vld [vmem:[#allocation8 + $0xc38] ss:$8 sps:$4 sm:$0xff]  }
  0xe1   :  { %4387 = vmatpush1.bf16.msra.mxu0 %v7886_v13  ;;  %v7958_v13 = vld [vmem:[#allocation8 + $0xc48] ss:$8 sps:$4 sm:$0xff]  }
  0xe2   :  { %4388 = vmatprep.subr.bf16.mxu0 %v7894_v56  ;;  %v126_v56 = vld [vmem:[#allocation2 + $0x46] sm:$0x55] }
  0xe3   :  { %1608 = vmatpush1.bf16.msra.mxu1 %v7883_v62  ;;  %v7966_v62 = vld [vmem:[#allocation8 + $0xc5c] ss:$8 sps:$4 sm:$0xff]  }
  0xe4   :  { %1609 = vmatprep.subr.bf16.mxu1 %v7891_v17  ;;  %v103_v17 = vsel %vm8809_vm11, 0, %v102_v14  ;;  %v7998_v14 = vld [vmem:[#allocation8 + $0x144] ss:$8 sps:$4 sm:$0xff]  }
  0xe5   :  { %4389 = vmatpush1.bf16.msra.mxu0 %v7892_v18  ;;  %v127_v18 = vsel %vm8809_vm11, 0, %v126_v56  ;;  %104 = vst [vmem:[#allocation2 + $0x1e] sm:$0x55] %v103_v17  ;;  %vm9378_vm11 = vmmov %vm9375_vm1  ;;  %v7993_v56 = vld [vmem:[#allocation8 + $0xca0] ss:$8 sps:$4 sm:$0xff]  }
  0xe6   :  { %4390 = vmatprep.subr.bf16.mxu0 %v7900_v20  ;;  %128 = vst [vmem:[#allocation2 + $0x46] sm:$0x55] %v127_v18  ;;  %v7963_v20 = vld [vmem:[#allocation8 + $0xe4] ss:$8 sps:$4 sm:$0xff]   ;;  %v7996_v17 = vld [vmem:[#allocation8 + $0x140] ss:$8 sps:$4 sm:$0xff]  }
  0xe7   :  { %1610 = vmatpush1.bf16.msra.mxu1 %v7889_v21  ;;  %v7964_v21 = vld [vmem:[#allocation8 + $0xc58] ss:$8 sps:$4 sm:$0xff]   ;;  %v8004_v18 = vld [vmem:[#allocation8 + $0x154] ss:$8 sps:$4 sm:$0xff]  }
  0xe8   :  { %1611 = vmatprep.subr.bf16.mxu1 %v7897_v23  ;;  %v7961_v23 = vld [vmem:[#allocation8 + $0xe0] ss:$8 sps:$4 sm:$0xff]  }
  0xe9   :  { %4391 = vmatpush1.bf16.msra.mxu0 %v7898_v24  ;;  %v7969_v24 = vld [vmem:[#allocation8 + $0xf4] ss:$8 sps:$4 sm:$0xff]  }
  0xea   :  { %4392 = vmatprep.subr.bf16.mxu0 %v7906_v26  ;;  %v7972_v26 = vld [vmem:[#allocation8 + $0xc6c] ss:$8 sps:$4 sm:$0xff]  }
  0xeb   :  { %1612 = vmatpush1.bf16.msra.mxu1 %v7895_v28  ;;  %v7970_v28 = vld [vmem:[#allocation8 + $0xc68] ss:$8 sps:$4 sm:$0xff]  }
  0xec   :  { %1613 = vmatprep.subr.bf16.mxu1 %v7903_v29  ;;  %v7221_v29 = vld.sshfl [vmem:[#allocation2 + $0x12] sm:$0x10 pattern:$0x75316420] }
  0xed   :  { %4393 = vmatpush1.bf16.msra.mxu0 %v7904_v30  ;;  %v7223_v30 = vld.sshfl [vmem:[#allocation2 + $0x1c] sm:$0x10 pattern:$0x75316420] }
  0xee   :  { %4394 = vmatprep.subr.bf16.mxu0 %v7912_v31  ;;  %v7225_v31 = vld.sshfl [vmem:[#allocation2 + $0x3a] sm:$0x10 pattern:$0x75316420] }
  0xef   :  { %1614 = vmatpush1.bf16.msra.mxu1 %v7901_v33  ;;  %v7227_v33 = vld.sshfl [vmem:[#allocation2 + $0x44] sm:$0x10 pattern:$0x75316420] }
  0xf0   :  { %1615 = vmatprep.subr.bf16.mxu1 %v7909_v2  ;;  %v7967_v2 = vld [vmem:[#allocation8 + $0xf0] ss:$8 sps:$4 sm:$0xff]  }
  0xf1   :  { %4395 = vmatpush1.bf16.msra.mxu0 %v7910_v34  ;;  %v7306_v34 = vld.sshfl [vmem:[#allocation2 + $0x3c] sm:$0xf pattern:$0x75316420] }
  0xf2   :  { %4396 = vmatprep.subr.bf16.mxu0 %v7918_v35  ;;  %v7978_v35 = vld [vmem:[#allocation8 + $0xc7c] ss:$8 sps:$4 sm:$0xff]  }
  0xf3   :  { %1616 = vmatpush1.bf16.msra.mxu1 %v7907_v36  ;;  %v1231_v36 = vcombine.low %v9046_v16, %v9050_v7 }
  0xf4   :  { %1617 = vmatprep.subr.bf16.mxu1 %v7915_v37  ;;  %v7304_v37 = vld.sshfl [vmem:[#allocation2 + $0x1e] sm:$0xf pattern:$0x75316420] }
  0xf5   :  { %4397 = vmatpush1.bf16.msra.mxu0 %v7916_v38  ;;  %v3936_v38 = vld [vmem:[#allocation8 + $0xc88] sm:$0x11]  ;;  %v9070_v16 = vrot.slane %v1231_v36, %v8968_v25  ;;  %v8023_v36 = vld [vmem:[#allocation8 + $0xcf0] ss:$8 sps:$4 sm:$0xff]  }
  0xf6   :  { %4398 = vmatprep.subr.bf16.mxu0 %v7924_v39  ;;  %v7308_v39 = vld.sshfl [vmem:[#allocation2 + $0x46] sm:$0xf pattern:$0x75316420]  ;;  %v7299_v7 = vcombine.high %v3936_v38, %v3936_v38 }
  0xf7   :  { %1618 = vmatpush1.bf16.msra.mxu1 %v7913_v40  ;;  %v7310_v40 = vcombine.low %v7302_v55, %v7304_v37  ;;  %v8022_v55 = vld [vmem:[#allocation8 + $0x184] ss:$8 sps:$4 sm:$0xff]   ;;  %v8028_v37 = vld [vmem:[#allocation8 + $0x194] ss:$8 sps:$4 sm:$0xff]  }
  0xf8   :  { %1619 = vmatprep.subr.bf16.mxu1 %v7921_v41  ;;  %v7975_v41 = vld [vmem:[#allocation8 + $0x104] ss:$8 sps:$4 sm:$0xff]  }
  0xf9   :  { %4399 = vmatpush1.bf16.msra.mxu0 %v7922_v42  ;;  %v3993_v42 = vcombine.high %v9036_v60, %v9036_v60  ;;  %v1256_v60 = vcombine.high %v9055_v22, %v9055_v22  ;;  %v7989_v22 = vld [vmem:[#allocation8 + $0xc94] ss:$8 sps:$4 sm:$0xff]  }
  0xfa   :  { %4400 = vmatprep.subr.bf16.mxu0 %v7930_v43  ;;  %v7229_v43 = vcombine.high %v7221_v29, %v7223_v30  ;;  %v8016_v29 = vld [vmem:[#allocation8 + $0x174] ss:$8 sps:$4 sm:$0xff]   ;;  %v8011_v30 = vld [vmem:[#allocation8 + $0xcd0] ss:$8 sps:$4 sm:$0xff]  }
  0xfb   :  { %1620 = vmatpush1.bf16.msra.mxu1 %v7919_v44  ;;  %v7231_v44 = vcombine.high %v7225_v31, %v7227_v33  ;;  %v8019_v31 = vld [vmem:[#allocation8 + $0xce4] ss:$8 sps:$4 sm:$0xff]   ;;  %v8014_v33 = vld [vmem:[#allocation8 + $0x170] ss:$8 sps:$4 sm:$0xff]  }
  0xfc   :  { %1621 = vmatprep.subr.bf16.mxu1 %v7927_v45  ;;  %v7312_v45 = vcombine.low %v7306_v34, %v7308_v39  ;;  %v8020_v34 = vld [vmem:[#allocation8 + $0x180] ss:$8 sps:$4 sm:$0xff]   ;;  %v8026_v39 = vld [vmem:[#allocation8 + $0x190] ss:$8 sps:$4 sm:$0xff]  }
  0xfd   :  { %4401 = vmatpush1.bf16.msra.mxu0 %v7928_v46  ;;  %v7976_v46 = vld [vmem:[#allocation8 + $0xc78] ss:$8 sps:$4 sm:$0xff]  }
  0xfe   :  { %4402 = vmatprep.subr.bf16.mxu0 %v7936_v47  ;;  %v9067_v47 = vrot.slane %v7310_v40, %v8968_v25  ;;  %v6976_v40 = vld.sshfl [vmem:[#allocation2 + $0xa] sm:$0xf0 pattern:$0x75316420] }
  0xff   :  { %1622 = vmatpush1.bf16.msra.mxu1 %v7925_v48  ;;  %v7298_v48 = vcombine.low %v3936_v38, %v3936_v38  ;;  %v6974_v38 = vld.sshfl [vmem:[#allocation2] sm:$0xf0 pattern:$0x75316420] }
 0x100   :  { %1623 = vmatprep.subr.bf16.mxu1 %v7933_v49  ;;  %v9073_v49 = vrot.slane %v7312_v45, %v8968_v25  ;;  %v8034_v45 = vld [vmem:[#allocation8 + $0x1a4] ss:$8 sps:$4 sm:$0xff]  }
 0x101   :  { %4403 = vmatpush1.bf16.msra.mxu0 %v7934_v15  ;;  %v7973_v15 = vld [vmem:[#allocation8 + $0x100] ss:$8 sps:$4 sm:$0xff]  }
 0x102   :  { %4404 = vmatprep.subr.bf16.mxu0 %v7942_v51  ;;  %v7981_v51 = vld [vmem:[#allocation8 + $0x114] ss:$8 sps:$4 sm:$0xff]  }
 0x103   :  { %1624 = vmatpush1.bf16.msra.mxu1 %v7931_v52  ;;  %v3954_v52 = vrot.slane %v7229_v43, %v8968_v25  ;;  %v6982_v43 = vcombine.high %v6974_v38, %v6976_v40  ;;  %v8071_v40 = vld [vmem:[#allocation8 + $0xd70] ss:$8 sps:$4 sm:$0xff]  }
 0x104   :  { %1625 = vmatprep.subr.bf16.mxu1 %v7939_v53  ;;  %v3968_v53 = vrot.slane %v7231_v44, %v8968_v25  ;;  %v6980_v44 = vld.sshfl [vmem:[#allocation2 + $0x32] sm:$0xf0 pattern:$0x75316420] }
 0x105   :  { %4405 = vmatpush1.bf16.msra.mxu0 %v7940_v54  ;;  %v4645_v54 = vcombine.low %v9067_v47, %v9073_v49 }
 0x106   :  { %4406 = vmatprep.subr.bf16.mxu0 %v7948_v57  ;;  %v4338_v57 = vsel %vm9379_vm12, %v7298_v48, 0  ;;  %v8029_v48 = vld [vmem:[#allocation8 + $0xd00] ss:$8 sps:$4 sm:$0xff]  }
 0x107   :  { %1626 = vmatpush1.bf16.msra.mxu1 %v7937_v63  ;;  %v7979_v63 = vld [vmem:[#allocation8 + $0x110] ss:$8 sps:$4 sm:$0xff]  }
 0x108   :  { %1627 = vmatprep.subr.bf16.mxu1 %v7945_v0  ;;  %v7986_v0 = vld [vmem:[#allocation8 + $0x124] ss:$8 sps:$4 sm:$0xff]  }
 0x109   :  { %4407 = vmatpush1.bf16.msra.mxu0 %v7946_v1  ;;  %v3971_v1 = vcombine.low %v3954_v52, %v3968_v53  ;;  %v8040_v52 = vld [vmem:[#allocation8 + $0x1b4] ss:$8 sps:$4 sm:$0xff]  }
 0x10a   :  { %4408 = vmatprep.subr.bf16.mxu0 %v7954_v5  ;;  %v4646_v5 = vcombine.high %v9067_v47, %v9073_v49  ;;  %v8088_v47 = vld [vmem:[#allocation8 + $0xda0] ss:$8 sps:$4 sm:$0xff]   ;;  %v8096_v49 = vld [vmem:[#allocation8 + $0xdb4] ss:$8 sps:$4 sm:$0xff]  }
 0x10b   :  { %1628 = vmatpush1.bf16.msra.mxu1 %v7943_v6  ;;  %v7984_v6 = vld [vmem:[#allocation8 + $0x120] ss:$8 sps:$4 sm:$0xff]  }
 0x10c   :  { %1629 = vmatprep.subr.bf16.mxu1 %v7951_v8  ;;  %v7992_v8 = vld [vmem:[#allocation8 + $0x134] ss:$8 sps:$4 sm:$0xff]  }
 0x10d   :  { %4409 = vmatpush1.bf16.msra.mxu0 %v7952_v9  ;;  %v3985_v9 = vrot.slane %v3971_v1, %v8968_v25  ;;  %v8038_v1 = vld [vmem:[#allocation8 + $0x1b0] ss:$8 sps:$4 sm:$0xff]  }
 0x10e   :  { %4410 = vmatprep.subr.bf16.mxu0 %v7960_v10  ;;  %v7987_v10 = vld [vmem:[#allocation8 + $0xc90] ss:$8 sps:$4 sm:$0xff]  }
 0x10f   :  { %1630 = vmatpush1.bf16.msra.mxu1 %v7949_v11  ;;  %v9089_v11 = vrot.slane %v4646_v5, %v8968_v25 }
 0x110   :  { %1631 = vmatprep.subr.bf16.mxu1 %v7957_v12  ;;  %v7995_v12 = vld [vmem:[#allocation8 + $0xca4] ss:$8 sps:$4 sm:$0xff]  }
 0x111   :  { %4411 = vmatpush1.bf16.msra.mxu0 %v7958_v13  ;;  %v7990_v13 = vld [vmem:[#allocation8 + $0x130] ss:$8 sps:$4 sm:$0xff]  }
 0x112   :  { %4412 = vmatprep.subr.bf16.mxu0 %v7966_v62  ;;  %v8001_v62 = vld [vmem:[#allocation8 + $0xcb4] ss:$8 sps:$4 sm:$0xff]  }
 0x113   :  { %1632 = vmatpush1.bf16.msra.mxu1 %v7955_v19  ;;  %v7999_v19 = vld [vmem:[#allocation8 + $0xcb0] ss:$8 sps:$4 sm:$0xff]  }
 0x114   :  { %1633 = vmatprep.subr.bf16.mxu1 %v7963_v20  ;;  %v8007_v20 = vld [vmem:[#allocation8 + $0xcc4] ss:$8 sps:$4 sm:$0xff]  }
 0x115   :  { %4413 = vmatpush1.bf16.msra.mxu0 %v7964_v21  ;;  %v8002_v21 = vld [vmem:[#allocation8 + $0x150] ss:$8 sps:$4 sm:$0xff]  }
 0x116   :  { %4414 = vmatprep.subr.bf16.mxu0 %v7972_v26  ;;  %v8013_v26 = vld [vmem:[#allocation8 + $0xcd4] ss:$8 sps:$4 sm:$0xff]  }
 0x117   :  { %1634 = vmatpush1.bf16.msra.mxu1 %v7961_v23  ;;  %v8010_v23 = vld [vmem:[#allocation8 + $0x164] ss:$8 sps:$4 sm:$0xff]  }
 0x118   :  { %1635 = vmatprep.subr.bf16.mxu1 %v7969_v24  ;;  %v8005_v24 = vld [vmem:[#allocation8 + $0xcc0] ss:$8 sps:$4 sm:$0xff]  }
 0x119   :  { %4415 = vmatpush1.bf16.msra.mxu0 %v7970_v28  ;;  %v8008_v28 = vld [vmem:[#allocation8 + $0x160] ss:$8 sps:$4 sm:$0xff]  }
 0x11a   :  { %4425 = vmatprep.subr.bf16.mxu0 %v7978_v35  ;;  %v8025_v35 = vld [vmem:[#allocation8 + $0xcf4] ss:$8 sps:$4 sm:$0xff]  }
 0x11b   :  { %1636 = vmatpush1.bf16.msra.mxu1 %v7967_v2  ;;  %v8017_v2 = vld [vmem:[#allocation8 + $0xce0] ss:$8 sps:$4 sm:$0xff]  }
 0x11c   :  { %1646 = vmatprep.subr.bf16.mxu1 %v7975_v41  ;;  %4417 = vmatmul.mubr.bf16.vlgmr.msra.gmra.mrb[0].mxu0 %v3993_v42  ;;  %v8031_v41 = vld [vmem:[#allocation8 + $0xd04] ss:$8 sps:$4 sm:$0xff]  }
 0x11d   :  { %4426 = vmatpush1.bf16.msra.mxu0 %v7976_v46  ;;  %4457 = vmatprep.mubr.bf16.mxu0 %v9028_v50  ;;  %v6978_v42 = vld.sshfl [vmem:[#allocation2 + $0x28] sm:$0xf0 pattern:$0x75316420] }
 0x11e   :  { %1638 = vmatmul.mubr.bf16.vlgmr.msra.gmra.mrb[0].mxu1 %v9070_v16  ;;  %7300 = vmatprep.subr.msk.bf16.mxu0 %vm9378_vm11, %v7299_v7  ;;  %v6984_v46 = vcombine.high %v6978_v42, %v6980_v44  ;;  %v9094_v7 = vrot.slane %v6982_v43, %v8968_v25  ;;  %v8081_v44 = vld [vmem:[#allocation8 + $0x434] ss:$8 sps:$4 sm:$0xff]  }
 0x11f   :  { %1647 = vmatpush1.bf16.msra.mxu1 %v7973_v15  ;;  %1678 = vmatprep.mubr.bf16.mxu1 %v1256_v60  ;;  %v8037_v15 = vld [vmem:[#allocation8 + $0xd14] ss:$8 sps:$4 sm:$0xff]  }
 0x120   :  { %1648 = vmatprep.subr.bf16.mxu1 %v7981_v51  ;;  %v9097_v60 = vrot.slane %v6984_v46, %v8968_v25  ;;  %v8032_v51 = vld [vmem:[#allocation8 + $0x1a0] ss:$8 sps:$4 sm:$0xff]   ;;  %v8084_v46 = vld [vmem:[#allocation8 + $0xd94] ss:$8 sps:$4 sm:$0xff]  }
 0x121   :  { %4428 = vmatpush1.bf16.msra.mxu0 %v4338_v57  ;;  %v8035_v57 = vld [vmem:[#allocation8 + $0xd10] ss:$8 sps:$4 sm:$0xff]  }
 0x122   :  { %5019 = vmatprep.subr.bf16.mxu0 %v7989_v22  ;;  %v1904_v53 = vcombine.low %v9094_v7, %v9097_v60  ;;  %v8043_v22 = vld [vmem:[#allocation8 + $0xd24] ss:$8 sps:$4 sm:$0xff]  }
 0x123   :  { %1649 = vmatpush1.bf16.msra.mxu1 %v7979_v63  ;;  %v105_v63 = vld [vmem:[#allocation2 + $0x26] sm:$0x1] }
 0x124   :  { %1650 = vmatprep.subr.bf16.mxu1 %v7986_v0  ;;  %v129_v0 = vld [vmem:[#allocation2 + $0x4e] sm:$0x1]  ;;  %v106_v5 = vsel %vm8815_vm6, 0, %v105_v63 }
 0x125   :  { %107 = vst [vmem:[#allocation2 + $0x26] sm:$0x1] %v106_v5  ;;  %v8090_v63 = vld [vmem:[#allocation8 + $0xda4] ss:$8 sps:$4 sm:$0xff]  }
 0x126   :  { %v8087_v5 = vld [vmem:[#allocation8 + $0x444] ss:$8 sps:$4 sm:$0xff]  }
 0x127   :  { %1651 = vmatpush1.bf16.msra.mxu1 %v7984_v6  ;;  %v130_v6 = vsel %vm8815_vm6, 0, %v129_v0  ;;  %vm9380_vm6 = vmmov %vm9375_vm1  ;;  %v8079_v0 = vld [vmem:[#allocation8 + $0x430] ss:$8 sps:$4 sm:$0xff]  }
 0x128   :  { %1652 = vmatprep.subr.bf16.mxu1 %v7992_v8  ;;  %7301 = vmatmul.mubr.msk.bf16.vlgmr.msra.gmra.mrb[0].mxu0 %vm1065_vm5, %v3985_v9  ;;  %v8046_v8 = vld [vmem:[#allocation8 + $0x1c4] ss:$8 sps:$4 sm:$0xff]   ;;  %131 = vst [vmem:[#allocation2 + $0x4e] sm:$0x1] %v130_v6  ;;  %v8041_v9 = vld [vmem:[#allocation8 + $0xd20] ss:$8 sps:$4 sm:$0xff]   ;;  %vm9390_vm1 = vmmov %vm9381_vm0 }
 0x129   :  { %5020 = vmatpush1.bf16.msra.mxu0 %v7987_v10  ;;  %5051 = vmatprep.mubr.bf16.mxu0 %v9089_v11  ;;  %v8049_v10 = vld [vmem:[#allocation8 + $0xd34] ss:$8 sps:$4 sm:$0xff]   ;;  %v8091_v6 = vld [vmem:[#allocation8 + $0x450] ss:$8 sps:$4 sm:$0xff]  }
 0x12a   :  { %5021 = vmatprep.subr.bf16.mxu0 %v7995_v12  ;;  %v8044_v12 = vld [vmem:[#allocation8 + $0x1c0] ss:$8 sps:$4 sm:$0xff]  }
 0x12b   :  { %1653 = vmatpush1.bf16.msra.mxu1 %v7990_v13  ;;  %v8052_v13 = vld [vmem:[#allocation8 + $0x1d4] ss:$8 sps:$4 sm:$0xff]  }
 0x12c   :  { %1654 = vmatprep.subr.bf16.mxu1 %v7998_v14  ;;  %v8047_v14 = vld [vmem:[#allocation8 + $0xd30] ss:$8 sps:$4 sm:$0xff]  }
 0x12d   :  { %5022 = vmatpush1.bf16.msra.mxu0 %v7993_v56  ;;  %v8055_v56 = vld [vmem:[#allocation8 + $0xd44] ss:$8 sps:$4 sm:$0xff]  }
 0x12e   :  { %5023 = vmatprep.subr.bf16.mxu0 %v8001_v62  ;;  %v8050_v62 = vld [vmem:[#allocation8 + $0x1d0] ss:$8 sps:$4 sm:$0xff]  }
 0x12f   :  { %1655 = vmatpush1.bf16.msra.mxu1 %v7996_v17  ;;  %v8053_v17 = vld [vmem:[#allocation8 + $0xd40] ss:$8 sps:$4 sm:$0xff]  }
 0x130   :  { %1656 = vmatprep.subr.bf16.mxu1 %v8004_v18  ;;  %v8056_v18 = vld [vmem:[#allocation8 + $0x1e0] ss:$8 sps:$4 sm:$0xff]  }
 0x131   :  { %5024 = vmatpush1.bf16.msra.mxu0 %v7999_v19  ;;  %v8061_v19 = vld [vmem:[#allocation8 + $0xd54] ss:$8 sps:$4 sm:$0xff]  }
 0x132   :  { %5025 = vmatprep.subr.bf16.mxu0 %v8007_v20  ;;  %v8059_v20 = vld [vmem:[#allocation8 + $0xd50] ss:$8 sps:$4 sm:$0xff]  }
 0x133   :  { %1657 = vmatpush1.bf16.msra.mxu1 %v8002_v21  ;;  %v8064_v21 = vld [vmem:[#allocation8 + $0x1f4] ss:$8 sps:$4 sm:$0xff]  }
 0x134   :  { %1658 = vmatprep.subr.bf16.mxu1 %v8010_v23  ;;  %v8067_v23 = vld [vmem:[#allocation8 + $0xd64] ss:$8 sps:$4 sm:$0xff]  }
 0x135   :  { %5026 = vmatpush1.bf16.msra.mxu0 %v8005_v24  ;;  %v8062_v24 = vld [vmem:[#allocation8 + $0x1f0] ss:$8 sps:$4 sm:$0xff]  }
 0x136   :  { %5027 = vmatprep.subr.bf16.mxu0 %v8013_v26  ;;  %v6811_v26 = vld.sshfl [vmem:[#allocation2 + $0x8] sm:$0x1 pattern:$0x75316420] }
 0x137   :  { %1659 = vmatpush1.bf16.msra.mxu1 %v8008_v28  ;;  %v6813_v28 = vld.sshfl [vmem:[#allocation2 + $0x12] sm:$0x1 pattern:$0x75316420] }
 0x138   :  { %1660 = vmatprep.subr.bf16.mxu1 %v8016_v29  ;;  %v6815_v29 = vld.sshfl [vmem:[#allocation2 + $0x30] sm:$0x1 pattern:$0x75316420] }
 0x139   :  { %5028 = vmatpush1.bf16.msra.mxu0 %v8011_v30  ;;  %v8065_v30 = vld [vmem:[#allocation8 + $0xd60] ss:$8 sps:$4 sm:$0xff]  }
 0x13a   :  { %5029 = vmatprep.subr.bf16.mxu0 %v8019_v31  ;;  %v6817_v31 = vld.sshfl [vmem:[#allocation2 + $0x3a] sm:$0x1 pattern:$0x75316420] }
 0x13b   :  { %1661 = vmatpush1.bf16.msra.mxu1 %v8014_v33  ;;  %v8070_v33 = vld [vmem:[#allocation8 + $0x204] ss:$8 sps:$4 sm:$0xff]  }
 0x13c   :  { %1662 = vmatprep.subr.bf16.mxu1 %v8022_v55  ;;  %v469_v55 = vld [vmem:[#allocation8 + $0x210] sm:$0x11] }
 0x13d   :  { %5030 = vmatpush1.bf16.msra.mxu0 %v8017_v2  ;;  %v1255_v2 = vcombine.high %v9070_v16, %v9070_v16  ;;  %v6971_v38 = vcombine.high %v469_v55, %v469_v55 }
 0x13e   :  { %5031 = vmatprep.subr.bf16.mxu0 %v8025_v35  ;;  %v6901_v35 = vcombine.low %v6811_v26, %v6813_v28  ;;  %v8105_v26 = vld [vmem:[#allocation8 + $0x474] ss:$8 sps:$4 sm:$0xff]  }
 0x13f   :  { %1663 = vmatpush1.bf16.msra.mxu1 %v8020_v34  ;;  %v8073_v34 = vld [vmem:[#allocation8 + $0xd74] ss:$8 sps:$4 sm:$0xff]  }
 0x140   :  { %1664 = vmatprep.subr.bf16.mxu1 %v8028_v37  ;;  %v8068_v37 = vld [vmem:[#allocation8 + $0x200] ss:$8 sps:$4 sm:$0xff]   ;;  %v1216_v42 = vrot.slane %v6901_v35, %v8968_v25  ;;  %v8111_v35 = vld [vmem:[#allocation8 + $0x484] ss:$8 sps:$4 sm:$0xff]  }
 0x141   :  { %5032 = vmatpush1.bf16.msra.mxu0 %v8023_v36  ;;  %v6903_v36 = vcombine.low %v6815_v29, %v6817_v31  ;;  %v7388_v28 = vld.sshfl [vmem:[#allocation2 + $0x3c] sm:$0xff pattern:$0x75316420] }
 0x142   :  { %5033 = vmatprep.subr.bf16.mxu0 %v8031_v41  ;;  %v8077_v41 = vld [vmem:[#allocation8 + $0xd84] ss:$8 sps:$4 sm:$0xff]   ;;  %v8106_v31 = vld [vmem:[#allocation8 + $0xdd0] ss:$8 sps:$4 sm:$0xff]  }
 0x143   :  { %1665 = vmatpush1.bf16.msra.mxu1 %v8026_v39  ;;  %v6970_v39 = vcombine.low %v469_v55, %v469_v55  ;;  %v1230_v43 = vrot.slane %v6903_v36, %v8968_v25  ;;  %v8114_v55 = vld [vmem:[#allocation8 + $0xde4] ss:$8 sps:$4 sm:$0xff]  }
 0x144   :  { %1666 = vmatprep.subr.bf16.mxu1 %v8034_v45  ;;  %v8075_v45 = vld [vmem:[#allocation8 + $0xd80] ss:$8 sps:$4 sm:$0xff]  }
 0x145   :  { %5034 = vmatpush1.bf16.msra.mxu0 %v8029_v48  ;;  %v1600_v16 = vsel %vm9381_vm0, %v6970_v39, 0  ;;  %v1233_v48 = vcombine.low %v1216_v42, %v1230_v43  ;;  %v8120_v39 = vld [vmem:[#allocation8 + $0xdf4] ss:$8 sps:$4 sm:$0xff]  }
 0x146   :  { %5035 = vmatprep.subr.bf16.mxu0 %v8037_v15  ;;  %v1905_v15 = vcombine.high %v9094_v7, %v9097_v60  ;;  %v8181_v60 = vld [vmem:[#allocation8 + $0x540] ss:$8 sps:$4 sm:$0xff]  }
 0x147   :  { %1667 = vmatpush1.bf16.msra.mxu1 %v8032_v51  ;;  %v9118_v51 = vrot.slane %v4645_v54, %v8968_v25  ;;  %v8085_v54 = vld [vmem:[#allocation8 + $0x440] ss:$8 sps:$4 sm:$0xff]  }
 0x148   :  { %1668 = vmatprep.subr.bf16.mxu1 %v8040_v52  ;;  %v8082_v52 = vld [vmem:[#allocation8 + $0xd90] ss:$8 sps:$4 sm:$0xff]  }
 0x149   :  { %5036 = vmatpush1.bf16.msra.mxu0 %v8035_v57  ;;  %v4670_v57 = vcombine.high %v9089_v11, %v9089_v11  ;;  %v8093_v11 = vld [vmem:[#allocation8 + $0x454] ss:$8 sps:$4 sm:$0xff]  }
 0x14a   :  { %5037 = vmatprep.subr.bf16.mxu0 %v8043_v22  ;;  %v1247_v22 = vrot.slane %v1233_v48, %v8968_v25 }
 0x14b   :  { %1669 = vmatpush1.bf16.msra.mxu1 %v8038_v1  ;;  %v9124_v1 = vrot.slane %v1905_v15, %v8968_v25  ;;  %v8117_v15 = vld [vmem:[#allocation8 + $0x494] ss:$8 sps:$4 sm:$0xff]  }
 0x14c   :  { %1670 = vmatprep.subr.bf16.mxu1 %v8046_v8  ;;  %v8094_v8 = vld [vmem:[#allocation8 + $0xdb0] ss:$8 sps:$4 sm:$0xff]  }
 0x14d   :  { %5038 = vmatpush1.bf16.msra.mxu0 %v8041_v9  ;;  %v8099_v9 = vld [vmem:[#allocation8 + $0x464] ss:$8 sps:$4 sm:$0xff]  }
 0x14e   :  { %5039 = vmatprep.subr.bf16.mxu0 %v8049_v10  ;;  %v8102_v10 = vld [vmem:[#allocation8 + $0xdc4] ss:$8 sps:$4 sm:$0xff]  }
 0x14f   :  { %1671 = vmatpush1.bf16.msra.mxu1 %v8044_v12  ;;  %v167_v12 = vld [vmem:[#allocation2 + $0x1e] sm:$0xaa] }
 0x150   :  { %1672 = vmatprep.subr.bf16.mxu1 %v8052_v13  ;;  %v168_v13 = vsel %vm8857_vm2, 0, %v167_v12 }
 0x151   :  { %5040 = vmatpush1.bf16.msra.mxu0 %v8047_v14  ;;  %v170_v14 = vld [vmem:[#allocation2 + $0x26] sm:$0x2]  ;;  %169 = vst [vmem:[#allocation2 + $0x1e] sm:$0xaa] %v168_v13  ;;  %v8124_v13 = vld [vmem:[#allocation8 + $0xe00] ss:$8 sps:$4 sm:$0xff]  }
 0x152   :  { %5041 = vmatprep.subr.bf16.mxu0 %v8055_v56  ;;  %v191_v56 = vld [vmem:[#allocation2 + $0x46] sm:$0xaa] }
 0x153   :  { %1673 = vmatpush1.bf16.msra.mxu1 %v8050_v62  ;;  %v8097_v62 = vld [vmem:[#allocation8 + $0x460] ss:$8 sps:$4 sm:$0xff]  }
 0x154   :  { %1674 = vmatprep.subr.bf16.mxu1 %v8058_v58  ;;  %v8100_v58 = vld [vmem:[#allocation8 + $0xdc0] ss:$8 sps:$4 sm:$0xff]  }
 0x155   :  { %5042 = vmatpush1.bf16.msra.mxu0 %v8053_v17  ;;  %v8108_v17 = vld [vmem:[#allocation8 + $0xdd4] ss:$8 sps:$4 sm:$0xff]  }
 0x156   :  { %5043 = vmatprep.subr.bf16.mxu0 %v8061_v19  ;;  %v192_v19 = vsel %vm8857_vm2, 0, %v191_v56  ;;  %vm9382_vm2 = vmmov %vm9381_vm0 }
 0x157   :  { %1675 = vmatpush1.bf16.msra.mxu1 %v8056_v18  ;;  %v171_v18 = vsel %vm8864_vm7, 0, %v170_v14  ;;  %193 = vst [vmem:[#allocation2 + $0x46] sm:$0xaa] %v192_v19  ;;  %v8130_v19 = vld [vmem:[#allocation8 + $0xe10] ss:$8 sps:$4 sm:$0xff]  }
 0x158   :  { %1676 = vmatprep.subr.bf16.mxu1 %v8064_v21  ;;  %172 = vst [vmem:[#allocation2 + $0x26] sm:$0x2] %v171_v18  ;;  %v7384_v21 = vld.sshfl [vmem:[#allocation2 + $0x14] sm:$0xff pattern:$0x75316420] }
 0x159   :  { %5044 = vmatpush1.bf16.msra.mxu0 %v8059_v20  ;;  %v194_v20 = vld [vmem:[#allocation2 + $0x4e] sm:$0x2] }
 0x15a   :  { %5045 = vmatprep.subr.bf16.mxu0 %v8067_v23  ;;  %v195_v23 = vsel %vm8864_vm7, 0, %v194_v20  ;;  %v8138_v20 = vld [vmem:[#allocation8 + $0xe24] ss:$8 sps:$4 sm:$0xff]   ;;  %vm9383_vm7 = vmmov %vm9381_vm0 }
 0x15b   :  { %1677 = vmatpush1.bf16.msra.mxu1 %v8062_v24  ;;  %v7385_v24 = vld.sshfl [vmem:[#allocation2 + $0x1c] sm:$0x11 pattern:$0x75316420]  ;;  %196 = vst [vmem:[#allocation2 + $0x4e] sm:$0x2] %v195_v23 }
 0x15c   :  { %1687 = vmatprep.subr.bf16.mxu1 %v8070_v33  ;;  %v5174_v29 = vcombine.low %v7384_v21, %v7385_v24  ;;  %v8103_v33 = vld [vmem:[#allocation8 + $0x470] ss:$8 sps:$4 sm:$0xff]  }
 0x15d   :  { %5046 = vmatpush1.bf16.msra.mxu0 %v8065_v30  ;;  %v5175_v30 = vcombine.high %v7384_v21, %v7385_v24  ;;  %v8127_v23 = vld [vmem:[#allocation8 + $0x4b0] ss:$8 sps:$4 sm:$0xff]   ;;  %v8135_v24 = vld [vmem:[#allocation8 + $0x4c4] ss:$8 sps:$4 sm:$0xff]  }
 0x15e   :  { %1679 = vmatmul.mubr.bf16.vlgmr.msra.gmra.mrb[0].mxu1 %v1255_v2  ;;  %5047 = vmatprep.subr.bf16.mxu0 %v8073_v34  ;;  %v5206_v2 = vcombine.low %v7388_v28, %v7389_v27  ;;  %v5207_v34 = vcombine.high %v7388_v28, %v7389_v27  ;;  %v5225_v36 = vshrl.u32 %v5174_v29, 16  ;;  %v8144_v28 = vld [vmem:[#allocation8 + $0xe34] ss:$8 sps:$4 sm:$0xff]   ;;  %v8133_v29 = vld [vmem:[#allocation8 + $0x4c0] ss:$8 sps:$4 sm:$0xff]  }
 0x15f   :  { %1688 = vmatpush1.bf16.msra.mxu1 %v8068_v37  ;;  %1719 = vmatprep.mubr.bf16.mxu1 %v9028_v50  ;;  %v5230_v32 = vshll.u32 %v5175_v30, 16  ;;  %v8112_v37 = vld [vmem:[#allocation8 + $0xde0] ss:$8 sps:$4 sm:$0xff]   ;;  %v8141_v30 = vld [vmem:[#allocation8 + $0x4d4] ss:$8 sps:$4 sm:$0xff]  }
 0x160   :  { %6972 = vmatprep.subr.msk.bf16.mxu1 %vm9380_vm6, %v6971_v38  ;;  %v7386_v38 = vld.sshfl [vmem:[#allocation2 + $0x1e] sm:$0xff pattern:$0x75316420]  ;;  %v8150_v27 = vld [vmem:[#allocation8 + $0xe44] ss:$8 sps:$4 sm:$0xff]  }
 0x161   :  { %5048 = vmatpush1.bf16.msra.mxu0 %v8071_v40  ;;  %v7387_v40 = vld.sshfl [vmem:[#allocation2 + $0x26] sm:$0x11 pattern:$0x75316420]  ;;  %v9139_v48 = vsel %vm8961_vm4, %v5225_v36, %v5230_v32  ;;  %v8153_v36 = vld [vmem:[#allocation8 + $0x4f4] ss:$8 sps:$4 sm:$0xff]  }
 0x162   :  { %5049 = vmatprep.subr.bf16.mxu0 %v8077_v41  ;;  %v7390_v41 = vld.sshfl [vmem:[#allocation2 + $0x46] sm:$0xff pattern:$0x75316420]  ;;  %v5190_v42 = vcombine.low %v7386_v38, %v7387_v40  ;;  %v5191_v43 = vcombine.high %v7386_v38, %v7387_v40  ;;  %v8154_v32 = vld [vmem:[#allocation8 + $0xe50] ss:$8 sps:$4 sm:$0xff]  }
 0x163   :  { %1690 = vmatpush1.bf16.msra.mxu1 %v1600_v16  ;;  %v5243_v16 = vshrl.u32 %v5206_v2, 16  ;;  %v8148_v2 = vld [vmem:[#allocation8 + $0xe40] ss:$8 sps:$4 sm:$0xff]   ;;  %v8151_v38 = vld [vmem:[#allocation8 + $0x4f0] ss:$8 sps:$4 sm:$0xff]  }
 0x164   :  { %2278 = vmatprep.subr.bf16.mxu1 %v8081_v44  ;;  %v5248_v44 = vshll.u32 %v5207_v34, 16  ;;  %v8156_v34 = vld [vmem:[#allocation8 + $0xe54] ss:$8 sps:$4 sm:$0xff]   ;;  %v8160_v40 = vld [vmem:[#allocation8 + $0xe60] ss:$8 sps:$4 sm:$0xff]  }
 0x165   :  { %5050 = vmatpush1.bf16.msra.mxu0 %v8075_v45  ;;  %v8109_v45 = vld [vmem:[#allocation8 + $0x480] ss:$8 sps:$4 sm:$0xff]  }
 0x166   :  { %5060 = vmatprep.subr.bf16.mxu0 %v8084_v46  ;;  %v7391_v46 = vld.sshfl [vmem:[#allocation2 + $0x4e] sm:$0x11 pattern:$0x75316420] }
 0x168   :  { %5052 = vmatmul.mubr.bf16.vlgmr.msra.gmra.mrb[0].mxu0 %v9118_v51 }
 0x169   :  { %5061 = vmatpush1.bf16.msra.mxu0 %v8082_v52  ;;  %5092 = vmatprep.mubr.bf16.mxu0 %v4670_v57  ;;  %v5222_v52 = vcombine.low %v7390_v41, %v7391_v46  ;;  %v5223_v57 = vcombine.high %v7390_v41, %v7391_v46  ;;  %v8168_v41 = vld [vmem:[#allocation8 + $0xe74] ss:$8 sps:$4 sm:$0xff]   ;;  %v8171_v46 = vld [vmem:[#allocation8 + $0x524] ss:$8 sps:$4 sm:$0xff]  }
 0x16a   :  { %6973 = vmatmul.mubr.msk.bf16.vlgmr.msra.gmra.mrb[0].mxu1 %vm1065_vm5, %v1247_v22  ;;  %5062 = vmatprep.subr.bf16.mxu0 %v8090_v63  ;;  %v5234_v22 = vshrl.u32 %v5190_v42, 16  ;;  %v5239_v63 = vshll.u32 %v5191_v43, 16  ;;  %v8157_v42 = vld [vmem:[#allocation8 + $0x500] ss:$8 sps:$4 sm:$0xff]   ;;  %v8165_v43 = vld [vmem:[#allocation8 + $0x514] ss:$8 sps:$4 sm:$0xff]  }
 0x16b   :  { %2279 = vmatpush1.bf16.msra.mxu1 %v8079_v0  ;;  %2310 = vmatprep.mubr.bf16.mxu1 %v9124_v1  ;;  %v8118_v0 = vld [vmem:[#allocation8 + $0xdf0] ss:$8 sps:$4 sm:$0xff]  }
 0x16c   :  { %2280 = vmatprep.subr.bf16.mxu1 %v8087_v5  ;;  %v8126_v5 = vld [vmem:[#allocation8 + $0xe04] ss:$8 sps:$4 sm:$0xff]  }
 0x16d   :  { %5063 = vmatpush1.bf16.msra.mxu0 %v8088_v47  ;;  %v9143_v47 = vsel %vm8961_vm4, %v5234_v22, %v5239_v63  ;;  %v7307_v22 = vld.sshfl [vmem:[#allocation2 + $0x44] sm:$0x1 pattern:$0x75316420]  ;;  %v8180_v63 = vld [vmem:[#allocation8 + $0xe94] ss:$8 sps:$4 sm:$0xff]  }
 0x16e   :  { %5064 = vmatprep.subr.bf16.mxu0 %v8096_v49  ;;  %v9147_v49 = vsel %vm8961_vm4, %v5243_v16, %v5248_v44  ;;  %v8166_v16 = vld [vmem:[#allocation8 + $0xe70] ss:$8 sps:$4 sm:$0xff]   ;;  %v8174_v44 = vld [vmem:[#allocation8 + $0xe84] ss:$8 sps:$4 sm:$0xff]  }
 0x16f   :  { %2281 = vmatpush1.bf16.msra.mxu1 %v8085_v54  ;;  %v5252_v54 = vshrl.u32 %v5222_v52, 16  ;;  %v7303_v52 = vld.sshfl [vmem:[#allocation2 + $0x1c] sm:$0x1 pattern:$0x75316420] }
 0x170   :  { %2282 = vmatprep.subr.bf16.mxu1 %v8093_v11  ;;  %v5257_v11 = vshll.u32 %v5223_v57, 16  ;;  %v7305_v57 = vld.sshfl [vmem:[#allocation2 + $0x26] sm:$0x1 pattern:$0x75316420] }
 0x171   :  { %5065 = vmatpush1.bf16.msra.mxu0 %v8094_v8  ;;  %v5328_v8 = vcombine.low %v9139_v48, %v9143_v47 }
 0x172   :  { %5066 = vmatprep.subr.bf16.mxu0 %v8102_v10  ;;  %v8123_v10 = vld [vmem:[#allocation8 + $0x4a4] ss:$8 sps:$4 sm:$0xff]   ;;  %v9155_v12 = vsel %vm8961_vm4, %v5252_v54, %v5257_v11  ;;  %v8177_v11 = vld [vmem:[#allocation8 + $0x534] ss:$8 sps:$4 sm:$0xff]   ;;  %vm9388_vm4 = vmmov %vm9381_vm0 }
 0x173   :  { %2283 = vmatpush1.bf16.msra.mxu1 %v8091_v6  ;;  %v8115_v6 = vld [vmem:[#allocation8 + $0x490] ss:$8 sps:$4 sm:$0xff]   ;;  %v5330_v14 = vcombine.low %v9147_v49, %v9155_v12  ;;  %v5331_v56 = vcombine.high %v9147_v49, %v9155_v12  ;;  %v4612_v54 = vld [vmem:[#allocation8 + $0xea0] sm:$0x11] }
 0x174   :  { %2284 = vmatprep.subr.bf16.mxu1 %v8099_v9  ;;  %v5329_v9 = vcombine.high %v9139_v48, %v9143_v47  ;;  %v8210_v48 = vld [vmem:[#allocation8 + $0x590] ss:$8 sps:$4 sm:$0xff]   ;;  %v8216_v49 = vld [vmem:[#allocation8 + $0x5a0] ss:$8 sps:$4 sm:$0xff]  }
 0x175   :  { %5067 = vmatpush1.bf16.msra.mxu0 %v8100_v58  ;;  %v8132_v58 = vld [vmem:[#allocation8 + $0xe14] ss:$8 sps:$4 sm:$0xff]   ;;  %v9165_v18 = vrot.slane %v5330_v14, %v8968_v25  ;;  %v9175_v14 = vrot.slane %v1904_v53, %v8968_v25  ;;  %v8213_v47 = vld [vmem:[#allocation8 + $0xee8] ss:$8 sps:$4 sm:$0xff]   ;;  %v8219_v12 = vld [vmem:[#allocation8 + $0xef8] ss:$8 sps:$4 sm:$0xff]  }
 0x176   :  { %5068 = vmatprep.subr.bf16.mxu0 %v8108_v17  ;;  %v8121_v17 = vld [vmem:[#allocation8 + $0x4a0] ss:$8 sps:$4 sm:$0xff]   ;;  %v8188_v53 = vld [vmem:[#allocation8 + $0x554] ss:$8 sps:$4 sm:$0xff]  }
 0x177   :  { %2285 = vmatpush1.bf16.msra.mxu1 %v8097_v62  ;;  %v9162_v62 = vrot.slane %v5328_v8, %v8968_v25  ;;  %v8178_v8 = vld [vmem:[#allocation8 + $0xe90] ss:$8 sps:$4 sm:$0xff]  }
 0x178   :  { %2286 = vmatprep.subr.bf16.mxu1 %v8105_v26  ;;  %v8136_v26 = vld [vmem:[#allocation8 + $0xe20] ss:$8 sps:$4 sm:$0xff]  }
 0x179   :  { %5069 = vmatpush1.bf16.msra.mxu0 %v8106_v31  ;;  %v5360_v21 = vcombine.low %v9162_v62, %v9165_v18  ;;  %v8142_v31 = vld [vmem:[#allocation8 + $0xe30] ss:$8 sps:$4 sm:$0xff]  }
 0x17a   :  { %5070 = vmatprep.subr.bf16.mxu0 %v8114_v55  ;;  %v8147_v55 = vld [vmem:[#allocation8 + $0x4e4] ss:$8 sps:$4 sm:$0xff]  }
 0x17b   :  { %2287 = vmatpush1.bf16.msra.mxu1 %v8103_v33  ;;  %v8139_v33 = vld [vmem:[#allocation8 + $0x4d0] ss:$8 sps:$4 sm:$0xff]  }
 0x17c   :  { %2288 = vmatprep.subr.bf16.mxu1 %v8111_v35  ;;  %v8145_v35 = vld [vmem:[#allocation8 + $0x4e0] ss:$8 sps:$4 sm:$0xff]  }
 0x17d   :  { %5071 = vmatpush1.bf16.msra.mxu0 %v8112_v37  ;;  %v8162_v37 = vld [vmem:[#allocation8 + $0xe64] ss:$8 sps:$4 sm:$0xff]  }
 0x17e   :  { %5072 = vmatprep.subr.bf16.mxu0 %v8120_v39  ;;  %v8159_v39 = vld [vmem:[#allocation8 + $0x504] ss:$8 sps:$4 sm:$0xff]  }
 0x17f   :  { %2289 = vmatpush1.bf16.msra.mxu1 %v8109_v45  ;;  %v8163_v45 = vld [vmem:[#allocation8 + $0x510] ss:$8 sps:$4 sm:$0xff]  }
 0x180   :  { %2290 = vmatprep.subr.bf16.mxu1 %v8117_v15  ;;  %v8172_v15 = vld [vmem:[#allocation8 + $0xe80] ss:$8 sps:$4 sm:$0xff]  }
 0x181   :  { %5073 = vmatpush1.bf16.msra.mxu0 %v8118_v0  ;;  %v7309_v0 = vld.sshfl [vmem:[#allocation2 + $0x4e] sm:$0x1 pattern:$0x75316420] }
 0x182   :  { %5074 = vmatprep.subr.bf16.mxu0 %v8126_v5  ;;  %v8169_v5 = vld [vmem:[#allocation8 + $0x520] ss:$8 sps:$4 sm:$0xff]  }
 0x183   :  { %2291 = vmatpush1.bf16.msra.mxu1 %v8115_v6  ;;  %v4669_v6 = vcombine.high %v9118_v51, %v9118_v51  ;;  %v8183_v51 = vld [vmem:[#allocation8 + $0x544] ss:$8 sps:$4 sm:$0xff]  }
 0x184   :  { %2292 = vmatprep.subr.bf16.mxu1 %v8123_v10  ;;  %v7311_v10 = vcombine.low %v7303_v52, %v7305_v57  ;;  %v9205_v52 = vrot.slane %v5329_v9, %v8968_v25  ;;  %v9211_v57 = vrot.slane %v5331_v56, %v8968_v25  ;;  %v8218_v9 = vld [vmem:[#allocation8 + $0x5a4] ss:$8 sps:$4 sm:$0xff]   ;;  %v8224_v56 = vld [vmem:[#allocation8 + $0x5b4] ss:$8 sps:$4 sm:$0xff]  }
 0x185   :  { %5075 = vmatpush1.bf16.msra.mxu0 %v8124_v13  ;;  %v7313_v13 = vcombine.low %v7307_v22, %v7309_v0  ;;  %v8207_v22 = vld [vmem:[#allocation8 + $0xed8] ss:$8 sps:$4 sm:$0xff]   ;;  %v8215_v0 = vld [vmem:[#allocation8 + $0xeec] ss:$8 sps:$4 sm:$0xff]  }
 0x186   :  { %5076 = vmatprep.subr.bf16.mxu0 %v8132_v58  ;;  %v7381_v58 = vcombine.high %v4612_v54, %v4612_v54 }
 0x187   :  { %2293 = vmatpush1.bf16.msra.mxu1 %v8121_v17  ;;  %v7380_v17 = vcombine.low %v4612_v54, %v4612_v54  ;;  %v8221_v54 = vld [vmem:[#allocation8 + $0xefc] ss:$8 sps:$4 sm:$0xff]  }
 0x188   :  { %2294 = vmatprep.subr.bf16.mxu1 %v8129_v4  ;;  %v8175_v4 = vld [vmem:[#allocation8 + $0x530] ss:$8 sps:$4 sm:$0xff]  }
 0x189   :  { %5077 = vmatpush1.bf16.msra.mxu0 %v8130_v19  ;;  %v1929_v19 = vcombine.high %v9124_v1, %v9124_v1  ;;  %v5014_v7 = vsel %vm9383_vm7, %v7380_v17, 0  ;;  %v8231_v17 = vld [vmem:[#allocation8 + $0xf18] ss:$8 sps:$4 sm:$0xff]  }
 0x18a   :  { %5078 = vmatprep.subr.bf16.mxu0 %v8138_v20  ;;  %v8191_v20 = vld [vmem:[#allocation8 + $0xeac] ss:$8 sps:$4 sm:$0xff]  }
 0x18b   :  { %2295 = vmatpush1.bf16.msra.mxu1 %v8127_v23  ;;  %v4630_v23 = vrot.slane %v7311_v10, %v8968_v25  ;;  %v8230_v10 = vld [vmem:[#allocation8 + $0x5c4] ss:$8 sps:$4 sm:$0xff]  }
 0x18c   :  { %2296 = vmatprep.subr.bf16.mxu1 %v8135_v24  ;;  %v4644_v24 = vrot.slane %v7313_v13, %v8968_v25  ;;  %v8233_v13 = vld [vmem:[#allocation8 + $0xf1c] ss:$8 sps:$4 sm:$0xff]  }
 0x18d   :  { %5079 = vmatpush1.bf16.msra.mxu0 %v8136_v26  ;;  %v5361_v26 = vcombine.high %v9162_v62, %v9165_v18  ;;  %v8290_v62 = vld [vmem:[#allocation8 + $0xfb8] ss:$8 sps:$4 sm:$0xff]   ;;  %v8298_v18 = vld [vmem:[#allocation8 + $0xfcc] ss:$8 sps:$4 sm:$0xff]  }
 0x18e   :  { %5080 = vmatprep.subr.bf16.mxu0 %v8144_v28  ;;  %v4647_v1 = vcombine.low %v4630_v23, %v4644_v24  ;;  %v7056_v28 = vld.sshfl [vmem:[#allocation2 + $0xa] sm:$0xf pattern:$0x75316420]  ;;  %v8245_v24 = vld [vmem:[#allocation8 + $0xf3c] ss:$8 sps:$4 sm:$0xff]  }
 0x18f   :  { %2297 = vmatpush1.bf16.msra.mxu1 %v8133_v29  ;;  %v7058_v29 = vld.sshfl [vmem:[#allocation2 + $0x14] sm:$0xf pattern:$0x75316420]  ;;  %v8242_v23 = vld [vmem:[#allocation8 + $0x5e4] ss:$8 sps:$4 sm:$0xff]  }
 0x190   :  { %2298 = vmatprep.subr.bf16.mxu1 %v8141_v30  ;;  %v8186_v30 = vld [vmem:[#allocation8 + $0x550] ss:$8 sps:$4 sm:$0xff]  }
 0x191   :  { %5081 = vmatpush1.bf16.msra.mxu0 %v8142_v31  ;;  %v8189_v31 = vld [vmem:[#allocation8 + $0xea8] ss:$8 sps:$4 sm:$0xff]  }
 0x192   :  { %5082 = vmatprep.subr.bf16.mxu0 %v8150_v27  ;;  %v7064_v27 = vcombine.low %v7056_v28, %v7058_v29  ;;  %v8249_v28 = vld [vmem:[#allocation8 + $0xf48] ss:$8 sps:$4 sm:$0xff]   ;;  %v8254_v29 = vld [vmem:[#allocation8 + $0x604] ss:$8 sps:$4 sm:$0xff]  }
 0x193   :  { %2299 = vmatpush1.bf16.msra.mxu1 %v8139_v33  ;;  %v8194_v33 = vld [vmem:[#allocation8 + $0x564] ss:$8 sps:$4 sm:$0xff]  }
 0x194   :  { %2300 = vmatprep.subr.bf16.mxu1 %v8147_v55  ;;  %v4661_v55 = vrot.slane %v4647_v1, %v8968_v25  ;;  %v8251_v1 = vld [vmem:[#allocation8 + $0xf4c] ss:$8 sps:$4 sm:$0xff]  }
 0x195   :  { %5083 = vmatpush1.bf16.msra.mxu0 %v8148_v2  ;;  %v8197_v2 = vld [vmem:[#allocation8 + $0xebc] ss:$8 sps:$4 sm:$0xff]  }
 0x196   :  { %5084 = vmatprep.subr.bf16.mxu0 %v8156_v34  ;;  %v9189_v34 = vrot.slane %v5361_v26, %v8968_v25  ;;  %v8246_v26 = vld [vmem:[#allocation8 + $0x5f0] ss:$8 sps:$4 sm:$0xff]  }
 0x197   :  { %2301 = vmatpush1.bf16.msra.mxu1 %v8145_v35  ;;  %v7060_v35 = vld.sshfl [vmem:[#allocation2 + $0x32] sm:$0xf pattern:$0x75316420] }
 0x198   :  { %2302 = vmatprep.subr.bf16.mxu1 %v8153_v36  ;;  %v7062_v36 = vld.sshfl [vmem:[#allocation2 + $0x3c] sm:$0xf pattern:$0x75316420] }
 0x199   :  { %5085 = vmatpush1.bf16.msra.mxu0 %v8154_v32  ;;  %v8192_v32 = vld [vmem:[#allocation8 + $0x560] ss:$8 sps:$4 sm:$0xff]  }
 0x19a   :  { %5086 = vmatprep.subr.bf16.mxu0 %v8162_v37  ;;  %v8195_v37 = vld [vmem:[#allocation8 + $0xeb8] ss:$8 sps:$4 sm:$0xff]  }
 0x19b   :  { %2303 = vmatpush1.bf16.msra.mxu1 %v8151_v38  ;;  %v7066_v38 = vcombine.low %v7060_v35, %v7062_v36  ;;  %v8266_v35 = vld [vmem:[#allocation8 + $0x624] ss:$8 sps:$4 sm:$0xff]   ;;  %v8261_v36 = vld [vmem:[#allocation8 + $0xf68] ss:$8 sps:$4 sm:$0xff]  }
 0x19c   :  { %2304 = vmatprep.subr.bf16.mxu1 %v8159_v39  ;;  %v9192_v39 = vrot.slane %v7064_v27, %v8968_v25  ;;  %v8255_v27 = vld [vmem:[#allocation8 + $0xf58] ss:$8 sps:$4 sm:$0xff]  }
 0x19d   :  { %5087 = vmatpush1.bf16.msra.mxu0 %v8160_v40  ;;  %v8200_v40 = vld [vmem:[#allocation8 + $0x574] ss:$8 sps:$4 sm:$0xff]  }
 0x19e   :  { %5088 = vmatprep.subr.bf16.mxu0 %v8168_v41  ;;  %v8203_v41 = vld [vmem:[#allocation8 + $0xecc] ss:$8 sps:$4 sm:$0xff]  }
 0x19f   :  { %2305 = vmatpush1.bf16.msra.mxu1 %v8157_v42  ;;  %v8198_v42 = vld [vmem:[#allocation8 + $0x570] ss:$8 sps:$4 sm:$0xff]  }
 0x1a0   :  { %2306 = vmatprep.subr.bf16.mxu1 %v8165_v43  ;;  %v9197_v43 = vrot.slane %v7066_v38, %v8968_v25  ;;  %v8269_v38 = vld [vmem:[#allocation8 + $0xf7c] ss:$8 sps:$4 sm:$0xff]  }
 0x1a1   :  { %5089 = vmatpush1.bf16.msra.mxu0 %v8166_v16  ;;  %v8201_v16 = vld [vmem:[#allocation8 + $0xec8] ss:$8 sps:$4 sm:$0xff]  }
 0x1a2   :  { %5090 = vmatprep.subr.bf16.mxu0 %v8174_v44  ;;  %v8206_v44 = vld [vmem:[#allocation8 + $0x584] ss:$8 sps:$4 sm:$0xff]  }
 0x1a3   :  { %2307 = vmatpush1.bf16.msra.mxu1 %v8163_v45  ;;  %v2579_v45 = vcombine.low %v9192_v39, %v9197_v43 }
 0x1a4   :  { %2308 = vmatprep.subr.bf16.mxu1 %v8171_v46  ;;  %v8204_v46 = vld [vmem:[#allocation8 + $0x580] ss:$8 sps:$4 sm:$0xff]  }
 0x1a5   :  { %5091 = vmatpush1.bf16.msra.mxu0 %v8172_v15  ;;  %v8209_v15 = vld [vmem:[#allocation8 + $0xedc] ss:$8 sps:$4 sm:$0xff]  }
 0x1a6   :  { %5101 = vmatprep.subr.bf16.mxu0 %v8180_v63  ;;  %v8212_v63 = vld [vmem:[#allocation8 + $0x594] ss:$8 sps:$4 sm:$0xff]  }
 0x1a7   :  { %2309 = vmatpush1.bf16.msra.mxu1 %v8169_v5  ;;  %v5362_v5 = vcombine.low %v9205_v52, %v9211_v57  ;;  %v8400_v52 = vld [vmem:[#allocation8 + $0x788] ss:$8 sps:$4 sm:$0xff]   ;;  %v8408_v57 = vld [vmem:[#allocation8 + $0x79c] ss:$8 sps:$4 sm:$0xff]  }
 0x1a8   :  { %2319 = vmatprep.subr.bf16.mxu1 %v8177_v11  ;;  %5093 = vmatmul.mubr.bf16.vlgmr.msra.gmra.mrb[0].mxu0 %v4669_v6  ;;  %v8227_v11 = vld [vmem:[#allocation8 + $0xf0c] ss:$8 sps:$4 sm:$0xff]   ;;  %v8222_v6 = vld [vmem:[#allocation8 + $0x5b0] ss:$8 sps:$4 sm:$0xff]  }
 0x1a9   :  { %5102 = vmatpush1.bf16.msra.mxu0 %v8178_v8  ;;  %5133 = vmatprep.mubr.bf16.mxu0 %v9028_v50  ;;  %v8225_v8 = vld [vmem:[#allocation8 + $0xf08] ss:$8 sps:$4 sm:$0xff]  }
 0x1aa   :  { %2311 = vmatmul.mubr.bf16.vlgmr.msra.gmra.mrb[0].mxu1 %v9175_v14  ;;  %7382 = vmatprep.subr.msk.bf16.mxu0 %vm9382_vm2, %v7381_v58  ;;  %v8228_v58 = vld [vmem:[#allocation8 + $0x5c0] ss:$8 sps:$4 sm:$0xff]  }
 0x1ab   :  { %2320 = vmatpush1.bf16.msra.mxu1 %v8175_v4  ;;  %2351 = vmatprep.mubr.bf16.mxu1 %v1929_v19  ;;  %v8236_v4 = vld [vmem:[#allocation8 + $0x5d4] ss:$8 sps:$4 sm:$0xff]  }
 0x1ac   :  { %2321 = vmatprep.subr.bf16.mxu1 %v8183_v51  ;;  %v8239_v19 = vld [vmem:[#allocation8 + $0xf2c] ss:$8 sps:$4 sm:$0xff]   ;;  %v8234_v51 = vld [vmem:[#allocation8 + $0x5d0] ss:$8 sps:$4 sm:$0xff]  }
 0x1ad   :  { %5104 = vmatpush1.bf16.msra.mxu0 %v5014_v7  ;;  %v8240_v7 = vld [vmem:[#allocation8 + $0x5e0] ss:$8 sps:$4 sm:$0xff]  }
 0x1ae   :  { %5734 = vmatprep.subr.bf16.mxu0 %v8191_v20  ;;  %v8237_v20 = vld [vmem:[#allocation8 + $0xf28] ss:$8 sps:$4 sm:$0xff]  }
 0x1af   :  { %2322 = vmatpush1.bf16.msra.mxu1 %v8181_v60  ;;  %v8243_v60 = vld [vmem:[#allocation8 + $0xf38] ss:$8 sps:$4 sm:$0xff]  }
 0x1b0   :  { %2323 = vmatprep.subr.bf16.mxu1 %v8188_v53  ;;  %v8248_v53 = vld [vmem:[#allocation8 + $0x5f4] ss:$8 sps:$4 sm:$0xff]  }
 0x1b3   :  { %2324 = vmatpush1.bf16.msra.mxu1 %v8186_v30  ;;  %v8257_v30 = vld [vmem:[#allocation8 + $0xf5c] ss:$8 sps:$4 sm:$0xff]  }
 0x1b4   :  { %2325 = vmatprep.subr.bf16.mxu1 %v8194_v33  ;;  %7383 = vmatmul.mubr.msk.bf16.vlgmr.msra.gmra.mrb[0].mxu0 %vm1065_vm5, %v4661_v55  ;;  %v8260_v33 = vld [vmem:[#allocation8 + $0x614] ss:$8 sps:$4 sm:$0xff]  }
 0x1b5   :  { %5735 = vmatpush1.bf16.msra.mxu0 %v8189_v31  ;;  %5766 = vmatprep.mubr.bf16.mxu0 %v9189_v34  ;;  %v8252_v31 = vld [vmem:[#allocation8 + $0x600] ss:$8 sps:$4 sm:$0xff]   ;;  %v8263_v55 = vld [vmem:[#allocation8 + $0xf6c] ss:$8 sps:$4 sm:$0xff]  }
 0x1b6   :  { %5736 = vmatprep.subr.bf16.mxu0 %v8197_v2  ;;  %v8258_v2 = vld [vmem:[#allocation8 + $0x610] ss:$8 sps:$4 sm:$0xff]  }
 0x1b7   :  { %2326 = vmatpush1.bf16.msra.mxu1 %v8192_v32  ;;  %v6975_v32 = vld.sshfl [vmem:[#allocation2 + $0x8] sm:$0x10 pattern:$0x75316420] }
 0x1b8   :  { %2327 = vmatprep.subr.bf16.mxu1 %v8200_v40  ;;  %v6979_v40 = vld.sshfl [vmem:[#allocation2 + $0x30] sm:$0x10 pattern:$0x75316420] }
 0x1b9   :  { %5737 = vmatpush1.bf16.msra.mxu0 %v8195_v37  ;;  %v6977_v37 = vld.sshfl [vmem:[#allocation2 + $0x12] sm:$0x10 pattern:$0x75316420] }
 0x1ba   :  { %5738 = vmatprep.subr.bf16.mxu0 %v8203_v41  ;;  %v8264_v41 = vld [vmem:[#allocation8 + $0x620] ss:$8 sps:$4 sm:$0xff]  }
 0x1bb   :  { %2328 = vmatpush1.bf16.msra.mxu1 %v8198_v42  ;;  %v6981_v42 = vld.sshfl [vmem:[#allocation2 + $0x3a] sm:$0x10 pattern:$0x75316420] }
 0x1bc   :  { %2329 = vmatprep.subr.bf16.mxu1 %v8206_v44  ;;  %v8267_v44 = vld [vmem:[#allocation8 + $0xf78] ss:$8 sps:$4 sm:$0xff]  }
 0x1bd   :  { %5739 = vmatpush1.bf16.msra.mxu0 %v8201_v16  ;;  %v8272_v16 = vld [vmem:[#allocation8 + $0x634] ss:$8 sps:$4 sm:$0xff]  }
 0x1be   :  { %5740 = vmatprep.subr.bf16.mxu0 %v8209_v15  ;;  %v1928_v15 = vcombine.high %v9175_v14, %v9175_v14 }
 0x1bf   :  { %2330 = vmatpush1.bf16.msra.mxu1 %v8204_v46  ;;  %v1871_v46 = vld [vmem:[#allocation8 + $0x640] sm:$0x11] }
 0x1c0   :  { %2331 = vmatprep.subr.bf16.mxu1 %v8212_v63  ;;  %v6983_v63 = vcombine.high %v6975_v32, %v6977_v37  ;;  %v8307_v32 = vld [vmem:[#allocation8 + $0x68c] ss:$8 sps:$4 sm:$0xff]   ;;  %v8308_v37 = vld [vmem:[#allocation8 + $0xfe8] ss:$8 sps:$4 sm:$0xff]  }
 0x1c1   :  { %5741 = vmatpush1.bf16.msra.mxu0 %v8207_v22  ;;  %v8275_v22 = vld [vmem:[#allocation8 + $0xf8c] ss:$8 sps:$4 sm:$0xff]  }
 0x1c2   :  { %5742 = vmatprep.subr.bf16.mxu0 %v8215_v0  ;;  %v6985_v0 = vcombine.high %v6979_v40, %v6981_v42  ;;  %v8316_v40 = vld [vmem:[#allocation8 + $0xffc] ss:$8 sps:$4 sm:$0xff]  }
 0x1c3   :  { %2332 = vmatpush1.bf16.msra.mxu1 %v8210_v48  ;;  %v8270_v48 = vld [vmem:[#allocation8 + $0x630] ss:$8 sps:$4 sm:$0xff]   ;;  %v8313_v42 = vld [vmem:[#allocation8 + $0x69c] ss:$8 sps:$4 sm:$0xff]  }
 0x1c4   :  { %2333 = vmatprep.subr.bf16.mxu1 %v8218_v9  ;;  %v7052_v9 = vcombine.low %v1871_v46, %v1871_v46 }
 0x1c5   :  { %5743 = vmatpush1.bf16.msra.mxu0 %v8213_v47  ;;  %v7053_v47 = vcombine.high %v1871_v46, %v1871_v46  ;;  %v8311_v46 = vld [vmem:[#allocation8 + $0x698] ss:$8 sps:$4 sm:$0xff]  }
 0x1c6   :  { %5744 = vmatprep.subr.bf16.mxu0 %v8221_v54  ;;  %v8273_v54 = vld [vmem:[#allocation8 + $0xf88] ss:$8 sps:$4 sm:$0xff]   ;;  %v2273_v14 = vsel %vm9385_vm13, %v7052_v9, 0  ;;  %v8334_v9 = vld [vmem:[#allocation8 + $0x102c] ss:$8 sps:$4 sm:$0xff]  }
 0x1c7   :  { %2334 = vmatpush1.bf16.msra.mxu1 %v8216_v49  ;;  %v8279_v49 = vld [vmem:[#allocation8 + $0xf9c] ss:$8 sps:$4 sm:$0xff]  }
 0x1c8   :  { %2335 = vmatprep.subr.bf16.mxu1 %v8224_v56  ;;  %v1903_v56 = vrot.slane %v6985_v0, %v8968_v25  ;;  %v8317_v0 = vld [vmem:[#allocation8 + $0x6a8] ss:$8 sps:$4 sm:$0xff]  }
 0x1c9   :  { %5745 = vmatpush1.bf16.msra.mxu0 %v8219_v12  ;;  %v1889_v12 = vrot.slane %v6983_v63, %v8968_v25  ;;  %v8328_v63 = vld [vmem:[#allocation8 + $0x101c] ss:$8 sps:$4 sm:$0xff]  }
 0x1ca   :  { %5746 = vmatprep.subr.bf16.mxu0 %v8227_v11  ;;  %v8283_v11 = vld [vmem:[#allocation8 + $0x64c] ss:$8 sps:$4 sm:$0xff]  }
 0x1cb   :  { %2336 = vmatpush1.bf16.msra.mxu1 %v8222_v6  ;;  %v8277_v6 = vld [vmem:[#allocation8 + $0xf98] ss:$8 sps:$4 sm:$0xff]  }
 0x1cc   :  { %2337 = vmatprep.subr.bf16.mxu1 %v8230_v10  ;;  %v1906_v10 = vcombine.low %v1889_v12, %v1903_v56  ;;  %v8332_v12 = vld [vmem:[#allocation8 + $0x1028] ss:$8 sps:$4 sm:$0xff]   ;;  %v8340_v56 = vld [vmem:[#allocation8 + $0x103c] ss:$8 sps:$4 sm:$0xff]  }
 0x1cd   :  { %5747 = vmatpush1.bf16.msra.mxu0 %v8225_v8  ;;  %v8286_v8 = vld [vmem:[#allocation8 + $0xfac] ss:$8 sps:$4 sm:$0xff]  }
 0x1ce   :  { %5748 = vmatprep.subr.bf16.mxu0 %v8233_v13  ;;  %v2580_v13 = vcombine.high %v9192_v39, %v9197_v43  ;;  %v8393_v43 = vld [vmem:[#allocation8 + $0x10c4] ss:$8 sps:$4 sm:$0xff]  }
 0x1cf   :  { %2338 = vmatpush1.bf16.msra.mxu1 %v8228_v58  ;;  %v9228_v58 = vrot.slane %v5360_v21, %v8968_v25  ;;  %v8287_v21 = vld [vmem:[#allocation8 + $0x658] ss:$8 sps:$4 sm:$0xff]  }
 0x1d0   :  { %2339 = vmatprep.subr.bf16.mxu1 %v8236_v4  ;;  %v5385_v4 = vcombine.high %v9189_v34, %v9189_v34  ;;  %v8295_v34 = vld [vmem:[#allocation8 + $0x66c] ss:$8 sps:$4 sm:$0xff]  }
 0x1d1   :  { %5749 = vmatpush1.bf16.msra.mxu0 %v8231_v17  ;;  %v8284_v17 = vld [vmem:[#allocation8 + $0xfa8] ss:$8 sps:$4 sm:$0xff]  }
 0x1d2   :  { %5750 = vmatprep.subr.bf16.mxu0 %v8239_v19  ;;  %v1920_v19 = vrot.slane %v1906_v10, %v8968_v25  ;;  %v8335_v10 = vld [vmem:[#allocation8 + $0x6d8] ss:$8 sps:$4 sm:$0xff]  }
 0x1d3   :  { %2340 = vmatpush1.bf16.msra.mxu1 %v8234_v51  ;;  %v8292_v51 = vld [vmem:[#allocation8 + $0xfbc] ss:$8 sps:$4 sm:$0xff]  }
 0x1d4   :  { %2341 = vmatprep.subr.bf16.mxu1 %v8242_v23  ;;  %v9234_v23 = vrot.slane %v2580_v13, %v8968_v25  ;;  %v8343_v13 = vld [vmem:[#allocation8 + $0x6ec] ss:$8 sps:$4 sm:$0xff]  }
 0x1d5   :  { %5751 = vmatpush1.bf16.msra.mxu0 %v8237_v20  ;;  %v8281_v20 = vld [vmem:[#allocation8 + $0x648] ss:$8 sps:$4 sm:$0xff]  }
 0x1d6   :  { %5752 = vmatprep.subr.bf16.mxu0 %v8245_v24  ;;  %v8289_v24 = vld [vmem:[#allocation8 + $0x65c] ss:$8 sps:$4 sm:$0xff]  }
 0x1d7   :  { %2342 = vmatpush1.bf16.msra.mxu1 %v8240_v7  ;;  %v7466_v7 = vld.sshfl [vmem:[#allocation2 + $0x14] sm:$0xf0 pattern:$0x75316420] }
 0x1d8   :  { %2343 = vmatprep.subr.bf16.mxu1 %v8248_v53  ;;  %v8304_v53 = vld [vmem:[#allocation8 + $0xfdc] ss:$8 sps:$4 sm:$0xff]  }
 0x1d9   :  { %5753 = vmatpush1.bf16.msra.mxu0 %v8243_v60  ;;  %v8296_v60 = vld [vmem:[#allocation8 + $0xfc8] ss:$8 sps:$4 sm:$0xff]  }
 0x1da   :  { %5754 = vmatprep.subr.bf16.mxu0 %v8251_v1  ;;  %v7468_v1 = vld.sshfl [vmem:[#allocation2 + $0x1e] sm:$0xf0 pattern:$0x75316420] }
 0x1db   :  { %2344 = vmatpush1.bf16.msra.mxu1 %v8246_v26  ;;  %v8293_v26 = vld [vmem:[#allocation8 + $0x668] ss:$8 sps:$4 sm:$0xff]  }
 0x1dc   :  { %2345 = vmatprep.subr.bf16.mxu1 %v8254_v29  ;;  %v7474_v29 = vcombine.high %v7466_v7, %v7468_v1  ;;  %v8353_v7 = vld [vmem:[#allocation8 + $0x708] ss:$8 sps:$4 sm:$0xff]   ;;  %v8370_v1 = vld [vmem:[#allocation8 + $0x108c] ss:$8 sps:$4 sm:$0xff]  }
 0x1dd   :  { %5755 = vmatpush1.bf16.msra.mxu0 %v8249_v28  ;;  %v7470_v28 = vld.sshfl [vmem:[#allocation2 + $0x3c] sm:$0xf0 pattern:$0x75316420] }
 0x1de   :  { %5756 = vmatprep.subr.bf16.mxu0 %v8257_v30  ;;  %v8301_v30 = vld [vmem:[#allocation8 + $0x67c] ss:$8 sps:$4 sm:$0xff]  }
 0x1df   :  { %2346 = vmatpush1.bf16.msra.mxu1 %v8252_v31  ;;  %v7472_v31 = vld.sshfl [vmem:[#allocation2 + $0x46] sm:$0xf0 pattern:$0x75316420] }
 0x1e0   :  { %2347 = vmatprep.subr.bf16.mxu1 %v8260_v33  ;;  %v7476_v33 = vcombine.high %v7470_v28, %v7472_v31  ;;  %v8367_v28 = vld [vmem:[#allocation8 + $0x72c] ss:$8 sps:$4 sm:$0xff]   ;;  %v8365_v31 = vld [vmem:[#allocation8 + $0x728] ss:$8 sps:$4 sm:$0xff]  }
 0x1e1   :  { %5757 = vmatpush1.bf16.msra.mxu0 %v8255_v27  ;;  %v8302_v27 = vld [vmem:[#allocation8 + $0xfd8] ss:$8 sps:$4 sm:$0xff]  }
 0x1e2   :  { %5758 = vmatprep.subr.bf16.mxu0 %v8263_v55  ;;  %v9240_v55 = vrot.slane %v7474_v29, %v8968_v25  ;;  %v8368_v29 = vld [vmem:[#allocation8 + $0x1088] ss:$8 sps:$4 sm:$0xff]  }
 0x1e3   :  { %2348 = vmatpush1.bf16.msra.mxu1 %v8258_v2  ;;  %v8310_v2 = vld [vmem:[#allocation8 + $0xfec] ss:$8 sps:$4 sm:$0xff]  }
 0x1e4   :  { %2349 = vmatprep.subr.bf16.mxu1 %v8266_v35  ;;  %v8299_v35 = vld [vmem:[#allocation8 + $0x678] ss:$8 sps:$4 sm:$0xff]  }
 0x1e5   :  { %5759 = vmatpush1.bf16.msra.mxu0 %v8261_v36  ;;  %v9243_v36 = vrot.slane %v7476_v33, %v8968_v25  ;;  %v8374_v33 = vld [vmem:[#allocation8 + $0x1098] ss:$8 sps:$4 sm:$0xff]  }
 0x1e6   :  { %5760 = vmatprep.subr.bf16.mxu0 %v8269_v38 }
 0x1e7   :  { %2350 = vmatpush1.bf16.msra.mxu1 %v8264_v41  ;;  %v6035_v38 = vcombine.low %v9240_v55, %v9243_v36  ;;  %v8305_v41 = vld [vmem:[#allocation8 + $0x688] ss:$8 sps:$4 sm:$0xff]  }
 0x1e8   :  { %2360 = vmatprep.subr.bf16.mxu1 %v8272_v16  ;;  %v8314_v16 = vld [vmem:[#allocation8 + $0xff8] ss:$8 sps:$4 sm:$0xff]  }
 0x1e9   :  { %5761 = vmatpush1.bf16.msra.mxu0 %v8267_v44  ;;  %v8322_v44 = vld [vmem:[#allocation8 + $0x100c] ss:$8 sps:$4 sm:$0xff]  }
 0x1ea   :  { %2352 = vmatmul.mubr.bf16.vlgmr.msra.gmra.mrb[0].mxu1 %v1928_v15  ;;  %5762 = vmatprep.subr.bf16.mxu0 %v8275_v22  ;;  %v8319_v15 = vld [vmem:[#allocation8 + $0x6ac] ss:$8 sps:$4 sm:$0xff]   ;;  %v8320_v22 = vld [vmem:[#allocation8 + $0x1008] ss:$8 sps:$4 sm:$0xff]  }
 0x1eb   :  { %2361 = vmatpush1.bf16.msra.mxu1 %v8270_v48  ;;  %2392 = vmatprep.mubr.bf16.mxu1 %v9028_v50  ;;  %v8325_v48 = vld [vmem:[#allocation8 + $0x6bc] ss:$8 sps:$4 sm:$0xff]  }
 0x1ec   :  { %7054 = vmatprep.subr.msk.bf16.mxu1 %vm9384_vm8, %v7053_v47  ;;  %v8326_v47 = vld [vmem:[#allocation8 + $0x1018] ss:$8 sps:$4 sm:$0xff]  }
 0x1ed   :  { %5763 = vmatpush1.bf16.msra.mxu0 %v8273_v54  ;;  %v8323_v54 = vld [vmem:[#allocation8 + $0x6b8] ss:$8 sps:$4 sm:$0xff]  }
 0x1ee   :  { %5764 = vmatprep.subr.bf16.mxu0 %v8279_v49  ;;  %v8331_v49 = vld [vmem:[#allocation8 + $0x6cc] ss:$8 sps:$4 sm:$0xff]  }
 0x1ef   :  { %2363 = vmatpush1.bf16.msra.mxu1 %v2273_v14  ;;  %v8329_v14 = vld [vmem:[#allocation8 + $0x6c8] ss:$8 sps:$4 sm:$0xff]  }
 0x1f0   :  { %2953 = vmatprep.subr.bf16.mxu1 %v8283_v11  ;;  %v8337_v11 = vld [vmem:[#allocation8 + $0x6dc] ss:$8 sps:$4 sm:$0xff]  }
 0x1f1   :  { %5765 = vmatpush1.bf16.msra.mxu0 %v8277_v6  ;;  %v8338_v6 = vld [vmem:[#allocation8 + $0x1038] ss:$8 sps:$4 sm:$0xff]  }
 0x1f2   :  { %5775 = vmatprep.subr.bf16.mxu0 %v8286_v8  ;;  %v8346_v8 = vld [vmem:[#allocation8 + $0x104c] ss:$8 sps:$4 sm:$0xff]  }
 0x1f4   :  { %5767 = vmatmul.mubr.bf16.vlgmr.msra.gmra.mrb[0].mxu0 %v9228_v58 }
 0x1f5   :  { %5776 = vmatpush1.bf16.msra.mxu0 %v8284_v17  ;;  %5807 = vmatprep.mubr.bf16.mxu0 %v5385_v4  ;;  %v8344_v17 = vld [vmem:[#allocation8 + $0x1048] ss:$8 sps:$4 sm:$0xff]   ;;  %v8352_v4 = vld [vmem:[#allocation8 + $0x105c] ss:$8 sps:$4 sm:$0xff]  }
 0x1f6   :  { %7055 = vmatmul.mubr.msk.bf16.vlgmr.msra.gmra.mrb[0].mxu1 %vm1065_vm5, %v1920_v19  ;;  %5777 = vmatprep.subr.bf16.mxu0 %v8292_v51  ;;  %v8341_v19 = vld [vmem:[#allocation8 + $0x6e8] ss:$8 sps:$4 sm:$0xff]   ;;  %v8349_v51 = vld [vmem:[#allocation8 + $0x6fc] ss:$8 sps:$4 sm:$0xff]  }
 0x1f7   :  { %2954 = vmatpush1.bf16.msra.mxu1 %v8281_v20  ;;  %2985 = vmatprep.mubr.bf16.mxu1 %v9234_v23  ;;  %v8350_v20 = vld [vmem:[#allocation8 + $0x1058] ss:$8 sps:$4 sm:$0xff]  }
 0x1f8   :  { %2955 = vmatprep.subr.bf16.mxu1 %v8289_v24  ;;  %v8358_v24 = vld [vmem:[#allocation8 + $0x106c] ss:$8 sps:$4 sm:$0xff]  }
 0x1f9   :  { %5778 = vmatpush1.bf16.msra.mxu0 %v8290_v62  ;;  %v8347_v62 = vld [vmem:[#allocation8 + $0x6f8] ss:$8 sps:$4 sm:$0xff]  }
 0x1fa   :  { %5779 = vmatprep.subr.bf16.mxu0 %v8298_v18  ;;  %v8355_v18 = vld [vmem:[#allocation8 + $0x70c] ss:$8 sps:$4 sm:$0xff]  }
 0x1fb   :  { %2956 = vmatpush1.bf16.msra.mxu1 %v8287_v21  ;;  %v8356_v21 = vld [vmem:[#allocation8 + $0x1068] ss:$8 sps:$4 sm:$0xff]  }
 0x1fc   :  { %2957 = vmatprep.subr.bf16.mxu1 %v8295_v34  ;;  %v8364_v34 = vld [vmem:[#allocation8 + $0x107c] ss:$8 sps:$4 sm:$0xff]  }
 0x1fd   :  { %5780 = vmatpush1.bf16.msra.mxu0 %v8296_v60  ;;  %v8361_v60 = vld [vmem:[#allocation8 + $0x71c] ss:$8 sps:$4 sm:$0xff]  }
 0x1fe   :  { %5781 = vmatprep.subr.bf16.mxu0 %v8304_v53  ;;  %v8362_v53 = vld [vmem:[#allocation8 + $0x1078] ss:$8 sps:$4 sm:$0xff]  }
 0x1ff   :  { %2958 = vmatpush1.bf16.msra.mxu1 %v8293_v26  ;;  %v8359_v26 = vld [vmem:[#allocation8 + $0x718] ss:$8 sps:$4 sm:$0xff]  }
 0x200   :  { %2959 = vmatprep.subr.bf16.mxu1 %v8301_v30  ;;  %v8376_v30 = vld [vmem:[#allocation8 + $0x109c] ss:$8 sps:$4 sm:$0xff]  }
 0x201   :  { %5782 = vmatpush1.bf16.msra.mxu0 %v8302_v27  ;;  %v8373_v27 = vld [vmem:[#allocation8 + $0x73c] ss:$8 sps:$4 sm:$0xff]  }
 0x202   :  { %5783 = vmatprep.subr.bf16.mxu0 %v8310_v2  ;;  %v8382_v2 = vld [vmem:[#allocation8 + $0x10ac] ss:$8 sps:$4 sm:$0xff]  }
 0x203   :  { %2960 = vmatpush1.bf16.msra.mxu1 %v8299_v35  ;;  %v8371_v35 = vld [vmem:[#allocation8 + $0x738] ss:$8 sps:$4 sm:$0xff]  }
 0x204   :  { %2961 = vmatprep.subr.bf16.mxu1 %v8307_v32  ;;  %v5327_v32 = vld [vmem:[#allocation8 + $0x10b8] sm:$0x11] }
 0x205   :  { %5784 = vmatpush1.bf16.msra.mxu0 %v8308_v37  ;;  %v8379_v37 = vld [vmem:[#allocation8 + $0x74c] ss:$8 sps:$4 sm:$0xff]  }
 0x206   :  { %5785 = vmatprep.subr.bf16.mxu0 %v8316_v40  ;;  %v5384_v40 = vcombine.high %v9228_v58, %v9228_v58  ;;  %v8390_v58 = vld [vmem:[#allocation8 + $0x76c] ss:$8 sps:$4 sm:$0xff]  }
 0x207   :  { %2962 = vmatpush1.bf16.msra.mxu1 %v8305_v41  ;;  %v8380_v41 = vld [vmem:[#allocation8 + $0x10a8] ss:$8 sps:$4 sm:$0xff]  }
 0x208   :  { %2963 = vmatprep.subr.bf16.mxu1 %v8313_v42  ;;  %v9253_v42 = vrot.slane %v2579_v45, %v8968_v25  ;;  %v8383_v45 = vld [vmem:[#allocation8 + $0x758] ss:$8 sps:$4 sm:$0xff]  }
 0x209   :  { %5786 = vmatpush1.bf16.msra.mxu0 %v8314_v16  ;;  %v7463_v16 = vcombine.high %v5327_v32, %v5327_v32 }
 0x20a   :  { %5787 = vmatprep.subr.bf16.mxu0 %v8322_v44  ;;  %v7462_v44 = vcombine.low %v5327_v32, %v5327_v32  ;;  %v8453_v32 = vld [vmem:[#allocation8 + $0x1164] ss:$8 sps:$4 sm:$0xff]  }
 0x20b   :  { %2964 = vmatpush1.bf16.msra.mxu1 %v8311_v46  ;;  %v8377_v46 = vld [vmem:[#allocation8 + $0x748] ss:$8 sps:$4 sm:$0xff]  }
 0x20c   :  { %2965 = vmatprep.subr.bf16.mxu1 %v8319_v15  ;;  %v2604_v15 = vcombine.high %v9234_v23, %v9234_v23  ;;  %v5729_v39 = vsel %vm9387_vm10, %v7462_v44, 0  ;;  %v6036_v23 = vcombine.high %v9240_v55, %v9243_v36  ;;  %v8454_v44 = vld [vmem:[#allocation8 + $0x818] ss:$8 sps:$4 sm:$0xff]   ;;  %v8500_v55 = vld [vmem:[#allocation8 + $0x11e4] ss:$8 sps:$4 sm:$0xff]  }
 0x20d   :  { %5788 = vmatpush1.bf16.msra.mxu0 %v8320_v22  ;;  %v8385_v22 = vld [vmem:[#allocation8 + $0x75c] ss:$8 sps:$4 sm:$0xff]   ;;  %v8489_v36 = vld [vmem:[#allocation8 + $0x870] ss:$8 sps:$4 sm:$0xff]  }
 0x20e   :  { %5789 = vmatprep.subr.bf16.mxu0 %v8328_v63  ;;  %v8388_v63 = vld [vmem:[#allocation8 + $0x768] ss:$8 sps:$4 sm:$0xff]  }
 0x20f   :  { %2966 = vmatpush1.bf16.msra.mxu1 %v8317_v0  ;;  %v8396_v0 = vld [vmem:[#allocation8 + $0x77c] ss:$8 sps:$4 sm:$0xff]  }
 0x210   :  { %2967 = vmatprep.subr.bf16.mxu1 %v8325_v48  ;;  %v5376_v48 = vrot.slane %v5362_v5, %v8968_v25  ;;  %v8403_v5 = vld [vmem:[#allocation8 + $0x10e0] ss:$8 sps:$4 sm:$0xff]  }
 0x211   :  { %5790 = vmatpush1.bf16.msra.mxu0 %v8326_v47  ;;  %v8391_v47 = vld [vmem:[#allocation8 + $0x10c0] ss:$8 sps:$4 sm:$0xff]  }
 0x212   :  { %5791 = vmatprep.subr.bf16.mxu0 %v8334_v9  ;;  %v9268_v9 = vrot.slane %v6036_v23, %v8968_v25  ;;  %v7059_v23 = vld.sshfl [vmem:[#allocation2 + $0x1c] sm:$0x1 pattern:$0x75316420] }
 0x213   :  { %2968 = vmatpush1.bf16.msra.mxu1 %v8323_v54  ;;  %v8399_v54 = vld [vmem:[#allocation8 + $0x10d4] ss:$8 sps:$4 sm:$0xff]  }
 0x214   :  { %2969 = vmatprep.subr.bf16.mxu1 %v8331_v49  ;;  %v8394_v49 = vld [vmem:[#allocation8 + $0x778] ss:$8 sps:$4 sm:$0xff]  }
 0x215   :  { %5792 = vmatpush1.bf16.msra.mxu0 %v8332_v12  ;;  %v8402_v12 = vld [vmem:[#allocation8 + $0x78c] ss:$8 sps:$4 sm:$0xff]  }
 0x216   :  { %5793 = vmatprep.subr.bf16.mxu0 %v8340_v56  ;;  %v8397_v56 = vld [vmem:[#allocation8 + $0x10d0] ss:$8 sps:$4 sm:$0xff]  }
 0x217   :  { %2970 = vmatpush1.bf16.msra.mxu1 %v8329_v14  ;;  %v8405_v14 = vld [vmem:[#allocation8 + $0x10e4] ss:$8 sps:$4 sm:$0xff]  }
 0x218   :  { %2971 = vmatprep.subr.bf16.mxu1 %v8337_v11  ;;  %v8411_v11 = vld [vmem:[#allocation8 + $0x10f4] ss:$8 sps:$4 sm:$0xff]  }
 0x219   :  { %5794 = vmatpush1.bf16.msra.mxu0 %v8338_v6  ;;  %v8406_v6 = vld [vmem:[#allocation8 + $0x798] ss:$8 sps:$4 sm:$0xff]  }
 0x21a   :  { %5795 = vmatprep.subr.bf16.mxu0 %v8346_v8  ;;  %v8414_v8 = vld [vmem:[#allocation8 + $0x7ac] ss:$8 sps:$4 sm:$0xff]  }
 0x21b   :  { %2972 = vmatpush1.bf16.msra.mxu1 %v8335_v10  ;;  %v8409_v10 = vld [vmem:[#allocation8 + $0x10f0] ss:$8 sps:$4 sm:$0xff]  }
 0x21c   :  { %2973 = vmatprep.subr.bf16.mxu1 %v8343_v13  ;;  %v8417_v13 = vld [vmem:[#allocation8 + $0x1104] ss:$8 sps:$4 sm:$0xff]  }
 0x21d   :  { %5796 = vmatpush1.bf16.msra.mxu0 %v8344_v17  ;;  %v8412_v17 = vld [vmem:[#allocation8 + $0x7a8] ss:$8 sps:$4 sm:$0xff]  }
 0x21e   :  { %5797 = vmatprep.subr.bf16.mxu0 %v8352_v4  ;;  %v8420_v4 = vld [vmem:[#allocation8 + $0x7bc] ss:$8 sps:$4 sm:$0xff]  }
 0x21f   :  { %2974 = vmatpush1.bf16.msra.mxu1 %v8341_v19  ;;  %v8415_v19 = vld [vmem:[#allocation8 + $0x1100] ss:$8 sps:$4 sm:$0xff]  }
 0x220   :  { %2975 = vmatprep.subr.bf16.mxu1 %v8349_v51  ;;  %v8423_v51 = vld [vmem:[#allocation8 + $0x1114] ss:$8 sps:$4 sm:$0xff]  }
 0x221   :  { %5798 = vmatpush1.bf16.msra.mxu0 %v8350_v20  ;;  %v8418_v20 = vld [vmem:[#allocation8 + $0x7b8] ss:$8 sps:$4 sm:$0xff]  }
 0x222   :  { %5799 = vmatprep.subr.bf16.mxu0 %v8358_v24  ;;  %v8426_v24 = vld [vmem:[#allocation8 + $0x7cc] ss:$8 sps:$4 sm:$0xff]  }
 0x223   :  { %2976 = vmatpush1.bf16.msra.mxu1 %v8347_v62  ;;  %v8421_v62 = vld [vmem:[#allocation8 + $0x1110] ss:$8 sps:$4 sm:$0xff]  }
 0x224   :  { %2977 = vmatprep.subr.bf16.mxu1 %v8355_v18  ;;  %v8429_v18 = vld [vmem:[#allocation8 + $0x1124] ss:$8 sps:$4 sm:$0xff]  }
 0x225   :  { %5800 = vmatpush1.bf16.msra.mxu0 %v8356_v21  ;;  %v8424_v21 = vld [vmem:[#allocation8 + $0x7c8] ss:$8 sps:$4 sm:$0xff]  }
 0x226   :  { %5801 = vmatprep.subr.bf16.mxu0 %v8364_v34  ;;  %v8432_v34 = vld [vmem:[#allocation8 + $0x7dc] ss:$8 sps:$4 sm:$0xff]  }
 0x227   :  { %2978 = vmatpush1.bf16.msra.mxu1 %v8353_v7  ;;  %v8427_v7 = vld [vmem:[#allocation8 + $0x1120] ss:$8 sps:$4 sm:$0xff]  }
 0x228   :  { %2979 = vmatprep.subr.bf16.mxu1 %v8361_v60  ;;  %v8435_v60 = vld [vmem:[#allocation8 + $0x1134] ss:$8 sps:$4 sm:$0xff]  }
 0x229   :  { %5802 = vmatpush1.bf16.msra.mxu0 %v8362_v53  ;;  %v8430_v53 = vld [vmem:[#allocation8 + $0x7d8] ss:$8 sps:$4 sm:$0xff]  }
 0x22a   :  { %5803 = vmatprep.subr.bf16.mxu0 %v8370_v1  ;;  %v8438_v1 = vld [vmem:[#allocation8 + $0x7ec] ss:$8 sps:$4 sm:$0xff]  }
 0x22b   :  { %2980 = vmatpush1.bf16.msra.mxu1 %v8359_v26  ;;  %v8433_v26 = vld [vmem:[#allocation8 + $0x1130] ss:$8 sps:$4 sm:$0xff]  }
 0x22c   :  { %2981 = vmatprep.subr.bf16.mxu1 %v8367_v28  ;;  %v8441_v28 = vld [vmem:[#allocation8 + $0x1144] ss:$8 sps:$4 sm:$0xff]  }
 0x22d   :  { %5804 = vmatpush1.bf16.msra.mxu0 %v8368_v29  ;;  %v8436_v29 = vld [vmem:[#allocation8 + $0x7e8] ss:$8 sps:$4 sm:$0xff]  }
 0x22e   :  { %5805 = vmatprep.subr.bf16.mxu0 %v8376_v30  ;;  %v8444_v30 = vld [vmem:[#allocation8 + $0x7fc] ss:$8 sps:$4 sm:$0xff]  }
 0x22f   :  { %2982 = vmatpush1.bf16.msra.mxu1 %v8365_v31  ;;  %v8439_v31 = vld [vmem:[#allocation8 + $0x1140] ss:$8 sps:$4 sm:$0xff]  }
 0x230   :  { %2983 = vmatprep.subr.bf16.mxu1 %v8373_v27  ;;  %v8447_v27 = vld [vmem:[#allocation8 + $0x1154] ss:$8 sps:$4 sm:$0xff]  }
 0x231   :  { %5806 = vmatpush1.bf16.msra.mxu0 %v8374_v33  ;;  %v8442_v33 = vld [vmem:[#allocation8 + $0x7f8] ss:$8 sps:$4 sm:$0xff]  }
 0x232   :  { %5816 = vmatprep.subr.bf16.mxu0 %v8382_v2  ;;  %v8450_v2 = vld [vmem:[#allocation8 + $0x80c] ss:$8 sps:$4 sm:$0xff]  }
 0x233   :  { %2984 = vmatpush1.bf16.msra.mxu1 %v8371_v35  ;;  %v8445_v35 = vld [vmem:[#allocation8 + $0x1150] ss:$8 sps:$4 sm:$0xff]  }
 0x234   :  { %2994 = vmatprep.subr.bf16.mxu1 %v8379_v37  ;;  %5808 = vmatmul.mubr.bf16.vlgmr.msra.gmra.mrb[0].mxu0 %v5384_v40  ;;  %v8448_v37 = vld [vmem:[#allocation8 + $0x808] ss:$8 sps:$4 sm:$0xff]   ;;  %v8456_v40 = vld [vmem:[#allocation8 + $0x81c] ss:$8 sps:$4 sm:$0xff]  }
 0x235   :  { %5817 = vmatpush1.bf16.msra.mxu0 %v8380_v41  ;;  %5848 = vmatprep.mubr.bf16.mxu0 %v9028_v50  ;;  %v8451_v41 = vld [vmem:[#allocation8 + $0x1160] ss:$8 sps:$4 sm:$0xff]  }
 0x236   :  { %2986 = vmatmul.mubr.bf16.vlgmr.msra.gmra.mrb[0].mxu1 %v9253_v42  ;;  %7464 = vmatprep.subr.msk.bf16.mxu0 %vm9386_vm9, %v7463_v16  ;;  %v8459_v16 = vld [vmem:[#allocation8 + $0x1174] ss:$8 sps:$4 sm:$0xff]  }
 0x237   :  { %2995 = vmatpush1.bf16.msra.mxu1 %v8377_v46  ;;  %3026 = vmatprep.mubr.bf16.mxu1 %v2604_v15  ;;  %v8462_v46 = vld [vmem:[#allocation8 + $0x82c] ss:$8 sps:$4 sm:$0xff]   ;;  %v8457_v15 = vld [vmem:[#allocation8 + $0x1170] ss:$8 sps:$4 sm:$0xff]  }
 0x238   :  { %2996 = vmatprep.subr.bf16.mxu1 %v8385_v22  ;;  %v8465_v22 = vld [vmem:[#allocation8 + $0x1184] ss:$8 sps:$4 sm:$0xff]  }
 0x239   :  { %5819 = vmatpush1.bf16.msra.mxu0 %v5729_v39  ;;  %v8460_v39 = vld [vmem:[#allocation8 + $0x828] ss:$8 sps:$4 sm:$0xff]  }
 0x23a   :  { %6409 = vmatprep.subr.bf16.mxu0 %v8393_v43  ;;  %v8468_v43 = vld [vmem:[#allocation8 + $0x83c] ss:$8 sps:$4 sm:$0xff]  }
 0x23b   :  { %2997 = vmatpush1.bf16.msra.mxu1 %v8383_v45  ;;  %v8463_v45 = vld [vmem:[#allocation8 + $0x1180] ss:$8 sps:$4 sm:$0xff]  }
 0x23c   :  { %2998 = vmatprep.subr.bf16.mxu1 %v8390_v58  ;;  %v7057_v58 = vld.sshfl [vmem:[#allocation2 + $0x12] sm:$0x1 pattern:$0x75316420] }
 0x23f   :  { %2999 = vmatpush1.bf16.msra.mxu1 %v8388_v63  ;;  %v8471_v63 = vld [vmem:[#allocation8 + $0x1194] ss:$8 sps:$4 sm:$0xff]  }
 0x240   :  { %3000 = vmatprep.subr.bf16.mxu1 %v8396_v0  ;;  %7465 = vmatmul.mubr.msk.bf16.vlgmr.msra.gmra.mrb[0].mxu0 %vm1065_vm5, %v5376_v48  ;;  %v7061_v0 = vld.sshfl [vmem:[#allocation2 + $0x3a] sm:$0x1 pattern:$0x75316420] }
 0x241   :  { %6410 = vmatpush1.bf16.msra.mxu0 %v8391_v47  ;;  %6441 = vmatprep.mubr.bf16.mxu0 %v9268_v9  ;;  %v8466_v48 = vld [vmem:[#allocation8 + $0x838] ss:$8 sps:$4 sm:$0xff]  }
 0x242   :  { %6411 = vmatprep.subr.bf16.mxu0 %v8399_v54  ;;  %v7063_v47 = vld.sshfl [vmem:[#allocation2 + $0x44] sm:$0x1 pattern:$0x75316420]  ;;  %v8474_v54 = vld [vmem:[#allocation8 + $0x84c] ss:$8 sps:$4 sm:$0xff]  }
 0x243   :  { %3001 = vmatpush1.bf16.msra.mxu1 %v8394_v49  ;;  %v8469_v49 = vld [vmem:[#allocation8 + $0x1190] ss:$8 sps:$4 sm:$0xff]  }
 0x244   :  { %3002 = vmatprep.subr.bf16.mxu1 %v8402_v12  ;;  %v2546_v12 = vld [vmem:[#allocation8 + $0x858] sm:$0x11] }
 0x245   :  { %6412 = vmatpush1.bf16.msra.mxu0 %v8397_v56  ;;  %v2603_v56 = vcombine.high %v9253_v42, %v9253_v42 }
 0x246   :  { %6413 = vmatprep.subr.bf16.mxu0 %v8405_v14  ;;  %v8477_v14 = vld [vmem:[#allocation8 + $0x11a4] ss:$8 sps:$4 sm:$0xff]  }
 0x247   :  { %3003 = vmatpush1.bf16.msra.mxu1 %v8400_v52  ;;  %v7065_v52 = vcombine.low %v7057_v58, %v7059_v23  ;;  %v8534_v58 = vld [vmem:[#allocation8 + $0x1240] ss:$8 sps:$4 sm:$0xff]   ;;  %v8542_v23 = vld [vmem:[#allocation8 + $0x1254] ss:$8 sps:$4 sm:$0xff]  }
 0x248   :  { %3004 = vmatprep.subr.bf16.mxu1 %v8408_v57  ;;  %v7067_v57 = vcombine.low %v7061_v0, %v7063_v47  ;;  %v8539_v0 = vld [vmem:[#allocation8 + $0x8f4] ss:$8 sps:$4 sm:$0xff]   ;;  %v8548_v47 = vld [vmem:[#allocation8 + $0x1264] ss:$8 sps:$4 sm:$0xff]  }
 0x249   :  { %6414 = vmatpush1.bf16.msra.mxu0 %v8403_v5  ;;  %v8472_v5 = vld [vmem:[#allocation8 + $0x848] ss:$8 sps:$4 sm:$0xff]  }
 0x24a   :  { %6415 = vmatprep.subr.bf16.mxu0 %v8411_v11  ;;  %v7135_v11 = vcombine.high %v2546_v12, %v2546_v12 }
 0x24b   :  { %3005 = vmatpush1.bf16.msra.mxu1 %v8406_v6  ;;  %v7134_v6 = vcombine.low %v2546_v12, %v2546_v12  ;;  %v8546_v12 = vld [vmem:[#allocation8 + $0x1260] ss:$8 sps:$4 sm:$0xff]  }
 0x24c   :  { %3006 = vmatprep.subr.bf16.mxu1 %v8414_v8  ;;  %v8475_v8 = vld [vmem:[#allocation8 + $0x11a0] ss:$8 sps:$4 sm:$0xff]  }
 0x24d   :  { %6416 = vmatpush1.bf16.msra.mxu0 %v8409_v10  ;;  %v8481_v10 = vld [vmem:[#allocation8 + $0x11b4] ss:$8 sps:$4 sm:$0xff]   ;;  %v2948_v42 = vsel %vm9389_vm15, %v7134_v6, 0  ;;  %v8557_v6 = vld [vmem:[#allocation8 + $0x924] ss:$8 sps:$4 sm:$0xff]  }
 0x24e   :  { %6417 = vmatprep.subr.bf16.mxu0 %v8417_v13  ;;  %v2564_v13 = vrot.slane %v7065_v52, %v8968_v25  ;;  %v8551_v52 = vld [vmem:[#allocation8 + $0x914] ss:$8 sps:$4 sm:$0xff]  }
 0x24f   :  { %3007 = vmatpush1.bf16.msra.mxu1 %v8412_v17  ;;  %v2578_v17 = vrot.slane %v7067_v57, %v8968_v25  ;;  %v8552_v57 = vld [vmem:[#allocation8 + $0x1270] ss:$8 sps:$4 sm:$0xff]  }
 0x250   :  { %3008 = vmatprep.subr.bf16.mxu1 %v8420_v4  ;;  %v8485_v4 = vld [vmem:[#allocation8 + $0x864] ss:$8 sps:$4 sm:$0xff]  }
 0x251   :  { %6418 = vmatpush1.bf16.msra.mxu0 %v8415_v19  ;;  %v8479_v19 = vld [vmem:[#allocation8 + $0x11b0] ss:$8 sps:$4 sm:$0xff]  }
 0x252   :  { %6419 = vmatprep.subr.bf16.mxu0 %v8423_v51  ;;  %v8488_v51 = vld [vmem:[#allocation8 + $0x11c4] ss:$8 sps:$4 sm:$0xff]  }
 0x253   :  { %3009 = vmatpush1.bf16.msra.mxu1 %v8418_v20  ;;  %v2581_v20 = vcombine.low %v2564_v13, %v2578_v17  ;;  %v8555_v13 = vld [vmem:[#allocation8 + $0x920] ss:$8 sps:$4 sm:$0xff]   ;;  %v8563_v17 = vld [vmem:[#allocation8 + $0x934] ss:$8 sps:$4 sm:$0xff]  }
 0x254   :  { %3010 = vmatprep.subr.bf16.mxu1 %v8426_v24  ;;  %v9283_v24 = vrot.slane %v6035_v38, %v8968_v25  ;;  %v8497_v38 = vld [vmem:[#allocation8 + $0x884] ss:$8 sps:$4 sm:$0xff]  }
 0x255   :  { %6420 = vmatpush1.bf16.msra.mxu0 %v8421_v62  ;;  %v8486_v62 = vld [vmem:[#allocation8 + $0x11c0] ss:$8 sps:$4 sm:$0xff]  }
 0x256   :  { %6421 = vmatprep.subr.bf16.mxu0 %v8429_v18  ;;  %v6060_v18 = vcombine.high %v9268_v9, %v9268_v9  ;;  %v8498_v9 = vld [vmem:[#allocation8 + $0x11e0] ss:$8 sps:$4 sm:$0xff]  }
 0x257   :  { %3011 = vmatpush1.bf16.msra.mxu1 %v8424_v21  ;;  %v2595_v21 = vrot.slane %v2581_v20, %v8968_v25  ;;  %v8570_v20 = vld [vmem:[#allocation8 + $0x12a0] ss:$8 sps:$4 sm:$0xff]  }
 0x258   :  { %3012 = vmatprep.subr.bf16.mxu1 %v8432_v34  ;;  %v8494_v34 = vld [vmem:[#allocation8 + $0x11d4] ss:$8 sps:$4 sm:$0xff]  }
 0x259   :  { %6422 = vmatpush1.bf16.msra.mxu0 %v8427_v7  ;;  %v8483_v7 = vld [vmem:[#allocation8 + $0x860] ss:$8 sps:$4 sm:$0xff]  }
 0x25a   :  { %6423 = vmatprep.subr.bf16.mxu0 %v8435_v60  ;;  %v8491_v60 = vld [vmem:[#allocation8 + $0x874] ss:$8 sps:$4 sm:$0xff]  }
 0x25b   :  { %3013 = vmatpush1.bf16.msra.mxu1 %v8430_v53  ;;  %v8492_v53 = vld [vmem:[#allocation8 + $0x11d0] ss:$8 sps:$4 sm:$0xff]  }
 0x25c   :  { %3014 = vmatprep.subr.bf16.mxu1 %v8438_v1  ;;  %v8506_v1 = vld [vmem:[#allocation8 + $0x11f4] ss:$8 sps:$4 sm:$0xff]  }
 0x25d   :  { %6424 = vmatpush1.bf16.msra.mxu0 %v8433_v26  ;;  %v8495_v26 = vld [vmem:[#allocation8 + $0x880] ss:$8 sps:$4 sm:$0xff]  }
 0x25e   :  { %6425 = vmatprep.subr.bf16.mxu0 %v8441_v28  ;;  %v8503_v28 = vld [vmem:[#allocation8 + $0x894] ss:$8 sps:$4 sm:$0xff]  }
 0x25f   :  { %3015 = vmatpush1.bf16.msra.mxu1 %v8436_v29  ;;  %v8504_v29 = vld [vmem:[#allocation8 + $0x11f0] ss:$8 sps:$4 sm:$0xff]  }
 0x260   :  { %3016 = vmatprep.subr.bf16.mxu1 %v8444_v30  ;;  %v8512_v30 = vld [vmem:[#allocation8 + $0x1204] ss:$8 sps:$4 sm:$0xff]  }
 0x261   :  { %6426 = vmatpush1.bf16.msra.mxu0 %v8439_v31  ;;  %v8501_v31 = vld [vmem:[#allocation8 + $0x890] ss:$8 sps:$4 sm:$0xff]  }
 0x262   :  { %6427 = vmatprep.subr.bf16.mxu0 %v8447_v27  ;;  %v8509_v27 = vld [vmem:[#allocation8 + $0x8a4] ss:$8 sps:$4 sm:$0xff]  }
 0x263   :  { %3017 = vmatpush1.bf16.msra.mxu1 %v8442_v33  ;;  %v8518_v33 = vld [vmem:[#allocation8 + $0x1214] ss:$8 sps:$4 sm:$0xff]  }
 0x264   :  { %3018 = vmatprep.subr.bf16.mxu1 %v8450_v2  ;;  %v8507_v2 = vld [vmem:[#allocation8 + $0x8a0] ss:$8 sps:$4 sm:$0xff]  }
 0x265   :  { %6428 = vmatpush1.bf16.msra.mxu0 %v8445_v35  ;;  %v8515_v35 = vld [vmem:[#allocation8 + $0x8b4] ss:$8 sps:$4 sm:$0xff]  }
 0x266   :  { %6429 = vmatprep.subr.bf16.mxu0 %v8453_v32  ;;  %v8516_v32 = vld [vmem:[#allocation8 + $0x1210] ss:$8 sps:$4 sm:$0xff]  }
 0x267   :  { %3019 = vmatpush1.bf16.msra.mxu1 %v8448_v37  ;;  %v8524_v37 = vld [vmem:[#allocation8 + $0x1224] ss:$8 sps:$4 sm:$0xff]  }
 0x268   :  { %3020 = vmatprep.subr.bf16.mxu1 %v8456_v40  ;;  %v8513_v40 = vld [vmem:[#allocation8 + $0x8b0] ss:$8 sps:$4 sm:$0xff]  }
 0x269   :  { %6430 = vmatpush1.bf16.msra.mxu0 %v8451_v41  ;;  %v8521_v41 = vld [vmem:[#allocation8 + $0x8c4] ss:$8 sps:$4 sm:$0xff]  }
 0x26a   :  { %6431 = vmatprep.subr.bf16.mxu0 %v8459_v16  ;;  %v8522_v16 = vld [vmem:[#allocation8 + $0x1220] ss:$8 sps:$4 sm:$0xff]  }
 0x26b   :  { %3021 = vmatpush1.bf16.msra.mxu1 %v8454_v44  ;;  %v8530_v44 = vld [vmem:[#allocation8 + $0x1234] ss:$8 sps:$4 sm:$0xff]  }
 0x26c   :  { %3022 = vmatprep.subr.bf16.mxu1 %v8462_v46  ;;  %v8519_v46 = vld [vmem:[#allocation8 + $0x8c0] ss:$8 sps:$4 sm:$0xff]  }
 0x26d   :  { %6432 = vmatpush1.bf16.msra.mxu0 %v8457_v15  ;;  %v8527_v15 = vld [vmem:[#allocation8 + $0x8d4] ss:$8 sps:$4 sm:$0xff]  }
 0x26e   :  { %6433 = vmatprep.subr.bf16.mxu0 %v8465_v22  ;;  %v8528_v22 = vld [vmem:[#allocation8 + $0x1230] ss:$8 sps:$4 sm:$0xff]  }
 0x26f   :  { %3023 = vmatpush1.bf16.msra.mxu1 %v8460_v39  ;;  %v8536_v39 = vld [vmem:[#allocation8 + $0x1244] ss:$8 sps:$4 sm:$0xff]  }
 0x270   :  { %3024 = vmatprep.subr.bf16.mxu1 %v8468_v43  ;;  %v8525_v43 = vld [vmem:[#allocation8 + $0x8d0] ss:$8 sps:$4 sm:$0xff]  }
 0x271   :  { %6434 = vmatpush1.bf16.msra.mxu0 %v8463_v45  ;;  %v8533_v45 = vld [vmem:[#allocation8 + $0x8e4] ss:$8 sps:$4 sm:$0xff]  }
 0x272   :  { %6435 = vmatprep.subr.bf16.mxu0 %v8471_v63  ;;  %v8531_v63 = vld [vmem:[#allocation8 + $0x8e0] ss:$8 sps:$4 sm:$0xff]  }
 0x273   :  { %3025 = vmatpush1.bf16.msra.mxu1 %v8466_v48  ;;  %v8540_v48 = vld [vmem:[#allocation8 + $0x1250] ss:$8 sps:$4 sm:$0xff]  }
 0x274   :  { %3035 = vmatprep.subr.bf16.mxu1 %v8474_v54  ;;  %v8537_v54 = vld [vmem:[#allocation8 + $0x8f0] ss:$8 sps:$4 sm:$0xff]  }
 0x275   :  { %6436 = vmatpush1.bf16.msra.mxu0 %v8469_v49  ;;  %v8545_v49 = vld [vmem:[#allocation8 + $0x904] ss:$8 sps:$4 sm:$0xff]  }
 0x276   :  { %3027 = vmatmul.mubr.bf16.vlgmr.msra.gmra.mrb[0].mxu1 %v2603_v56  ;;  %6437 = vmatprep.subr.bf16.mxu0 %v8477_v14  ;;  %v8554_v56 = vld [vmem:[#allocation8 + $0x1274] ss:$8 sps:$4 sm:$0xff]   ;;  %v8543_v14 = vld [vmem:[#allocation8 + $0x900] ss:$8 sps:$4 sm:$0xff]  }
 0x277   :  { %3036 = vmatpush1.bf16.msra.mxu1 %v8472_v5  ;;  %3067 = vmatprep.mubr.bf16.mxu1 %v9028_v50  ;;  %v8560_v5 = vld [vmem:[#allocation8 + $0x1284] ss:$8 sps:$4 sm:$0xff]  }
 0x278   :  { %7136 = vmatprep.subr.msk.bf16.mxu1 %vm9388_vm4, %v7135_v11  ;;  %v8549_v11 = vld [vmem:[#allocation8 + $0x910] ss:$8 sps:$4 sm:$0xff]  }
 0x279   :  { %6438 = vmatpush1.bf16.msra.mxu0 %v8475_v8  ;;  %v8558_v8 = vld [vmem:[#allocation8 + $0x1280] ss:$8 sps:$4 sm:$0xff]  }
 0x27a   :  { %6439 = vmatprep.subr.bf16.mxu0 %v8481_v10  ;;  %v8566_v10 = vld [vmem:[#allocation8 + $0x1294] ss:$8 sps:$4 sm:$0xff]  }
 0x27b   :  { %3038 = vmatpush1.bf16.msra.mxu1 %v2948_v42  ;;  %v8564_v42 = vld [vmem:[#allocation8 + $0x1290] ss:$8 sps:$4 sm:$0xff]  }
 0x27c   :  { %3668 = vmatprep.subr.bf16.mxu1 %v8485_v4  ;;  %v8572_v4 = vld [vmem:[#allocation8 + $0x12a4] ss:$8 sps:$4 sm:$0xff]  }
 0x27d   :  { %6440 = vmatpush1.bf16.msra.mxu0 %v8479_v19  ;;  %v8561_v19 = vld [vmem:[#allocation8 + $0x930] ss:$8 sps:$4 sm:$0xff]  }
 0x27e   :  { %6450 = vmatprep.subr.bf16.mxu0 %v8488_v51  ;;  %v8569_v51 = vld [vmem:[#allocation8 + $0x944] ss:$8 sps:$4 sm:$0xff]  }
 0x280   :  { %6442 = vmatmul.mubr.bf16.vlgmr.msra.gmra.mrb[0].mxu0 %v9283_v24 }
 0x281   :  { %6451 = vmatpush1.bf16.msra.mxu0 %v8486_v62  ;;  %6482 = vmatprep.mubr.bf16.mxu0 %v6060_v18  ;;  %v8578_v62 = vld [vmem:[#allocation8 + $0x12b4] ss:$8 sps:$4 sm:$0xff]   ;;  %v8567_v18 = vld [vmem:[#allocation8 + $0x940] ss:$8 sps:$4 sm:$0xff]  }
 0x282   :  { %7137 = vmatmul.mubr.msk.bf16.vlgmr.msra.gmra.mrb[0].mxu1 %vm1065_vm5, %v2595_v21  ;;  %6452 = vmatprep.subr.bf16.mxu0 %v8494_v34  ;;  %v7467_v21 = vld.sshfl [vmem:[#allocation2 + $0x1c] sm:$0x10 pattern:$0x75316420] }
 0x283   :  { %3669 = vmatpush1.bf16.msra.mxu1 %v8483_v7  ;;  %3700 = vmatprep.mubr.bf16.mxu1 %v8987_v59  ;;  %v8510_v59 = vld [vmem:[#allocation8 + $0x1200] ss:$8 sps:$4 sm:$0xff]   ;;  %v7469_v34 = vld.sshfl [vmem:[#allocation2 + $0x26] sm:$0x10 pattern:$0x75316420] }
 0x284   :  { %3670 = vmatprep.subr.bf16.mxu1 %v8491_v60  ;;  %v8575_v7 = vld [vmem:[#allocation8 + $0x954] ss:$8 sps:$4 sm:$0xff]   ;;  %v7471_v60 = vld.sshfl [vmem:[#allocation2 + $0x44] sm:$0x10 pattern:$0x75316420] }
 0x285   :  { %6453 = vmatpush1.bf16.msra.mxu0 %v8492_v53  ;;  %v8576_v53 = vld [vmem:[#allocation8 + $0x12b0] ss:$8 sps:$4 sm:$0xff]  }
 0x286   :  { %6454 = vmatprep.subr.bf16.mxu0 %v8500_v55  ;;  %v7473_v55 = vld.sshfl [vmem:[#allocation2 + $0x4e] sm:$0x10 pattern:$0x75316420] }
 0x287   :  { %3671 = vmatpush1.bf16.msra.mxu1 %v8489_v36  ;;  %v8581_v36 = vld [vmem:[#allocation8 + $0x12c4] ss:$8 sps:$4 sm:$0xff]  }
 0x288   :  { %3672 = vmatprep.subr.bf16.mxu1 %v8497_v38  ;;  %v8573_v38 = vld [vmem:[#allocation8 + $0x950] ss:$8 sps:$4 sm:$0xff]  }
 0x289   :  { %6455 = vmatpush1.bf16.msra.mxu0 %v8498_v9  ;;  %v6002_v9 = vld [vmem:[#allocation8 + $0x12d0] sm:$0x11] }
 0x28a   :  { %6456 = vmatprep.subr.bf16.mxu0 %v8506_v1  ;;  %v6059_v1 = vcombine.high %v9283_v24, %v9283_v24 }
 0x28b   :  { %3673 = vmatpush1.bf16.msra.mxu1 %v8495_v26  ;;  %v7475_v26 = vcombine.high %v7467_v21, %v7469_v34 }
 0x28c   :  { %3674 = vmatprep.subr.bf16.mxu1 %v8503_v28  ;;  %v7477_v28 = vcombine.high %v7471_v60, %v7473_v55 }
 0x28d   :  { %6457 = vmatpush1.bf16.msra.mxu0 %v8504_v29  ;;  %v8579_v29 = vld [vmem:[#allocation8 + $0x12c0] ss:$8 sps:$4 sm:$0xff]  }
 0x28e   :  { %6458 = vmatprep.subr.bf16.mxu0 %v8512_v30  ;;  %v7545_v30 = vcombine.high %v6002_v9, %v6002_v9 }
 0x28f   :  { %3675 = vmatpush1.bf16.msra.mxu1 %v8501_v31  ;;  %v7544_v31 = vcombine.low %v6002_v9, %v6002_v9 }
 0x290   :  { %3676 = vmatprep.subr.bf16.mxu1 %v8509_v27  ;;  %v6020_v27 = vrot.slane %v7475_v26, %v8968_v25 }
 0x291   :  { %6459 = vmatpush1.bf16.msra.mxu0 %v8510_v59  ;;  %v6034_v59 = vrot.slane %v7477_v28, %v8968_v25  ;;  %v6404_v24 = vsel %vm9391_vm3, %v7544_v31, 0 }
 0x292   :  { %6460 = vmatprep.subr.bf16.mxu0 %v8518_v33 }
 0x293   :  { %3677 = vmatpush1.bf16.msra.mxu1 %v8507_v2  ;;  %v6037_v33 = vcombine.low %v6020_v27, %v6034_v59 }
 0x294   :  { %3678 = vmatprep.subr.bf16.mxu1 %v8515_v35 }
 0x295   :  { %6461 = vmatpush1.bf16.msra.mxu0 %v8516_v32  ;;  %v6051_v2 = vrot.slane %v6037_v33, %v8968_v25 }
 0x296   :  { %6462 = vmatprep.subr.bf16.mxu0 %v8524_v37 }
 0x297   :  { %3679 = vmatpush1.bf16.msra.mxu1 %v8513_v40 }
 0x298   :  { %3680 = vmatprep.subr.bf16.mxu1 %v8521_v41 }
 0x299   :  { %6463 = vmatpush1.bf16.msra.mxu0 %v8522_v16 }
 0x29a   :  { %6464 = vmatprep.subr.bf16.mxu0 %v8530_v44 }
 0x29b   :  { %3681 = vmatpush1.bf16.msra.mxu1 %v8519_v46 }
 0x29c   :  { %3682 = vmatprep.subr.bf16.mxu1 %v8527_v15 }
 0x29d   :  { %6465 = vmatpush1.bf16.msra.mxu0 %v8528_v22 }
 0x29e   :  { %6466 = vmatprep.subr.bf16.mxu0 %v8536_v39 }
 0x29f   :  { %3683 = vmatpush1.bf16.msra.mxu1 %v8525_v43 }
 0x2a0   :  { %3684 = vmatprep.subr.bf16.mxu1 %v8533_v45 }
 0x2a1   :  { %6467 = vmatpush1.bf16.msra.mxu0 %v8534_v58 }
 0x2a2   :  { %6468 = vmatprep.subr.bf16.mxu0 %v8542_v23 }
 0x2a3   :  { %3685 = vmatpush1.bf16.msra.mxu1 %v8531_v63 }
 0x2a4   :  { %3686 = vmatprep.subr.bf16.mxu1 %v8539_v0 }
 0x2a5   :  { %6469 = vmatpush1.bf16.msra.mxu0 %v8540_v48 }
 0x2a6   :  { %6470 = vmatprep.subr.bf16.mxu0 %v8548_v47 }
 0x2a7   :  { %3687 = vmatpush1.bf16.msra.mxu1 %v8537_v54 }
 0x2a8   :  { %3688 = vmatprep.subr.bf16.mxu1 %v8545_v49 }
 0x2a9   :  { %6471 = vmatpush1.bf16.msra.mxu0 %v8546_v12 }
 0x2aa   :  { %6472 = vmatprep.subr.bf16.mxu0 %v8554_v56 }
 0x2ab   :  { %3689 = vmatpush1.bf16.msra.mxu1 %v8543_v14 }
 0x2ac   :  { %3690 = vmatprep.subr.bf16.mxu1 %v8551_v52 }
 0x2ad   :  { %6473 = vmatpush1.bf16.msra.mxu0 %v8552_v57 }
 0x2ae   :  { %6474 = vmatprep.subr.bf16.mxu0 %v8560_v5 }
 0x2af   :  { %3691 = vmatpush1.bf16.msra.mxu1 %v8549_v11 }
 0x2b0   :  { %3692 = vmatprep.subr.bf16.mxu1 %v8557_v6 }
 0x2b1   :  { %6475 = vmatpush1.bf16.msra.mxu0 %v8558_v8 }
 0x2b2   :  { %6476 = vmatprep.subr.bf16.mxu0 %v8566_v10 }
 0x2b3   :  { %3693 = vmatpush1.bf16.msra.mxu1 %v8555_v13 }
 0x2b4   :  { %3694 = vmatprep.subr.bf16.mxu1 %v8563_v17 }
 0x2b5   :  { %6477 = vmatpush1.bf16.msra.mxu0 %v8564_v42 }
 0x2b6   :  { %6478 = vmatprep.subr.bf16.mxu0 %v8572_v4 }
 0x2b7   :  { %3695 = vmatpush1.bf16.msra.mxu1 %v8561_v19 }
 0x2b8   :  { %3696 = vmatprep.subr.bf16.mxu1 %v8569_v51 }
 0x2b9   :  { %6479 = vmatpush1.bf16.msra.mxu0 %v8570_v20 }
 0x2ba   :  { %6480 = vmatprep.subr.bf16.mxu0 %v8578_v62 }
 0x2bb   :  { %3697 = vmatpush1.bf16.msra.mxu1 %v8567_v18 }
 0x2bc   :  { %3698 = vmatprep.subr.bf16.mxu1 %v8575_v7 }
 0x2bd   :  { %6481 = vmatpush1.bf16.msra.mxu0 %v8576_v53 }
 0x2be   :  { %6491 = vmatprep.subr.bf16.mxu0 %v8581_v36 }
 0x2bf   :  { %3699 = vmatpush1.bf16.msra.mxu1 %v8573_v38 }
 0x2c0   :  { %6483 = vmatmul.mubr.bf16.vlgmr.msra.gmra.mrb[0].mxu0 %v6059_v1 }
 0x2c1   :  { %6492 = vmatpush1.bf16.msra.mxu0 %v8579_v29  ;;  %6523 = vmatprep.mubr.bf16.mxu0 %v9028_v50 }
 0x2c2   :  { %3701 = vmatmul.mubr.bf16.vlgmr.msra.gmra.mrb[0].mxu1 %v8994_v3  ;;  %7546 = vmatprep.subr.msk.bf16.mxu0 %vm9390_vm1, %v7545_v30 }
 0x2c5   :  { %6494 = vmatpush1.bf16.msra.mxu0 %v6404_v24 }
 0x2cc   :  { %7547 = vmatmul.mubr.msk.bf16.vlgmr.msra.gmra.mrb[0].mxu0 %vm1065_vm5, %v6051_v2 }
 0x395   :  { %v3702_v35 = vpop.f32.mrb[0].mxu1 }
 0x396   :  { %v3704_v32 = vpop.f32.mrb[1].mxu1 }
 0x397   :  { %v3706_v37 = vpop.f32.mrb[2].mxu1 }
 0x398   :  { %v3707_v40 = vpop.f32.mrb[3].mxu1 }
 0x39f   :  { %v6525_v41 = vpop.f32.mrb[0].mxu0 }
 0x3a0   :  { %v7558_v16 = vadd.f32 %v6525_v41, %v3702_v35  ;;  %v6527_v44 = vpop.f32.mrb[1].mxu0 }
 0x3a1   :  { %v7559_v50 = vadd.f32 %v6527_v44, %v3704_v32  ;;  %v6529_v46 = vpop.f32.mrb[2].mxu0 }
 0x3a2   :  { %v6530_v3 = vpop.f32.mrb[3].mxu0 }
 0x3a3   :  { %v6536_v15 = vcombine.low %v7558_v16, %v7559_v50  ;;  %v6537_v22 = vcombine.high %v7558_v16, %v7559_v50  ;;  %v7548_v39 = vcombine.low %v7559_v50, %v7559_v50  ;;  %v7549_v43 = vcombine.high %v7559_v50, %v7559_v50 }
 0x3a5   :  { %v6545_v45 = vsel %vm6544_vm14, %v6536_v15, 0.0  ;;  %v6552_v58 = vsel %vm6544_vm14, %v7548_v39, 0.0  ;;  %v6559_v23 = vsel %vm6544_vm14, %v6537_v22, 0.0  ;;  %v6566_v63 = vsel %vm6544_vm14, %v7549_v43, 0.0 }
 0x3a6   :  { %v6546_v0 = vrot.slane %v6545_v45, 4  ;;  %v6553_v48 = vrot.slane %v6552_v58, 4  ;;  %v6560_v47 = vrot.slane %v6559_v23, 4  ;;  %v6567_v54 = vrot.slane %v6566_v63, 4 }
 0x3a8   :  { %v6547_v49 = vadd.f32 %v6546_v0, %v6545_v45  ;;  %v6554_v12 = vadd.f32 %v6553_v48, %v6552_v58  ;;  %v6561_v56 = vadd.f32 %v6560_v47, %v6559_v23  ;;  %v6568_v14 = vadd.f32 %v6567_v54, %v6566_v63 }
 0x3aa   :  { %v6548_v52 = vrot.slane %v6547_v49, 2  ;;  %v6555_v57 = vrot.slane %v6554_v12, 2  ;;  %v6562_v5 = vrot.slane %v6561_v56, 2  ;;  %v6569_v11 = vrot.slane %v6568_v14, 2 }
 0x3ac   :  { %v6549_v6 = vadd.f32 %v6548_v52, %v6547_v49  ;;  %v6556_v8 = vadd.f32 %v6555_v57, %v6554_v12  ;;  %v6563_v10 = vadd.f32 %v6562_v5, %v6561_v56  ;;  %v6570_v13 = vadd.f32 %v6569_v11, %v6568_v14 }
 0x3ad   :  { %v8698_v5 = vmov 1983009808  }
 0x3ae   :  { %v6550_v17 = vrot.slane %v6549_v6, 1  ;;  %v6557_v42 = vrot.slane %v6556_v8, 1  ;;  %v6564_v4 = vrot.slane %v6563_v10, 1  ;;  %v6571_v19 = vrot.slane %v6570_v13, 1 }
 0x3af   :  { %v6649_v11 = vunpack.c.l.s4 %v8698_v5 }
 0x3b0   :  { %v6551_v51 = vadd.f32 %v6550_v17, %v6549_v6  ;;  %v6558_v20 = vadd.f32 %v6557_v42, %v6556_v8  ;;  %v6565_v62 = vadd.f32 %v6564_v4, %v6563_v10  ;;  %v6572_v18 = vadd.f32 %v6571_v19, %v6570_v13 }
 0x3b1   :  { %v6650_v6 = vunpack.c.0.s8 %v6649_v11 }
 0x3b2   :  { %v6574_v21 = vmul.f32 0.25, %v6551_v51  ;;  %v6575_v34 = vmul.f32 0.25, %v6558_v20  ;;  %v6576_v7 = vmul.f32 0.25, %v6565_v62  ;;  %v6577_v60 = vmul.f32 0.25, %v6572_v18 }
 0x3b3   :  { %v6653_v4 = vsub.s32 %v6650_v6, %v8819_v61 }
 0x3b4   :  { %v6582_v53 = vcombine.low %v6574_v21, %v6575_v34  ;;  %v6583_v55 = vcombine.low %v6576_v7, %v6577_v60 }
 0x3b6   :  { %v6586_v36 = vsub.f32 %v6536_v15, %v6582_v53  ;;  %v6587_v38 = vsub.f32 %v6537_v22, %v6583_v55 }
 0x3b8   :  { %v6588_v9 = vmul.f32 %v6586_v36, %v6586_v36  ;;  %v6589_v1 = vmul.f32 %v6587_v38, %v6587_v38 }
 0x3ba   :  { %v6592_v26 = vcombine.high %v6588_v9, %v6588_v9  ;;  %v6593_v28 = vcombine.high %v6589_v1, %v6589_v1  ;;  %v6596_v29 = vsel %vm6544_vm14, %v6588_v9, 0.0  ;;  %v6610_v30 = vsel %vm6544_vm14, %v6589_v1, 0.0 }
 0x3bb   :  { %v6597_v31 = vrot.slane %v6596_v29, 4  ;;  %v6611_v27 = vrot.slane %v6610_v30, 4 }
 0x3bc   :  { %v6603_v59 = vsel %vm6544_vm14, %v6592_v26, 0.0  ;;  %v6617_v24 = vsel %vm6544_vm14, %v6593_v28, 0.0 }
 0x3bd   :  { %v6598_v33 = vadd.f32 %v6597_v31, %v6596_v29  ;;  %v6604_v2 = vrot.slane %v6603_v59, 4  ;;  %v6612_v35 = vadd.f32 %v6611_v27, %v6610_v30  ;;  %v6618_v32 = vrot.slane %v6617_v24, 4 }
 0x3bf   :  { %v6599_v37 = vrot.slane %v6598_v33, 2  ;;  %v6605_v40 = vadd.f32 %v6604_v2, %v6603_v59  ;;  %v6613_v41 = vrot.slane %v6612_v35, 2  ;;  %v6619_v16 = vadd.f32 %v6618_v32, %v6617_v24 }
 0x3c1   :  { %v6600_v44 = vadd.f32 %v6599_v37, %v6598_v33  ;;  %v6606_v50 = vrot.slane %v6605_v40, 2  ;;  %v6614_v46 = vadd.f32 %v6613_v41, %v6612_v35  ;;  %v6620_v3 = vrot.slane %v6619_v16, 2 }
 0x3c3   :  { %v6601_v15 = vrot.slane %v6600_v44, 1  ;;  %v6607_v22 = vadd.f32 %v6606_v50, %v6605_v40  ;;  %v6615_v39 = vrot.slane %v6614_v46, 1  ;;  %v6621_v43 = vadd.f32 %v6620_v3, %v6619_v16 }
 0x3c5   :  { %v6602_v45 = vadd.f32 %v6601_v15, %v6600_v44  ;;  %v6608_v58 = vrot.slane %v6607_v22, 1  ;;  %v6616_v23 = vadd.f32 %v6615_v39, %v6614_v46  ;;  %v6622_v63 = vrot.slane %v6621_v43, 1 }
 0x3c7   :  { %v6609_v0 = vadd.f32 %v6608_v58, %v6607_v22  ;;  %v6623_v48 = vadd.f32 %v6622_v63, %v6621_v43  ;;  %v6624_v47 = vmul.f32 0.25, %v6602_v45  ;;  %v6626_v54 = vmul.f32 0.25, %v6616_v23 }
 0x3c9   :  { %v6625_v49 = vmul.f32 0.25, %v6609_v0  ;;  %v6627_v12 = vmul.f32 0.25, %v6623_v48  ;;  %v6628_v56 = vadd.f32 1e-05, %v6624_v47  ;;  %v6630_v14 = vadd.f32 1e-05, %v6626_v54 }
 0x3cb   :  { %v6629_v52 = vadd.f32 1e-05, %v6625_v49  ;;  %v6631_v57 = vadd.f32 1e-05, %v6627_v12  ;;  %8584 = vrsqrt.f32 %v6628_v56 }
 0x3cc   :  { %8586 = vrsqrt.f32 %v6630_v14 }
 0x3cd   :  { %8588 = vrsqrt.f32 %v6629_v52 }
 0x3ce   :  { %8590 = vrsqrt.f32 %v6631_v57 }
 0x3d5   :  { %v8585_v8 = vpop.eup %8584 }
 0x3d6   :  { %v8587_v10 = vpop.eup %8586 }
 0x3d7   :  { %v8589_v13 = vpop.eup %8588 }
 0x3d8   :  { %v8591_v17 = vpop.eup %8590  ;;  %v6640_v42 = vcombine.low %v8585_v8, %v8589_v13 }
 0x3d9   :  { %v6641_v19 = vcombine.low %v8587_v10, %v8591_v17 }
 0x3da   :  { %v6644_v51 = vmul.f32 %v6640_v42, %v6586_v36 }
 0x3db   :  { %v6645_v20 = vmul.f32 %v6641_v19, %v6587_v38 }
 0x3dc   :  { %v6654_v62 = vrot.slane %v6644_v51, %v6653_v4 }
 0x3dd   :  { %v6662_v18 = vrot.slane %v6645_v20, %v6653_v4 }
 0x3de   :  { %v6655_v21 = vcombine.high %v6654_v62, %v6654_v62  ;;  %v6670_v34 = vrot.slane %v6654_v62, %v6653_v4 }
 0x3df   :  { %v6663_v7 = vcombine.high %v6662_v18, %v6662_v18  ;;  %v6686_v60 = vrot.slane %v6662_v18, %v6653_v4 }
 0x3e0   :  { %v6671_v53 = vcombine.high %v6670_v34, %v6670_v34  ;;  %v6678_v55 = vrot.slane %v6655_v21, %v6653_v4 }
 0x3e1   :  { %v6687_v9 = vcombine.high %v6686_v60, %v6686_v60  ;;  %v6694_v1 = vrot.slane %v6663_v7, %v6653_v4 }
 0x3e2   :  { %v6679_v26 = vcombine.high %v6678_v55, %v6678_v55  ;;  %v7550_v28 = vpack.c.bf16 %v6671_v53, %v6670_v34 }
 0x3e3   :  { %v6695_v29 = vcombine.high %v6694_v1, %v6694_v1  ;;  %v7552_v30 = vpack.c.bf16 %v6687_v9, %v6686_v60 }
 0x3e4   :  { %v6727_v31 = vrot.slane %v7550_v28, %v8968_v25  ;;  %v7551_v61 = vpack.c.bf16 %v6679_v26, %v6678_v55 }
 0x3e5   :  { %v6757_v36 = vrot.slane %v7552_v30, %v8968_v25  ;;  %v7553_v38 = vpack.c.bf16 %v6695_v29, %v6694_v1 }
 0x3e6   :  { %v6742_v27 = vrot.slane %v7551_v61, %v8968_v25  ;;  %7554 = vst.sshfl [vmem:[#allocation9] sm:$0x5 pattern:$0x73625140] %v6727_v31 }
 0x3e7   :  { %v6772_v59 = vrot.slane %v7553_v38, %v8968_v25  ;;  %7556 = vst.sshfl [vmem:[#allocation9 + $0x4] sm:$0x5 pattern:$0x73625140] %v6757_v36 }
 0x3e8   :  { %7555 = vst.sshfl [vmem:[#allocation9 + $0x2] sm:$0x5 pattern:$0x73625140] %v6742_v27 }
 0x3e9   :  { %7557 = vst.sshfl [vmem:[#allocation9 + $0x6] sm:$0x5 pattern:$0x73625140] %v6772_v59 }
 0x3ea   :  { %8670 = shalt.err (!%p8667_p0)
}
 0x3eb   :  { %s8671_s29 = scalar_lea.hbm %s9329_s3, 128 }
 0x3ec   :  { %p8672_p1 = scmp.ne.s32.totalorder %s9329_s3, %s8671_s29  ;;  %p8675_p2 = scmp.lt.u32.totalorder %s8671_s29, %s9329_s3 }
 0x3ee   :  { %p8677_p3 = pnand %p8675_p2, %p8672_p1 }
 0x3f0   :  { %8680 = shalt.err (!%p8677_p3)
}
 0x3f1   :  { %s8700_s7 = smov 32   ;;  %s8701_s8 = smov 2  }
 0x3f2   :  { %6799 = dma.vmem_to_hbm [thread:$0]  %s6794_s25, 128, %s9329_s3, [#allocation5], %s8700_s7, %s8700_s7, %s8701_s8  }
 0x3f3   :  { %8685 = dma.done.wait [#allocation5], 128  }
 0x3f4   :  { %8686 = vsyncadd [#allocation5], 4294967168 }
 0x3f5   :  { %6803 = vsyncpa [#allocation4], 1 }
 0x3f6   :  { %6804 = vsyncpa [#allocation7], 1 }
 0x3f7   :  { %6805 = vsyncpa [#allocation5], 1 }

</bundles_post_ra>
